<compile_context>
chip_gen: v6e
topology: v6e:2x2x1
jax: 0.10.0
libtpu: 0.0.40
codegen_flags: <defaults>
</compile_context>

<pallas_src>
import functools
import math

import jax
import jax.numpy as jnp
from jax.experimental import pallas as pl
from jax.experimental.pallas import tpu as pltpu


def _rep_matrix(w, s, dtype):
    """(W, W*s) 0/1 matrix R with R[w, wo] = 1 iff wo // s == w.

    `y @ R` replicates every element of the lane axis s times, exactly, on the
    MXU (avoids fragile lane-interleaving reshapes).  Built once per call in
    the wrapper and passed in as a VMEM-resident input.
    """
    rows = jnp.arange(w, dtype=jnp.int32)[:, None]
    cols = jnp.arange(w * s, dtype=jnp.int32)[None, :]
    return (cols // s == rows).astype(dtype)


def _upsample_kernel(x_ref, rep_ref, o_ref, *, scale, precision):
    # x_ref: (C, TH, W)   rep_ref: (W, W*s)   o_ref: (C, TH*s, W*s)
    c, th, w = x_ref.shape
    s = scale
    ws = w * s
    x2 = x_ref[...].reshape(c * th, w)            # collapse leading dims (lane kept)
    xr = jnp.dot(x2, rep_ref[...], preferred_element_type=jnp.float32,
                 precision=precision)             # exact W-replication on the MXU
    xr = xr.astype(o_ref.dtype).reshape(c, th, ws)
    out = jnp.broadcast_to(xr[:, :, None, :], (c, th, s, ws)).reshape(c, th * s, ws)
    o_ref[...] = out


def _upsample_conv_kernel(x_ref, w_ref, b_ref, rep_ref, o_ref, ys_ref,
                          *, scale, precision):
    # x_ref:  (Cin, TH, W)      w_ref: (Cout, Cin)   b_ref: (Cout, 1, 1) f32
    # rep_ref:(W, W*s)          o_ref: (Cout, TH*s, W*s)
    # ys_ref: (Cout, TH, W) f32 scratch (pre-replication conv output)
    cin, th, w = x_ref.shape
    cout = w_ref.shape[0]
    s = scale
    ws = w * s
    wt = w_ref[...]                               # loop-invariant weight load

    # 1x1 conv commutes with nearest replication -> conv on the small
    # pre-upsample rows (s^2 less MXU work).  Rows go to an f32 VMEM scratch;
    # bias / replication / HBM store happen once per tile afterwards.
    def conv_row(t, carry):
        xt = x_ref[:, pl.ds(t, 1), :].reshape(cin, w)                      # (Cin, W)
        yt = jnp.dot(wt, xt, preferred_element_type=jnp.float32,
                     precision=precision)                                  # (Cout, W)
        ys_ref[:, pl.ds(t, 1), :] = yt.reshape(cout, 1, w)
        return carry

    if th <= 32:                                  # small tile: straight unroll
        for t in range(th):
            conv_row(t, 0)
    else:                                         # big tile: no unroll explosion
        jax.lax.fori_loop(0, th, conv_row, 0)

    y = ys_ref[...] + b_ref[...]                  # one bias broadcast per tile
    y2 = y.reshape(cout * th, w).astype(rep_ref.dtype)        # safe reshape
    yw = jnp.dot(y2, rep_ref[...], preferred_element_type=jnp.float32,
                 precision=precision)             # ONE big W-replication matmul
    yw = yw.astype(o_ref.dtype).reshape(cout, th, ws)
    out = jnp.broadcast_to(yw[:, :, None, :], (cout, th, s, ws)).reshape(cout, th * s, ws)
    o_ref[...] = out                              # single lane-dense tile store


def _pick_rows(h, n_batch, mult, tile_bytes_fn, max_tile_bytes, min_steps=8):
    """Largest legal H-tile (multiple of `mult` dividing H, or full H) whose
    total resident VMEM footprint fits the budget, preferring tiles that leave
    at least `min_steps` grid steps so megacore + double-buffering stay busy."""
    divs = [t for t in range(1, h + 1) if h % t == 0]
    cands = sorted({t for t in divs if t % mult == 0} | {h})
    fits = [t for t in cands if tile_bytes_fn(t) <= max_tile_bytes]
    if not fits:
        return cands[0]                           # smallest legal tile
    pipelined = [t for t in fits if n_batch * (h // t) >= min_steps]
    return max(pipelined) if pipelined else max(fits)


class Upsample:
    """JAX/Pallas port of the PyTorch Upsample module (nearest, integer scale)."""

    def __init__(self, scale_factor, mode='nearest', in_channels=None,
                 out_channels=None, align_corners=False, *, key=None):
        assert mode == 'nearest', "only nearest-neighbor upsampling implemented"
        assert int(scale_factor) == scale_factor, "integer scale_factor only"
        self.scale_factor = int(scale_factor)
        self.mode = mode
        self.align_corners = align_corners
        self.in_channels = in_channels
        self.out_channels = out_channels

        if in_channels != out_channels:
            # Deterministic Conv2d(in, out, kernel_size=1) init (PyTorch-style
            # uniform bounds), shapes: weight (out, in, 1, 1), bias (out,).
            if key is None:
                key = jax.random.PRNGKey(0)
            kw, kb = jax.random.split(key)
            bound = 1.0 / math.sqrt(in_channels)   # fan_in = in_channels * 1 * 1
            self.weight = jax.random.uniform(
                kw, (out_channels, in_channels, 1, 1), jnp.float32, -bound, bound)
            self.bias = jax.random.uniform(
                kb, (out_channels,), jnp.float32, -bound, bound)
        else:
            self.weight = None
            self.bias = None

    def __call__(self, x):
        # x: NCHW -> NCHW, no layout round trips.
        n, c, h, w = x.shape
        s = self.scale_factor
        hs, ws = h * s, w * s
        dt = jnp.dtype(x.dtype)
        item = dt.itemsize
        prec = jax.lax.Precision.HIGHEST if dt == jnp.dtype(jnp.float32) else None

        # VMEM capacity -> budgets (conservative default = v7x's 64 MiB / TC).
        try:
            cap = int(getattr(pltpu.get_tpu_info(), 'vmem_capacity_bytes',
                              64 * 1024 * 1024))
        except Exception:
            cap = 64 * 1024 * 1024
        vmem_limit = min(int(cap * 0.70), 100 * 1024 * 1024)
        tile_budget = min(int(cap * 0.20), 28 * 1024 * 1024)

        # Sublane packing: 8 rows (f32) / 16 (bf16) / 32 (int8/fp8).
        mult = max(8, 32 // item)

        compiler_params = pltpu.CompilerParams(
            dimension_semantics=("parallel", "parallel"),
            vmem_limit_bytes=vmem_limit)

        rep = _rep_matrix(w, s, x.dtype)

        if self.weight is None:
            def tile_bytes(t):
                return (2 * c * t * w * item                 # input blocks (x2 buf)
                        + 2 * c * t * s * ws * item          # output blocks (x2 buf)
                        + 2 * w * ws * item                  # rep matrix
                        + c * t * ws * 4                     # f32 rep-matmul result
                        + c * t * s * ws * item)             # broadcast temp pre-store

            th = _pick_rows(h, n, mult, tile_bytes, tile_budget)
            cost = pl.CostEstimate(
                flops=2 * n * c * h * w * ws,
                transcendentals=0,
                bytes_accessed=(n * c * h * w + n * c * hs * ws + w * ws) * item)
            out = pl.pallas_call(
                functools.partial(_upsample_kernel, scale=s, precision=prec),
                out_shape=jax.ShapeDtypeStruct((n, c, hs, ws), x.dtype),
                grid=(n, h // th),
                in_specs=[
                    pl.BlockSpec((None, c, th, w), lambda b, i: (b, 0, i, 0)),
                    pl.BlockSpec((w, ws), lambda b, i: (0, 0)),
                ],
                out_specs=pl.BlockSpec((None, c, th * s, ws),
                                       lambda b, i: (b, 0, i, 0)),
                compiler_params=compiler_params,
                cost_estimate=cost,
            )(x, rep)
        else:
            cin, cout = self.in_channels, self.out_channels
            # Weight on the input dtype (bf16 MXU path for bf16 activations);
            # bias stays f32 and is added to the f32 accumulator once per tile.
            w2 = self.weight.reshape(cout, cin).astype(x.dtype)
            b2 = self.bias.reshape(cout, 1, 1).astype(jnp.float32)

            def tile_bytes(t):
                return (2 * cin * t * w * item               # input blocks (x2 buf)
                        + 2 * cout * t * s * ws * item       # output blocks (x2 buf)
                        + 2 * (w * ws * item + cout * cin * item + cout * 4)  # rep+weights
                        + cout * t * w * 4                   # f32 conv scratch
                        + cout * t * ws * 4                  # rep-matmul result
                        + cout * t * s * ws * item)          # broadcast temp pre-store

            th = _pick_rows(h, n, mult, tile_bytes, tile_budget)
            cost = pl.CostEstimate(
                flops=2 * n * cin * cout * h * w + 2 * n * cout * h * w * ws,
                transcendentals=0,
                bytes_accessed=(n * cin * h * w + n * cout * hs * ws
                                + cout * cin + w * ws) * item + cout * 4)
            out = pl.pallas_call(
                functools.partial(_upsample_conv_kernel, scale=s, precision=prec),
                out_shape=jax.ShapeDtypeStruct((n, cout, hs, ws), x.dtype),
                grid=(n, h // th),
                in_specs=[
                    pl.BlockSpec((None, cin, th, w), lambda b, i: (b, 0, i, 0)),
                    pl.BlockSpec((cout, cin), lambda b, i: (0, 0)),
                    pl.BlockSpec((cout, 1, 1), lambda b, i: (0, 0, 0)),
                    pl.BlockSpec((w, ws), lambda b, i: (0, 0)),
                ],
                out_specs=pl.BlockSpec((None, cout, th * s, ws),
                                       lambda b, i: (b, 0, i, 0)),
                scratch_shapes=[pltpu.VMEM((cout, th, w), jnp.float32)],
                compiler_params=compiler_params,
                cost_estimate=cost,
            )(x, w2, b2, rep)
        return out


def _reference(x, scale, weight, bias):
    # Pure-JAX reference for validation (nearest upsample + optional 1x1 conv).
    up = jnp.repeat(jnp.repeat(x, scale, axis=2), scale, axis=3)
    if weight is None:
        return up
    w = weight.reshape(weight.shape[0], weight.shape[1])       # (Cout, Cin)
    y = jnp.einsum('oc,nchw->nohw', w, up,
                   precision=jax.lax.Precision.HIGHEST)
    return y + bias[None, :, None, None]


if __name__ == "__main__":
    key = jax.random.PRNGKey(0)
    kx, kmod = jax.random.split(key)

    # Small NCHW input consistent with the module's forward: (2, 4, 16, 16)
    x = jax.random.normal(kx, (2, 4, 16, 16), dtype=jnp.float32)

    # Case 1: in_channels != out_channels -> nearest upsample + 1x1 conv
    mod = Upsample(scale_factor=2, mode='nearest',
                   in_channels=4, out_channels=8, key=kmod)
    out = jax.block_until_ready(mod(x))
    ref = _reference(x, 2, mod.weight, mod.bias)
    assert out.shape == (2, 8, 32, 32), out.shape
    assert jnp.allclose(out, ref, atol=1e-5, rtol=1e-5), "conv path mismatch"

    # Case 2: in_channels == out_channels -> pure nearest upsample
    mod2 = Upsample(scale_factor=2, mode='nearest',
                    in_channels=4, out_channels=4)
    out2 = jax.block_until_ready(mod2(x))
    ref2 = _reference(x, 2, None, None)
    assert out2.shape == (2, 4, 32, 32), out2.shape
    assert jnp.allclose(out2, ref2, atol=1e-6, rtol=1e-6), "upsample path mismatch"

    print("KERNEL_OK")
</pallas_src>

<mosaic_0001>
module attributes {stable_mosaic.version = 11 : i64} {
  func.func @_upsample_conv_kernel(%arg0: i32, %arg1: i32, %arg2: memref<1x4x16x16xf32, #tpu.memory_space<vmem>>, %arg3: memref<8x4xf32, #tpu.memory_space<vmem>>, %arg4: memref<8x1x1xf32, #tpu.memory_space<vmem>>, %arg5: memref<16x32xf32, #tpu.memory_space<vmem>>, %arg6: memref<1x8x32x32xf32, #tpu.memory_space<vmem>>, %arg7: memref<8x16x16xf32, #tpu.memory_space<vmem>>) attributes {dimension_semantics = [#tpu.dimension_semantics<parallel>, #tpu.dimension_semantics<parallel>], iteration_bounds = array<i64: 2, 1>, scalar_prefetch = 0 : i64, scratch_operands = 1 : i64, tpu.core_type = #tpu.core_type<tc>, window_params = [{transform_indices = @transform_0, window_bounds = array<i64: 1, 4, 16, 16>}, {pipeline_mode = #tpu.pipeline_mode<synchronous>, transform_indices = @transform_1, window_bounds = array<i64: 8, 4>}, {pipeline_mode = #tpu.pipeline_mode<synchronous>, transform_indices = @transform_2, window_bounds = array<i64: 8, 1, 1>}, {pipeline_mode = #tpu.pipeline_mode<synchronous>, transform_indices = @transform_3, window_bounds = array<i64: 16, 32>}, {transform_indices = @transform_4, window_bounds = array<i64: 1, 8, 32, 32>}]} {
    %c0 = arith.constant 0 : index
    %c0_0 = arith.constant 0 : index
    %0 = vector.load %arg3[%c0, %c0_0] : memref<8x4xf32, #tpu.memory_space<vmem>>, vector<8x4xf32>
    %c0_1 = arith.constant 0 : index
    %c0_2 = arith.constant 0 : index
    %c0_3 = arith.constant 0 : index
    %c0_4 = arith.constant 0 : index
    %1 = vector.load %arg2[%c0_1, %c0_2, %c0_3, %c0_4] : memref<1x4x16x16xf32, #tpu.memory_space<vmem>>, vector<1x4x1x16xf32>
    %2 = vector.shape_cast %1 : vector<1x4x1x16xf32> to vector<4x1x16xf32>
    %3 = vector.shape_cast %2 : vector<4x1x16xf32> to vector<4x16xf32>
    %cst = arith.constant dense<0.000000e+00> : vector<8x16xf32>
    %4 = tpu.matmul %0, %3, %cst {dimension_numbers = #tpu.dot_dimension_numbers<[1], [0], [0], [1], [0, 0, 1, 1], [], []>, precision = #tpu.contract_precision<fp32>} : vector<8x4xf32>, vector<4x16xf32>, vector<8x16xf32> -> vector<8x16xf32>
    %5 = vector.shape_cast %4 : vector<8x16xf32> to vector<8x1x16xf32>
    %c0_5 = arith.constant 0 : index
    %c0_6 = arith.constant 0 : index
    %c0_7 = arith.constant 0 : index
    %6 = vector.load %arg7[%c0_5, %c0_6, %c0_7] : memref<8x16x16xf32, #tpu.memory_space<vmem>>, vector<8x1x16xf32>
    tpu.vector_store %arg7[%c0_5, %c0_6, %c0_7], %5 {strides = array<i32>} : memref<8x16x16xf32, #tpu.memory_space<vmem>>, vector<8x1x16xf32>,
    %c0_8 = arith.constant 0 : index
    %c0_9 = arith.constant 0 : index
    %c1 = arith.constant 1 : index
    %c0_10 = arith.constant 0 : index
    %7 = vector.load %arg2[%c0_8, %c0_9, %c1, %c0_10] : memref<1x4x16x16xf32, #tpu.memory_space<vmem>>, vector<1x4x1x16xf32>
    %8 = vector.shape_cast %7 : vector<1x4x1x16xf32> to vector<4x1x16xf32>
    %9 = vector.shape_cast %8 : vector<4x1x16xf32> to vector<4x16xf32>
    %cst_11 = arith.constant dense<0.000000e+00> : vector<8x16xf32>
    %10 = tpu.matmul %0, %9, %cst_11 {dimension_numbers = #tpu.dot_dimension_numbers<[1], [0], [0], [1], [0, 0, 1, 1], [], []>, precision = #tpu.contract_precision<fp32>} : vector<8x4xf32>, vector<4x16xf32>, vector<8x16xf32> -> vector<8x16xf32>
    %11 = vector.shape_cast %10 : vector<8x16xf32> to vector<8x1x16xf32>
    %c0_12 = arith.constant 0 : index
    %c1_13 = arith.constant 1 : index
    %c0_14 = arith.constant 0 : index
    %12 = vector.load %arg7[%c0_12, %c1_13, %c0_14] : memref<8x16x16xf32, #tpu.memory_space<vmem>>, vector<8x1x16xf32>
    tpu.vector_store %arg7[%c0_12, %c1_13, %c0_14], %11 {strides = array<i32>} : memref<8x16x16xf32, #tpu.memory_space<vmem>>, vector<8x1x16xf32>,
    %c0_15 = arith.constant 0 : index
    %c0_16 = arith.constant 0 : index
    %c2 = arith.constant 2 : index
    %c0_17 = arith.constant 0 : index
    %13 = vector.load %arg2[%c0_15, %c0_16, %c2, %c0_17] : memref<1x4x16x16xf32, #tpu.memory_space<vmem>>, vector<1x4x1x16xf32>
    %14 = vector.shape_cast %13 : vector<1x4x1x16xf32> to vector<4x1x16xf32>
    %15 = vector.shape_cast %14 : vector<4x1x16xf32> to vector<4x16xf32>
    %cst_18 = arith.constant dense<0.000000e+00> : vector<8x16xf32>
    %16 = tpu.matmul %0, %15, %cst_18 {dimension_numbers = #tpu.dot_dimension_numbers<[1], [0], [0], [1], [0, 0, 1, 1], [], []>, precision = #tpu.contract_precision<fp32>} : vector<8x4xf32>, vector<4x16xf32>, vector<8x16xf32> -> vector<8x16xf32>
    %17 = vector.shape_cast %16 : vector<8x16xf32> to vector<8x1x16xf32>
    %c0_19 = arith.constant 0 : index
    %c2_20 = arith.constant 2 : index
    %c0_21 = arith.constant 0 : index
    %18 = vector.load %arg7[%c0_19, %c2_20, %c0_21] : memref<8x16x16xf32, #tpu.memory_space<vmem>>, vector<8x1x16xf32>
    tpu.vector_store %arg7[%c0_19, %c2_20, %c0_21], %17 {strides = array<i32>} : memref<8x16x16xf32, #tpu.memory_space<vmem>>, vector<8x1x16xf32>,
    %c0_22 = arith.constant 0 : index
    %c0_23 = arith.constant 0 : index
    %c3 = arith.constant 3 : index
    %c0_24 = arith.constant 0 : index
    %19 = vector.load %arg2[%c0_22, %c0_23, %c3, %c0_24] : memref<1x4x16x16xf32, #tpu.memory_space<vmem>>, vector<1x4x1x16xf32>
    %20 = vector.shape_cast %19 : vector<1x4x1x16xf32> to vector<4x1x16xf32>
    %21 = vector.shape_cast %20 : vector<4x1x16xf32> to vector<4x16xf32>
    %cst_25 = arith.constant dense<0.000000e+00> : vector<8x16xf32>
    %22 = tpu.matmul %0, %21, %cst_25 {dimension_numbers = #tpu.dot_dimension_numbers<[1], [0], [0], [1], [0, 0, 1, 1], [], []>, precision = #tpu.contract_precision<fp32>} : vector<8x4xf32>, vector<4x16xf32>, vector<8x16xf32> -> vector<8x16xf32>
    %23 = vector.shape_cast %22 : vector<8x16xf32> to vector<8x1x16xf32>
    %c0_26 = arith.constant 0 : index
    %c3_27 = arith.constant 3 : index
    %c0_28 = arith.constant 0 : index
    %24 = vector.load %arg7[%c0_26, %c3_27, %c0_28] : memref<8x16x16xf32, #tpu.memory_space<vmem>>, vector<8x1x16xf32>
    tpu.vector_store %arg7[%c0_26, %c3_27, %c0_28], %23 {strides = array<i32>} : memref<8x16x16xf32, #tpu.memory_space<vmem>>, vector<8x1x16xf32>,
    %c0_29 = arith.constant 0 : index
    %c0_30 = arith.constant 0 : index
    %c4 = arith.constant 4 : index
    %c0_31 = arith.constant 0 : index
    %25 = vector.load %arg2[%c0_29, %c0_30, %c4, %c0_31] : memref<1x4x16x16xf32, #tpu.memory_space<vmem>>, vector<1x4x1x16xf32>
    %26 = vector.shape_cast %25 : vector<1x4x1x16xf32> to vector<4x1x16xf32>
    %27 = vector.shape_cast %26 : vector<4x1x16xf32> to vector<4x16xf32>
    %cst_32 = arith.constant dense<0.000000e+00> : vector<8x16xf32>
    %28 = tpu.matmul %0, %27, %cst_32 {dimension_numbers = #tpu.dot_dimension_numbers<[1], [0], [0], [1], [0, 0, 1, 1], [], []>, precision = #tpu.contract_precision<fp32>} : vector<8x4xf32>, vector<4x16xf32>, vector<8x16xf32> -> vector<8x16xf32>
    %29 = vector.shape_cast %28 : vector<8x16xf32> to vector<8x1x16xf32>
    %c0_33 = arith.constant 0 : index
    %c4_34 = arith.constant 4 : index
    %c0_35 = arith.constant 0 : index
    %30 = vector.load %arg7[%c0_33, %c4_34, %c0_35] : memref<8x16x16xf32, #tpu.memory_space<vmem>>, vector<8x1x16xf32>
    tpu.vector_store %arg7[%c0_33, %c4_34, %c0_35], %29 {strides = array<i32>} : memref<8x16x16xf32, #tpu.memory_space<vmem>>, vector<8x1x16xf32>,
    %c0_36 = arith.constant 0 : index
    %c0_37 = arith.constant 0 : index
    %c5 = arith.constant 5 : index
    %c0_38 = arith.constant 0 : index
    %31 = vector.load %arg2[%c0_36, %c0_37, %c5, %c0_38] : memref<1x4x16x16xf32, #tpu.memory_space<vmem>>, vector<1x4x1x16xf32>
    %32 = vector.shape_cast %31 : vector<1x4x1x16xf32> to vector<4x1x16xf32>
    %33 = vector.shape_cast %32 : vector<4x1x16xf32> to vector<4x16xf32>
    %cst_39 = arith.constant dense<0.000000e+00> : vector<8x16xf32>
    %34 = tpu.matmul %0, %33, %cst_39 {dimension_numbers = #tpu.dot_dimension_numbers<[1], [0], [0], [1], [0, 0, 1, 1], [], []>, precision = #tpu.contract_precision<fp32>} : vector<8x4xf32>, vector<4x16xf32>, vector<8x16xf32> -> vector<8x16xf32>
    %35 = vector.shape_cast %34 : vector<8x16xf32> to vector<8x1x16xf32>
    %c0_40 = arith.constant 0 : index
    %c5_41 = arith.constant 5 : index
    %c0_42 = arith.constant 0 : index
    %36 = vector.load %arg7[%c0_40, %c5_41, %c0_42] : memref<8x16x16xf32, #tpu.memory_space<vmem>>, vector<8x1x16xf32>
    tpu.vector_store %arg7[%c0_40, %c5_41, %c0_42], %35 {strides = array<i32>} : memref<8x16x16xf32, #tpu.memory_space<vmem>>, vector<8x1x16xf32>,
    %c0_43 = arith.constant 0 : index
    %c0_44 = arith.constant 0 : index
    %c6 = arith.constant 6 : index
    %c0_45 = arith.constant 0 : index
    %37 = vector.load %arg2[%c0_43, %c0_44, %c6, %c0_45] : memref<1x4x16x16xf32, #tpu.memory_space<vmem>>, vector<1x4x1x16xf32>
    %38 = vector.shape_cast %37 : vector<1x4x1x16xf32> to vector<4x1x16xf32>
    %39 = vector.shape_cast %38 : vector<4x1x16xf32> to vector<4x16xf32>
    %cst_46 = arith.constant dense<0.000000e+00> : vector<8x16xf32>
    %40 = tpu.matmul %0, %39, %cst_46 {dimension_numbers = #tpu.dot_dimension_numbers<[1], [0], [0], [1], [0, 0, 1, 1], [], []>, precision = #tpu.contract_precision<fp32>} : vector<8x4xf32>, vector<4x16xf32>, vector<8x16xf32> -> vector<8x16xf32>
    %41 = vector.shape_cast %40 : vector<8x16xf32> to vector<8x1x16xf32>
    %c0_47 = arith.constant 0 : index
    %c6_48 = arith.constant 6 : index
    %c0_49 = arith.constant 0 : index
    %42 = vector.load %arg7[%c0_47, %c6_48, %c0_49] : memref<8x16x16xf32, #tpu.memory_space<vmem>>, vector<8x1x16xf32>
    tpu.vector_store %arg7[%c0_47, %c6_48, %c0_49], %41 {strides = array<i32>} : memref<8x16x16xf32, #tpu.memory_space<vmem>>, vector<8x1x16xf32>,
    %c0_50 = arith.constant 0 : index
    %c0_51 = arith.constant 0 : index
    %c7 = arith.constant 7 : index
    %c0_52 = arith.constant 0 : index
    %43 = vector.load %arg2[%c0_50, %c0_51, %c7, %c0_52] : memref<1x4x16x16xf32, #tpu.memory_space<vmem>>, vector<1x4x1x16xf32>
    %44 = vector.shape_cast %43 : vector<1x4x1x16xf32> to vector<4x1x16xf32>
    %45 = vector.shape_cast %44 : vector<4x1x16xf32> to vector<4x16xf32>
    %cst_53 = arith.constant dense<0.000000e+00> : vector<8x16xf32>
    %46 = tpu.matmul %0, %45, %cst_53 {dimension_numbers = #tpu.dot_dimension_numbers<[1], [0], [0], [1], [0, 0, 1, 1], [], []>, precision = #tpu.contract_precision<fp32>} : vector<8x4xf32>, vector<4x16xf32>, vector<8x16xf32> -> vector<8x16xf32>
    %47 = vector.shape_cast %46 : vector<8x16xf32> to vector<8x1x16xf32>
    %c0_54 = arith.constant 0 : index
    %c7_55 = arith.constant 7 : index
    %c0_56 = arith.constant 0 : index
    %48 = vector.load %arg7[%c0_54, %c7_55, %c0_56] : memref<8x16x16xf32, #tpu.memory_space<vmem>>, vector<8x1x16xf32>
    tpu.vector_store %arg7[%c0_54, %c7_55, %c0_56], %47 {strides = array<i32>} : memref<8x16x16xf32, #tpu.memory_space<vmem>>, vector<8x1x16xf32>,
    %c0_57 = arith.constant 0 : index
    %c0_58 = arith.constant 0 : index
    %c8 = arith.constant 8 : index
    %c0_59 = arith.constant 0 : index
    %49 = vector.load %arg2[%c0_57, %c0_58, %c8, %c0_59] : memref<1x4x16x16xf32, #tpu.memory_space<vmem>>, vector<1x4x1x16xf32>
    %50 = vector.shape_cast %49 : vector<1x4x1x16xf32> to vector<4x1x16xf32>
    %51 = vector.shape_cast %50 : vector<4x1x16xf32> to vector<4x16xf32>
    %cst_60 = arith.constant dense<0.000000e+00> : vector<8x16xf32>
    %52 = tpu.matmul %0, %51, %cst_60 {dimension_numbers = #tpu.dot_dimension_numbers<[1], [0], [0], [1], [0, 0, 1, 1], [], []>, precision = #tpu.contract_precision<fp32>} : vector<8x4xf32>, vector<4x16xf32>, vector<8x16xf32> -> vector<8x16xf32>
    %53 = vector.shape_cast %52 : vector<8x16xf32> to vector<8x1x16xf32>
    %c0_61 = arith.constant 0 : index
    %c8_62 = arith.constant 8 : index
    %c0_63 = arith.constant 0 : index
    %54 = vector.load %arg7[%c0_61, %c8_62, %c0_63] : memref<8x16x16xf32, #tpu.memory_space<vmem>>, vector<8x1x16xf32>
    tpu.vector_store %arg7[%c0_61, %c8_62, %c0_63], %53 {strides = array<i32>} : memref<8x16x16xf32, #tpu.memory_space<vmem>>, vector<8x1x16xf32>,
    %c0_64 = arith.constant 0 : index
    %c0_65 = arith.constant 0 : index
    %c9 = arith.constant 9 : index
    %c0_66 = arith.constant 0 : index
    %55 = vector.load %arg2[%c0_64, %c0_65, %c9, %c0_66] : memref<1x4x16x16xf32, #tpu.memory_space<vmem>>, vector<1x4x1x16xf32>
    %56 = vector.shape_cast %55 : vector<1x4x1x16xf32> to vector<4x1x16xf32>
    %57 = vector.shape_cast %56 : vector<4x1x16xf32> to vector<4x16xf32>
    %cst_67 = arith.constant dense<0.000000e+00> : vector<8x16xf32>
    %58 = tpu.matmul %0, %57, %cst_67 {dimension_numbers = #tpu.dot_dimension_numbers<[1], [0], [0], [1], [0, 0, 1, 1], [], []>, precision = #tpu.contract_precision<fp32>} : vector<8x4xf32>, vector<4x16xf32>, vector<8x16xf32> -> vector<8x16xf32>
    %59 = vector.shape_cast %58 : vector<8x16xf32> to vector<8x1x16xf32>
    %c0_68 = arith.constant 0 : index
    %c9_69 = arith.constant 9 : index
    %c0_70 = arith.constant 0 : index
    %60 = vector.load %arg7[%c0_68, %c9_69, %c0_70] : memref<8x16x16xf32, #tpu.memory_space<vmem>>, vector<8x1x16xf32>
    tpu.vector_store %arg7[%c0_68, %c9_69, %c0_70], %59 {strides = array<i32>} : memref<8x16x16xf32, #tpu.memory_space<vmem>>, vector<8x1x16xf32>,
    %c0_71 = arith.constant 0 : index
    %c0_72 = arith.constant 0 : index
    %c10 = arith.constant 10 : index
    %c0_73 = arith.constant 0 : index
    %61 = vector.load %arg2[%c0_71, %c0_72, %c10, %c0_73] : memref<1x4x16x16xf32, #tpu.memory_space<vmem>>, vector<1x4x1x16xf32>
    %62 = vector.shape_cast %61 : vector<1x4x1x16xf32> to vector<4x1x16xf32>
    %63 = vector.shape_cast %62 : vector<4x1x16xf32> to vector<4x16xf32>
    %cst_74 = arith.constant dense<0.000000e+00> : vector<8x16xf32>
    %64 = tpu.matmul %0, %63, %cst_74 {dimension_numbers = #tpu.dot_dimension_numbers<[1], [0], [0], [1], [0, 0, 1, 1], [], []>, precision = #tpu.contract_precision<fp32>} : vector<8x4xf32>, vector<4x16xf32>, vector<8x16xf32> -> vector<8x16xf32>
    %65 = vector.shape_cast %64 : vector<8x16xf32> to vector<8x1x16xf32>
    %c0_75 = arith.constant 0 : index
    %c10_76 = arith.constant 10 : index
    %c0_77 = arith.constant 0 : index
    %66 = vector.load %arg7[%c0_75, %c10_76, %c0_77] : memref<8x16x16xf32, #tpu.memory_space<vmem>>, vector<8x1x16xf32>
    tpu.vector_store %arg7[%c0_75, %c10_76, %c0_77], %65 {strides = array<i32>} : memref<8x16x16xf32, #tpu.memory_space<vmem>>, vector<8x1x16xf32>,
    %c0_78 = arith.constant 0 : index
    %c0_79 = arith.constant 0 : index
    %c11 = arith.constant 11 : index
    %c0_80 = arith.constant 0 : index
    %67 = vector.load %arg2[%c0_78, %c0_79, %c11, %c0_80] : memref<1x4x16x16xf32, #tpu.memory_space<vmem>>, vector<1x4x1x16xf32>
    %68 = vector.shape_cast %67 : vector<1x4x1x16xf32> to vector<4x1x16xf32>
    %69 = vector.shape_cast %68 : vector<4x1x16xf32> to vector<4x16xf32>
    %cst_81 = arith.constant dense<0.000000e+00> : vector<8x16xf32>
    %70 = tpu.matmul %0, %69, %cst_81 {dimension_numbers = #tpu.dot_dimension_numbers<[1], [0], [0], [1], [0, 0, 1, 1], [], []>, precision = #tpu.contract_precision<fp32>} : vector<8x4xf32>, vector<4x16xf32>, vector<8x16xf32> -> vector<8x16xf32>
    %71 = vector.shape_cast %70 : vector<8x16xf32> to vector<8x1x16xf32>
    %c0_82 = arith.constant 0 : index
    %c11_83 = arith.constant 11 : index
    %c0_84 = arith.constant 0 : index
    %72 = vector.load %arg7[%c0_82, %c11_83, %c0_84] : memref<8x16x16xf32, #tpu.memory_space<vmem>>, vector<8x1x16xf32>
    tpu.vector_store %arg7[%c0_82, %c11_83, %c0_84], %71 {strides = array<i32>} : memref<8x16x16xf32, #tpu.memory_space<vmem>>, vector<8x1x16xf32>,
    %c0_85 = arith.constant 0 : index
    %c0_86 = arith.constant 0 : index
    %c12 = arith.constant 12 : index
    %c0_87 = arith.constant 0 : index
    %73 = vector.load %arg2[%c0_85, %c0_86, %c12, %c0_87] : memref<1x4x16x16xf32, #tpu.memory_space<vmem>>, vector<1x4x1x16xf32>
    %74 = vector.shape_cast %73 : vector<1x4x1x16xf32> to vector<4x1x16xf32>
    %75 = vector.shape_cast %74 : vector<4x1x16xf32> to vector<4x16xf32>
    %cst_88 = arith.constant dense<0.000000e+00> : vector<8x16xf32>
    %76 = tpu.matmul %0, %75, %cst_88 {dimension_numbers = #tpu.dot_dimension_numbers<[1], [0], [0], [1], [0, 0, 1, 1], [], []>, precision = #tpu.contract_precision<fp32>} : vector<8x4xf32>, vector<4x16xf32>, vector<8x16xf32> -> vector<8x16xf32>
    %77 = vector.shape_cast %76 : vector<8x16xf32> to vector<8x1x16xf32>
    %c0_89 = arith.constant 0 : index
    %c12_90 = arith.constant 12 : index
    %c0_91 = arith.constant 0 : index
    %78 = vector.load %arg7[%c0_89, %c12_90, %c0_91] : memref<8x16x16xf32, #tpu.memory_space<vmem>>, vector<8x1x16xf32>
    tpu.vector_store %arg7[%c0_89, %c12_90, %c0_91], %77 {strides = array<i32>} : memref<8x16x16xf32, #tpu.memory_space<vmem>>, vector<8x1x16xf32>,
    %c0_92 = arith.constant 0 : index
    %c0_93 = arith.constant 0 : index
    %c13 = arith.constant 13 : index
    %c0_94 = arith.constant 0 : index
    %79 = vector.load %arg2[%c0_92, %c0_93, %c13, %c0_94] : memref<1x4x16x16xf32, #tpu.memory_space<vmem>>, vector<1x4x1x16xf32>
    %80 = vector.shape_cast %79 : vector<1x4x1x16xf32> to vector<4x1x16xf32>
    %81 = vector.shape_cast %80 : vector<4x1x16xf32> to vector<4x16xf32>
    %cst_95 = arith.constant dense<0.000000e+00> : vector<8x16xf32>
    %82 = tpu.matmul %0, %81, %cst_95 {dimension_numbers = #tpu.dot_dimension_numbers<[1], [0], [0], [1], [0, 0, 1, 1], [], []>, precision = #tpu.contract_precision<fp32>} : vector<8x4xf32>, vector<4x16xf32>, vector<8x16xf32> -> vector<8x16xf32>
    %83 = vector.shape_cast %82 : vector<8x16xf32> to vector<8x1x16xf32>
    %c0_96 = arith.constant 0 : index
    %c13_97 = arith.constant 13 : index
    %c0_98 = arith.constant 0 : index
    %84 = vector.load %arg7[%c0_96, %c13_97, %c0_98] : memref<8x16x16xf32, #tpu.memory_space<vmem>>, vector<8x1x16xf32>
    tpu.vector_store %arg7[%c0_96, %c13_97, %c0_98], %83 {strides = array<i32>} : memref<8x16x16xf32, #tpu.memory_space<vmem>>, vector<8x1x16xf32>,
    %c0_99 = arith.constant 0 : index
    %c0_100 = arith.constant 0 : index
    %c14 = arith.constant 14 : index
    %c0_101 = arith.constant 0 : index
    %85 = vector.load %arg2[%c0_99, %c0_100, %c14, %c0_101] : memref<1x4x16x16xf32, #tpu.memory_space<vmem>>, vector<1x4x1x16xf32>
    %86 = vector.shape_cast %85 : vector<1x4x1x16xf32> to vector<4x1x16xf32>
    %87 = vector.shape_cast %86 : vector<4x1x16xf32> to vector<4x16xf32>
    %cst_102 = arith.constant dense<0.000000e+00> : vector<8x16xf32>
    %88 = tpu.matmul %0, %87, %cst_102 {dimension_numbers = #tpu.dot_dimension_numbers<[1], [0], [0], [1], [0, 0, 1, 1], [], []>, precision = #tpu.contract_precision<fp32>} : vector<8x4xf32>, vector<4x16xf32>, vector<8x16xf32> -> vector<8x16xf32>
    %89 = vector.shape_cast %88 : vector<8x16xf32> to vector<8x1x16xf32>
    %c0_103 = arith.constant 0 : index
    %c14_104 = arith.constant 14 : index
    %c0_105 = arith.constant 0 : index
    %90 = vector.load %arg7[%c0_103, %c14_104, %c0_105] : memref<8x16x16xf32, #tpu.memory_space<vmem>>, vector<8x1x16xf32>
    tpu.vector_store %arg7[%c0_103, %c14_104, %c0_105], %89 {strides = array<i32>} : memref<8x16x16xf32, #tpu.memory_space<vmem>>, vector<8x1x16xf32>,
    %c0_106 = arith.constant 0 : index
    %c0_107 = arith.constant 0 : index
    %c15 = arith.constant 15 : index
    %c0_108 = arith.constant 0 : index
    %91 = vector.load %arg2[%c0_106, %c0_107, %c15, %c0_108] : memref<1x4x16x16xf32, #tpu.memory_space<vmem>>, vector<1x4x1x16xf32>
    %92 = vector.shape_cast %91 : vector<1x4x1x16xf32> to vector<4x1x16xf32>
    %93 = vector.shape_cast %92 : vector<4x1x16xf32> to vector<4x16xf32>
    %cst_109 = arith.constant dense<0.000000e+00> : vector<8x16xf32>
    %94 = tpu.matmul %0, %93, %cst_109 {dimension_numbers = #tpu.dot_dimension_numbers<[1], [0], [0], [1], [0, 0, 1, 1], [], []>, precision = #tpu.contract_precision<fp32>} : vector<8x4xf32>, vector<4x16xf32>, vector<8x16xf32> -> vector<8x16xf32>
    %95 = vector.shape_cast %94 : vector<8x16xf32> to vector<8x1x16xf32>
    %c0_110 = arith.constant 0 : index
    %c15_111 = arith.constant 15 : index
    %c0_112 = arith.constant 0 : index
    %96 = vector.load %arg7[%c0_110, %c15_111, %c0_112] : memref<8x16x16xf32, #tpu.memory_space<vmem>>, vector<8x1x16xf32>
    tpu.vector_store %arg7[%c0_110, %c15_111, %c0_112], %95 {strides = array<i32>} : memref<8x16x16xf32, #tpu.memory_space<vmem>>, vector<8x1x16xf32>,
    %c0_113 = arith.constant 0 : index
    %c0_114 = arith.constant 0 : index
    %c0_115 = arith.constant 0 : index
    %97 = vector.load %arg7[%c0_113, %c0_114, %c0_115] : memref<8x16x16xf32, #tpu.memory_space<vmem>>, vector<8x16x16xf32>
    %c0_116 = arith.constant 0 : index
    %c0_117 = arith.constant 0 : index
    %c0_118 = arith.constant 0 : index
    %98 = vector.load %arg4[%c0_116, %c0_117, %c0_118] : memref<8x1x1xf32, #tpu.memory_space<vmem>>, vector<8x1x1xf32>
    %99 = vector.broadcast %98 : vector<8x1x1xf32> to vector<8x16x16xf32>
    %100 = arith.addf %97, %99 : vector<8x16x16xf32>
    %101 = vector.shape_cast %100 : vector<8x16x16xf32> to vector<128x16xf32>
    %c0_119 = arith.constant 0 : index
    %c0_120 = arith.constant 0 : index
    %102 = vector.load %arg5[%c0_119, %c0_120] : memref<16x32xf32, #tpu.memory_space<vmem>>, vector<16x32xf32>
    %cst_121 = arith.constant dense<0.000000e+00> : vector<128x32xf32>
    %103 = tpu.matmul %101, %102, %cst_121 {dimension_numbers = #tpu.dot_dimension_numbers<[1], [0], [0], [1], [0, 0, 1, 1], [], []>, precision = #tpu.contract_precision<fp32>} : vector<128x16xf32>, vector<16x32xf32>, vector<128x32xf32> -> vector<128x32xf32>
    %104 = vector.shape_cast %103 : vector<128x32xf32> to vector<8x16x32xf32>
    %105 = vector.shape_cast %104 : vector<8x16x32xf32> to vector<8x16x1x32xf32>
    %106 = vector.shape_cast %105 : vector<8x16x1x32xf32> to vector<8x16x1x32xf32>
    %107 = vector.broadcast %106 : vector<8x16x1x32xf32> to vector<8x16x2x32xf32>
    %108 = vector.shape_cast %107 : vector<8x16x2x32xf32> to vector<8x32x32xf32>
    %c0_122 = arith.constant 0 : index
    %c0_123 = arith.constant 0 : index
    %c0_124 = arith.constant 0 : index
    %c0_125 = arith.constant 0 : index
    %109 = vector.load %arg6[%c0_122, %c0_123, %c0_124, %c0_125] : memref<1x8x32x32xf32, #tpu.memory_space<vmem>>, vector<1x8x32x32xf32>
    %110 = vector.shape_cast %109 : vector<1x8x32x32xf32> to vector<8x32x32xf32>
    %111 = vector.shape_cast %108 : vector<8x32x32xf32> to vector<1x8x32x32xf32>
    tpu.vector_store %arg6[%c0_122, %c0_123, %c0_124, %c0_125], %111 {strides = array<i32>} : memref<1x8x32x32xf32, #tpu.memory_space<vmem>>, vector<1x8x32x32xf32>,
    return
  }
  func.func @transform_0(%arg0: i32, %arg1: i32) -> (i32, i32, i32, i32) {
    %c0_i32 = arith.constant 0 : i32
    %c0_i32_0 = arith.constant 0 : i32
    %c0_i32_1 = arith.constant 0 : i32
    return %arg0, %c0_i32, %arg1, %c0_i32_0 : i32, i32, i32, i32
  }
  func.func @transform_1(%arg0: i32, %arg1: i32) -> (i32, i32) {
    %c0_i32 = arith.constant 0 : i32
    %c0_i32_0 = arith.constant 0 : i32
    %c0_i32_1 = arith.constant 0 : i32
    return %c0_i32, %c0_i32_0 : i32, i32
  }
  func.func @transform_2(%arg0: i32, %arg1: i32) -> (i32, i32, i32) {
    %c0_i32 = arith.constant 0 : i32
    %c0_i32_0 = arith.constant 0 : i32
    %c0_i32_1 = arith.constant 0 : i32
    %c0_i32_2 = arith.constant 0 : i32
    return %c0_i32, %c0_i32_0, %c0_i32_1 : i32, i32, i32
  }
  func.func @transform_3(%arg0: i32, %arg1: i32) -> (i32, i32) {
    %c0_i32 = arith.constant 0 : i32
    %c0_i32_0 = arith.constant 0 : i32
    %c0_i32_1 = arith.constant 0 : i32
    return %c0_i32, %c0_i32_0 : i32, i32
  }
  func.func @transform_4(%arg0: i32, %arg1: i32) -> (i32, i32, i32, i32) {
    %c0_i32 = arith.constant 0 : i32
    %c0_i32_0 = arith.constant 0 : i32
    %c0_i32_1 = arith.constant 0 : i32
    return %arg0, %c0_i32, %arg1, %c0_i32_0 : i32, i32, i32, i32
  }
}

</mosaic_0001>

<bundles_post_ra>
// kernel: tpu_custom_call.1
= control target key start
LH: loop header
LB: loop body
LE: loop exit
PB: predicated region body
PF: predicated region fallthrough
CT: control target
= control target key end

     0   :  { %9 = vsyncpa [#allocation4], 0  ;;  %s15030_s0 = inlined_call_operand.hbm [shape: f32[2,4,16,16], index: 0, kind: input, shape index: {}]   ;;  %s15031_s1 = inlined_call_operand.vmem [shape: f32[8,4], index: 1, kind: input, shape index: {}]   ;;  %s15032_s2 = inlined_call_operand.vmem [shape: f32[8,1,1], index: 2, kind: input, shape index: {}]   ;;  %s15033_s3 = inlined_call_operand.vmem [shape: f32[16,32], index: 3, kind: input, shape index: {}]   ;;  %s15034_s4 = inlined_call_operand.hbm [shape: f32[2,8,32,32], index: 4, kind: output, shape index: {}]  }
   0x1   :  { %11 = vsyncpa [#allocation4 + $0x1], 0 }
   0x2   :  { %12 = vsyncpa [#allocation5], 0 }
   0x3   :  { %14 = vsyncpa [#allocation5 + $0x1], 0  ;;  %s13177_s15 = smov 0   ;;  %s13179_s16 = smov 0  }
   0x4   :  { %s13181_s17 = smov 0   ;;  %s13183_s18 = smov 0  }
   0x5   :  { %s13185_s19 = smov 0   ;;  %s13187_s20 = smov 0  }
   0x6 LB: > { %s11985_s21 = sadd.s32 4294967295, %s13139_s20   ;;  %s11986_s22 = sadd.s32 4294967294, %s13139_s20   ;;  %s13139_s20 = sphi %s13187_s20, %s20_s20   ;;  %s13135_s19 = sphi %s13185_s19, %s15045_s19   ;;  %s13131_s18 = sphi %s13183_s18, %s15044_s18   ;;  %s13127_s17 = sphi %s13181_s17, %s15043_s17   ;;  %s13123_s16 = sphi %s13179_s16, %s15042_s16   ;;  %s13119_s15 = sphi %s13177_s15, %s15041_s15  }
   0x7   : > { %s32_s23 = sadd.s32 1, %s13135_s19  ;;  %s41_s24 = sadd.s32 1, %s13127_s17 }
   0x8   : > { %p34_p0 = scmp.ge.s32.totalorder %s32_s23, 2  ;;  %p48_p1 = scmp.ne.s32.totalorder %s13127_s17, %s13123_s16 }
   0x9   : > { %p49_p2 = scmp.eq.s32.totalorder %s13139_s20, 0  ;;  %p54_p3 = scmp.ne.s32.totalorder %s13123_s16, %s13119_s15 }
   0xa   : > { %s15047_s23 = smov (%p34_p0, %s32_s23), 0  ;;  %p55_p5 = scmp.eq.s32.totalorder %s11985_s21, 0 }
   0xb   : > { %p13218_p4 = por %p49_p2, %p48_p1  ;;  %s36_s26 = ssub.s32 %s13135_s19, %s15047_s23 }
   0xc   : > { %p143_p6 = scmp.eq.s32.totalorder %s11985_s21, 1  ;;  %p39_p7 = scmp.eq.s32.totalorder %s36_s26, 0 }
   0xd   : > { %p13224_p8 = por %p55_p5, %p54_p3  ;;  %p149_p10 = scmp.eq.s32.totalorder %s11986_s22, 1 }
   0xe   : > { %p13228_p9 = por %p143_p6, %p48_p1  ;;  %p12970_p13 = scmp.lt.s32.totalorder %s13139_s20, 2 }
   0xf   : > { %s13233_s29 = scalar_select %p39_p7, %s13127_s17, %s41_s24  }
  0x10   : > { %p13235_p11 = por %p149_p10, %p54_p3  ;;  %s178_s5 = sand.u32 1, %s13127_s17  }
  0x11   : > { %s11989_s6 = sshll.u32 %s178_s5, 6  ;;  %s12008_s7 = sshll.u32 %s13135_s19, 10 }
  0x12   : > { %s190_s10 = scalar_lea.hbm %s15030_s0, %s12008_s7  ;;  %s182_s11 = scalar_lea.vmem [#allocation3], %s11989_s6 }
  0x13   : > { %s191_s12 = sshll.u32 %s182_s11, 4  ;;  %p13248_p0 = pnand %p12970_p13, %p13218_p4  ;;  %s192_s12 = int_to_ptr.vmem [resolvable:$true] %s191_s12 }
  0x14   : > { %p11992_p1 = scmp.ge.s32.totalorder %s13139_s20, 1  ;;  %s179_s14 = scalar_lea.sflag [#allocation4], %s178_s5 }
  0x15   : > { %p13033_p2 = pneg %p13248_p0  ;;  %s13044_s21 = scalar_lea.vmem %s192_s12, 1024 }
  0x16   : > { %p13045_p3 = scmp.ne.s32.totalorder %s192_s12, %s13044_s21  ;;  %s13141_s22 = smov [#allocation3]  }
  0x17   : > { %s13049_s24 = sshll.u32 %s13141_s22, 4  ;;  %s13050_s24 = int_to_ptr.vmem [resolvable:$false] %s13049_s24 }
  0x18   : > { %p13047_p5 = pnand %p13045_p3, %p13033_p2  ;;  %s13051_s26 = scalar_lea.vmem %s13050_s24, 2048 }
  0x19   : > { %p13052_p7 = scmp.lt.s32.totalorder %s192_s12, %s13050_s24  ;;  %p13053_p10 = scmp.lt.s32.totalorder %s13051_s26, %s13044_s21 }
  0x1a   : > { %p13048_p6 = pneg %p13047_p5 }
  0x1b   : > { %p13054_p12 = por %p13053_p10, %p13052_p7 }
  0x1d   : > { %p13055_p4 = pnand %p13054_p12, %p13048_p6 }
  0x1f   : > { %13058 = shalt.err (!%p13055_p4)
}
  0x20   : > { %s13142_s25 = smov 128   ;;  %s13143_s5 = smov 8  }
  0x21   : > { %12965 = dma.hbm_to_vmem [thread:$0]  (!%p13248_p0), %s190_s10, 1024, %s192_s12, %s179_s14, %s13142_s25, %s13142_s25, %s13143_s5  }
  0x22   : > { %p199_p13 = scmp.lt.s32.totalorder %s13139_s20, 3 }
  0x24   : > { %p200_p2 = pnand %p11992_p1, %p199_p13 }
  0x25   : > { %s13261_s6 = sand.u32 (!%p200_p2), 1, %s13123_s16  }
  0x26   : > { %203 = sbr.rel (%p200_p2) target bundleno = 888 (0x378), region = 36  ;;  %s11993_s7 = sshll.u32 (!%p200_p2), %s13261_s6, 6 }
  0x27   : > { %s206_s8 = scalar_lea.sflag (!%p200_p2), [#allocation4], %s13261_s6  ;;  %s13265_s9 = scalar_lea.vmem (!%p200_p2), [#allocation3], %s11993_s7 }
  0x2b   : > { %13110 = dma.done.wait (%p13224_p8), %s206_s8, 1024  }
  0x2c   : > { %13112 = vsyncadd (%p13224_p8), %s206_s8, 4294966272  ;;  %v13144_v0 = vmov 0.0   ;;  %vm13145_vm0 = vmmov 0   ;;  %vm246_vm1 = vcmask 1041409   ;;  %vm249_vm2 = vcmask 1042434   ;;  %v236_v7 = vld [vmem:[%s15031_s1] sm:$0xff] }
  0x2d   : > { %12310 = vmatprep.subr.mxu0 %v13144_v0  ;;  %12315 = vmatprep.subr.mxu1 %v13144_v0  ;;  %vm252_vm3 = vcmask 1043459   ;;  %vm254_vm4 = vcmask 31744   ;;  %v237_v1 = vld [vmem:[%s13265_s9] sm:$0x1]  ;;  %v238_v2 = vld [vmem:[%s13265_s9 + $0x10] sm:$0x1] }
  0x2e   : > { %12312 = vmatprep.mubr.msk.f32.mxu0 %vm13145_vm0, %v13144_v0  ;;  %12317 = vmatprep.mubr.msk.f32.mxu1 %vm13145_vm0, %v13144_v0  ;;  %v239_v3 = vld [vmem:[%s13265_s9 + $0x20] sm:$0x1]  ;;  %v240_v4 = vld [vmem:[%s13265_s9 + $0x30] sm:$0x1]  ;;  %v245_v5 = vrot.slane %v238_v2, 7  ;;  %vm258_vm5 = vcmask 1043456  }
  0x2f   : > { %v248_v6 = vrot.slane %v239_v3, 6  ;;  %v251_v8 = vrot.slane %v240_v4, 5  ;;  %v256_v9 = vsel %vm254_vm4, %v236_v7, 0  ;;  %v774_v10 = vld [vmem:[%s13265_s9 + $0x1] sm:$0x1]  ;;  %vm765_vm6 = vcmask 122880  }
  0x30   : > { %v775_v11 = vld [vmem:[%s13265_s9 + $0x11] sm:$0x1]  ;;  %v247_v12 = vsel %vm246_vm1, %v245_v5, %v237_v1  ;;  %v13287_v13 = vand.u32 4294901760, %v256_v9  ;;  %v776_v14 = vld [vmem:[%s13265_s9 + $0x21] sm:$0x1]  ;;  %vm8808_vm7 = vcmask 130048  }
  0x31   : > { %v777_v15 = vld [vmem:[%s13265_s9 + $0x31] sm:$0x1]  ;;  %v782_v16 = vrot.slane %v775_v11, 7  ;;  %v250_v17 = vsel %vm249_vm2, %v248_v6, %v247_v12  ;;  %v784_v18 = vrot.slane %v776_v14, 6  ;;  %v1302_v20 = vld [vmem:[%s13265_s9 + $0x2] sm:$0x1] }
  0x32   : > { %v786_v19 = vrot.slane %v777_v15, 5  ;;  %v1303_v21 = vld [vmem:[%s13265_s9 + $0x12] sm:$0x1]  ;;  %v253_v22 = vsel %vm252_vm3, %v251_v8, %v250_v17  ;;  %v13296_v23 = vsub.f32 %v256_v9, %v13287_v13  ;;  %v1304_v25 = vld [vmem:[%s13265_s9 + $0x22] sm:$0x1]  ;;  %vm11849_vm8 = vcmask 261120  }
  0x33   : > { %v783_v24 = vsel %vm246_vm1, %v782_v16, %v774_v10  ;;  %v1310_v26 = vrot.slane %v1303_v21, 7  ;;  %v259_v27 = vsel %vm258_vm5, %v253_v22, 0  ;;  %v1305_v29 = vld [vmem:[%s13265_s9 + $0x32] sm:$0x1]  ;;  %v1312_v30 = vrot.slane %v1304_v25, 6  ;;  %s11994_s22 = sshll.u32 %s13261_s6, 8 }
  0x34   : > { %v785_v28 = vsel %vm249_vm2, %v784_v18, %v783_v24  ;;  %v13303_v31 = vand.u32 4294901760, %v259_v27  ;;  %v13306_v32 = vand.u32 4294901760, %v13296_v23  ;;  %v1314_v39 = vrot.slane %v1305_v29, 5  ;;  %v1831_v44 = vld [vmem:[%s13265_s9 + $0x13] sm:$0x1]  ;;  %s14623_s24 = scalar_lea.vmem [#allocation6], %s11994_s22 }
  0x35   : > { %v787_v33 = vsel %vm252_vm3, %v786_v19, %v785_v28  ;;  %v1311_v34 = vsel %vm246_vm1, %v1310_v26, %v1302_v20  ;;  %v1830_v47 = vld [vmem:[%s13265_s9 + $0x3] sm:$0x1]  ;;  %v1838_v49 = vrot.slane %v1831_v44, 7  ;;  %v3414_v52 = vld [vmem:[%s13265_s9 + $0x6] sm:$0x1]  ;;  %s12009_s26 = sshll.u32 %s13131_s18, 12 }
  0x36   : > { %v788_v35 = vsel %vm258_vm5, %v787_v33, 0  ;;  %12311 = vmatpush3.msra.mxu0 %v13303_v31  ;;  %v330_v36 = vsub.f32 %v13296_v23, %v13306_v32  ;;  %v369_v37 = vsub.f32 %v259_v27, %v13303_v31  ;;  %v1313_v40 = vsel %vm249_vm2, %v1312_v30, %v1311_v34  ;;  %v1832_v48 = vld [vmem:[%s13265_s9 + $0x23] sm:$0x1]  ;;  %v3415_v53 = vld [vmem:[%s13265_s9 + $0x16] sm:$0x1]  ;;  %s11898_s25 = sshll.u32 %s14623_s24, 4  ;;  %s14976_s8 = scalar_lea.hbm %s15034_s4, %s12009_s26  ;;  %s14978_s25 = int_to_ptr.vmem [resolvable:$true] %s11898_s25 }
  0x37   : > { %v13315_v38 = vand.u32 4294901760, %v788_v35  ;;  %12320 = vmatprep.subr.mxu0 %v13144_v0  ;;  %v1315_v46 = vsel %vm252_vm3, %v1314_v39, %v1313_v40  ;;  %v3416_v55 = vld [vmem:[%s13265_s9 + $0x26] sm:$0x1]  ;;  %v3422_v56 = vrot.slane %v3415_v53, 7  ;;  %v1840_v57 = vrot.slane %v1832_v48, 6  ;;  %s11883_s18 = scalar_lea.sflag [#allocation5], %s13261_s6 }
  0x38   : > { %v13319_v41 = vand.u32 4294901760, %v330_v36  ;;  %v370_v42 = vand.u32 4294901760, %v369_v37  ;;  %v1316_v54 = vsel %vm258_vm5, %v1315_v46, 0  ;;  %v3417_v58 = vld [vmem:[%s13265_s9 + $0x36] sm:$0x1]  ;;  %v1839_v61 = vsel %vm246_vm1, %v1838_v49, %v1830_v47  ;;  %s13149_s27 = smov [#allocation6]  }
  0x39   : > { %v13322_v43 = vsub.f32 %v788_v35, %v13315_v38  ;;  %v3943_v59 = vld [vmem:[%s13265_s9 + $0x17] sm:$0x1]  ;;  %v1833_v60 = vld [vmem:[%s13265_s9 + $0x33] sm:$0x1]  ;;  %v3423_v62 = vsel %vm246_vm1, %v3422_v56, %v3414_v52  ;;  %v3424_v63 = vrot.slane %v3416_v55, 6  ;;  %v13352_v3 = vand.u32 4294901760, %v1316_v54 }
  0x3a   : > { %12313 = vmatmul.mubr.f32.vlgmr.msra.gmra.mxu0 %v13319_v41  ;;  %v371_v45 = vsub.f32 %v369_v37, %v370_v42  ;;  %v3944_v1 = vld [vmem:[%s13265_s9 + $0x27] sm:$0x1]  ;;  %v3945_v5 = vld [vmem:[%s13265_s9 + $0x37] sm:$0x1]  ;;  %v3426_v7 = vrot.slane %v3417_v58, 5  ;;  %v3950_v8 = vrot.slane %v3943_v59, 7  ;;  %v1841_v10 = vsel %vm249_vm2, %v1840_v57, %v1839_v61 }
  0x3b   : > { %12321 = vmatpush3.msra.mxu0 %v369_v37  ;;  %12322 = vmatprep.mubr.msk.f32.mxu0 %vm13145_vm0, %v13144_v0  ;;  %v899_v51 = vand.u32 4294901760, %v13322_v43  ;;  %v3942_v4 = vld [vmem:[%s13265_s9 + $0x7] sm:$0x1]  ;;  %v3425_v6 = vsel %vm249_vm2, %v3424_v63, %v3423_v62  ;;  %v4471_v9 = vld [vmem:[%s13265_s9 + $0x18] sm:$0x1]  ;;  %v1842_v11 = vrot.slane %v1833_v60, 5  ;;  %v13374_v22 = vsub.f32 %v1316_v54, %v13352_v3 }
  0x3c   : > { %v372_v50 = vand.u32 4294901760, %v371_v45  ;;  %12330 = vmatprep.subr.mxu0 %v13144_v0  ;;  %v3952_v12 = vrot.slane %v3944_v1, 6  ;;  %v4470_v14 = vld [vmem:[%s13265_s9 + $0x8] sm:$0x1]  ;;  %v3427_v16 = vsel %vm252_vm3, %v3426_v7, %v3425_v6  ;;  %v3951_v17 = vsel %vm246_vm1, %v3950_v8, %v3942_v4  ;;  %v4473_v19 = vld [vmem:[%s13265_s9 + $0x38] sm:$0x1] }
  0x3d   : > { %v900_v2 = vsub.f32 %v13322_v43, %v899_v51  ;;  %v4472_v15 = vld [vmem:[%s13265_s9 + $0x28] sm:$0x1]  ;;  %v3954_v18 = vrot.slane %v3945_v5, 5  ;;  %v4478_v20 = vrot.slane %v4471_v9, 7  ;;  %v2359_v24 = vld [vmem:[%s13265_s9 + $0x14] sm:$0x1] }
  0x3e   : > { %12316 = vmatpush3.msra.mxu1 %v372_v50  ;;  %12323 = vmatmul.mubr.f32.vlgmr.msra.gmra.mxu0 %v13296_v23  ;;  %v13378_v25 = vsel %vm258_vm5, %v3427_v16, 0  ;;  %v4999_v26 = vld [vmem:[%s13265_s9 + $0x19] sm:$0x1]  ;;  %v13385_v27 = vld [vmem:[%s13265_s9 + $0x24] sm:$0x1]  ;;  %v3953_v28 = vsel %vm249_vm2, %v3952_v12, %v3951_v17  ;;  %v4480_v30 = vrot.slane %v4472_v15, 6 }
  0x3f   : > { %12318 = vmatmul.mubr.f32.vlgmr.msra.gmra.mxu1 %v13287_v13  ;;  %12325 = vmatprep.subr.mxu1 %v13144_v0  ;;  %v901_v21 = vand.u32 4294901760, %v900_v2  ;;  %v4479_v29 = vsel %vm246_vm1, %v4478_v20, %v4470_v14  ;;  %v2358_v33 = vld [vmem:[%s13265_s9 + $0x4] sm:$0x1]  ;;  %v3955_v34 = vsel %vm252_vm3, %v3954_v18, %v3953_v28  ;;  %v4482_v35 = vrot.slane %v4473_v19, 5  ;;  %v4998_v36 = vld [vmem:[%s13265_s9 + $0x9] sm:$0x1] }
  0x40   : > { %12326 = vmatpush3.msra.mxu1 %v13303_v31  ;;  %12327 = vmatprep.mubr.msk.f32.mxu1 %vm13145_vm0, %v13144_v0  ;;  %v5000_v37 = vld [vmem:[%s13265_s9 + $0x29] sm:$0x1]  ;;  %v2366_v39 = vrot.slane %v2359_v24, 7  ;;  %v13399_v40 = vsel %vm258_vm5, %v3955_v34, 0  ;;  %v5001_v44 = vld [vmem:[%s13265_s9 + $0x39] sm:$0x1] }
  0x41   : > { %12331 = vmatpush3.msra.mxu0 %v370_v42  ;;  %12332 = vmatprep.mubr.msk.f32.mxu0 %vm13145_vm0, %v13144_v0  ;;  %v4481_v42 = vsel %vm249_vm2, %v4480_v30, %v4479_v29  ;;  %v5006_v45 = vrot.slane %v4999_v26, 7  ;;  %v1427_v46 = vand.u32 4294901760, %v13374_v22  ;;  %v13407_v47 = vld [vmem:[%s13265_s9 + $0x34] sm:$0x1]  ;;  %v5527_v49 = vld [vmem:[%s13265_s9 + $0x1a] sm:$0x1] }
  0x42   : > { %12335 = vmatprep.subr.mxu1 %v13144_v0  ;;  %12333 = vmatmul.mubr.f32.vlgmr.msra.gmra.mxu0 %v13287_v13  ;;  %v4483_v48 = vsel %vm252_vm3, %v4482_v35, %v4481_v42  ;;  %v5528_v50 = vld [vmem:[%s13265_s9 + $0x2a] sm:$0x1]  ;;  %v5008_v55 = vrot.slane %v5000_v37, 6  ;;  %v5529_v56 = vld [vmem:[%s13265_s9 + $0x3a] sm:$0x1]  ;;  %v2368_v57 = vrot.slane %v13385_v27, 6  ;;  %v2367_v61 = vsel %vm246_vm1, %v2366_v39, %v2358_v33 }
  0x43   : > { %12328 = vmatmul.mubr.f32.vlgmr.msra.gmra.mxu1 %v13306_v32  ;;  %12340 = vmatprep.subr.mxu0 %v13144_v0  ;;  %v13417_v53 = vsel %vm258_vm5, %v4483_v48, 0  ;;  %v5007_v54 = vsel %vm246_vm1, %v5006_v45, %v4998_v36  ;;  %v5010_v58 = vrot.slane %v5001_v44, 5  ;;  %v5526_v59 = vld [vmem:[%s13265_s9 + $0xa] sm:$0x1]  ;;  %v6055_v60 = vld [vmem:[%s13265_s9 + $0x1b] sm:$0x1]  ;;  %v1428_v4 = vsub.f32 %v13374_v22, %v1427_v46 }
  0x44   : > { %12336 = vmatpush3.msra.mxu1 %v13303_v31  ;;  %12337 = vmatprep.mubr.msk.f32.mxu1 %vm13145_vm0, %v13144_v0  ;;  %v1843_v31 = vsel %vm252_vm3, %v1842_v11, %v1841_v10  ;;  %v5009_v62 = vsel %vm249_vm2, %v5008_v55, %v5007_v54  ;;  %v5534_v63 = vrot.slane %v5527_v49, 7  ;;  %v5536_v1 = vrot.slane %v5528_v50, 6  ;;  %v6054_v2 = vld [vmem:[%s13265_s9 + $0xb] sm:$0x1]  ;;  %v6057_v9 = vld [vmem:[%s13265_s9 + $0x3b] sm:$0x1] }
  0x45   : > { %12341 = vmatpush3.msra.mxu0 %v13315_v38  ;;  %12342 = vmatprep.mubr.msk.f32.mxu0 %vm13145_vm0, %v13144_v0  ;;  %v1844_v52 = vsel %vm258_vm5, %v1843_v31, 0  ;;  %v5011_v6 = vsel %vm252_vm3, %v5010_v58, %v5009_v62  ;;  %v5538_v7 = vrot.slane %v5529_v56, 5  ;;  %v6056_v8 = vld [vmem:[%s13265_s9 + $0x2b] sm:$0x1]  ;;  %v2370_v10 = vrot.slane %v13407_v47, 5  ;;  %s13063_s10 = sshll.u32 %s13149_s27, 4  ;;  %s13064_s10 = int_to_ptr.vmem [resolvable:$false] %s13063_s10 }
  0x46   : > { %12345 = vmatprep.subr.mxu1 %v13144_v0  ;;  %12343 = vmatmul.mubr.f32.vlgmr.msra.gmra.mxu0 %v13319_v41  ;;  %v13437_v5 = vand.u32 4294901760, %v1844_v52  ;;  %v13448_v11 = vsel %vm258_vm5, %v5011_v6, 0  ;;  %v5535_v12 = vsel %vm246_vm1, %v5534_v63, %v5526_v59  ;;  %v6062_v14 = vrot.slane %v6055_v60, 7  ;;  %v6584_v16 = vld [vmem:[%s13265_s9 + $0x2c] sm:$0x1]  ;;  %s13065_s11 = scalar_lea.vmem %s13064_s10, 8192  ;;  %p13066_p1 = scmp.lt.s32.totalorder %s14978_s25, %s13064_s10 }
  0x47   : > { %12338 = vmatmul.mubr.f32.vlgmr.msra.gmra.mxu1 %v13287_v13  ;;  %12350 = vmatprep.subr.mxu0 %v13144_v0  ;;  %v2369_v15 = vsel %vm249_vm2, %v2368_v57, %v2367_v61  ;;  %v2887_v17 = vld [vmem:[%s13265_s9 + $0x15] sm:$0x1]  ;;  %v6064_v20 = vrot.slane %v6056_v8, 6  ;;  %v6585_v24 = vld [vmem:[%s13265_s9 + $0x3c] sm:$0x1]  ;;  %v1429_v26 = vand.u32 4294901760, %v1428_v4 }
  0x48   : > { %12346 = vmatpush3.msra.mxu1 %v901_v21  ;;  %12347 = vmatprep.mubr.msk.f32.mxu1 %vm13145_vm0, %v13144_v0  ;;  %v6063_v19 = vsel %vm246_vm1, %v6062_v14, %v6054_v2  ;;  %v6066_v21 = vrot.slane %v6057_v9, 5  ;;  %v13467_v27 = vsub.f32 %v1844_v52, %v13437_v5  ;;  %v6582_v29 = vld [vmem:[%s13265_s9 + $0xc] sm:$0x1]  ;;  %v7111_v30 = vld [vmem:[%s13265_s9 + $0x1d] sm:$0x1]  ;;  %v6592_v34 = vrot.slane %v6584_v16, 6 }
  0x49   : > { %12351 = vmatpush3.msra.mxu0 %v13322_v43  ;;  %12352 = vmatprep.mubr.msk.f32.mxu0 %vm13145_vm0, %v13144_v0  ;;  %v5537_v43 = vsel %vm249_vm2, %v5536_v1, %v5535_v12  ;;  %v6065_v31 = vsel %vm249_vm2, %v6064_v20, %v6063_v19  ;;  %v7112_v35 = vld [vmem:[%s13265_s9 + $0x2d] sm:$0x1]  ;;  %v6594_v37 = vrot.slane %v6585_v24, 5  ;;  %v7113_v42 = vld [vmem:[%s13265_s9 + $0x3d] sm:$0x1]  ;;  %v2894_v45 = vrot.slane %v2887_v17, 7 }
  0x4a   : > { %12355 = vmatprep.subr.mxu1 %v13144_v0  ;;  %12353 = vmatmul.mubr.f32.vlgmr.msra.gmra.mxu0 %v13296_v23  ;;  %v5539_v18 = vsel %vm252_vm3, %v5538_v7, %v5537_v43  ;;  %v6067_v36 = vsel %vm252_vm3, %v6066_v21, %v6065_v31  ;;  %v7110_v39 = vld [vmem:[%s13265_s9 + $0xd] sm:$0x1]  ;;  %v2888_v44 = vld [vmem:[%s13265_s9 + $0x25] sm:$0x1]  ;;  %v7118_v49 = vrot.slane %v7111_v30, 7  ;;  %v1955_v50 = vand.u32 4294901760, %v13467_v27 }
  0x4b   : > { %12348 = vmatmul.mubr.f32.vlgmr.msra.gmra.mxu1 %v13287_v13  ;;  %12360 = vmatprep.subr.mxu0 %v13144_v0  ;;  %v13470_v28 = vsel %vm258_vm5, %v5539_v18, 0  ;;  %v13489_v47 = vsel %vm258_vm5, %v6067_v36, 0  ;;  %v2886_v54 = vld [vmem:[%s13265_s9 + $0x5] sm:$0x1]  ;;  %v7120_v56 = vrot.slane %v7112_v35, 6  ;;  %v7122_v59 = vrot.slane %v7113_v42, 5 }
  0x4c   : > { %12356 = vmatpush3.msra.mxu1 %v13315_v38  ;;  %12357 = vmatprep.mubr.msk.f32.mxu1 %vm13145_vm0, %v13144_v0  ;;  %v7119_v58 = vsel %vm246_vm1, %v7118_v49, %v7110_v39  ;;  %v7639_v60 = vld [vmem:[%s13265_s9 + $0x1e] sm:$0x1]  ;;  %v2889_v61 = vld [vmem:[%s13265_s9 + $0x35] sm:$0x1]  ;;  %v2896_v62 = vrot.slane %v2888_v44, 6  ;;  %v2895_v6 = vsel %vm246_vm1, %v2894_v45, %v2886_v54  ;;  %v1956_v12 = vsub.f32 %v13467_v27, %v1955_v50 }
  0x4d   : > { %12361 = vmatpush3.msra.mxu0 %v899_v51  ;;  %12362 = vmatprep.mubr.msk.f32.mxu0 %vm13145_vm0, %v13144_v0  ;;  %v6583_v51 = vld [vmem:[%s13265_s9 + $0x1c] sm:$0x1]  ;;  %v7121_v1 = vsel %vm249_vm2, %v7120_v56, %v7119_v58  ;;  %v7640_v2 = vld [vmem:[%s13265_s9 + $0x2e] sm:$0x1]  ;;  %v7641_v9 = vld [vmem:[%s13265_s9 + $0x3e] sm:$0x1] }
  0x4e   : > { %12365 = vmatprep.subr.mxu1 %v13144_v0  ;;  %12363 = vmatmul.mubr.f32.vlgmr.msra.gmra.mxu0 %v13287_v13  ;;  %v6590_v33 = vrot.slane %v6583_v51, 7  ;;  %v7123_v7 = vsel %vm252_vm3, %v7122_v59, %v7121_v1  ;;  %v7638_v8 = vld [vmem:[%s13265_s9 + $0xe] sm:$0x1]  ;;  %v7650_v43 = vrot.slane %v7641_v9, 5  ;;  %v2898_v16 = vrot.slane %v2889_v61, 5 }
  0x4f   : > { %12358 = vmatmul.mubr.f32.vlgmr.msra.gmra.mxu1 %v13306_v32  ;;  %12370 = vmatprep.subr.mxu0 %v13144_v0  ;;  %v13527_v14 = vsel %vm258_vm5, %v7123_v7, 0  ;;  %v2897_v18 = vsel %vm249_vm2, %v2896_v62, %v2895_v6  ;;  %v8167_v30 = vld [vmem:[%s13265_s9 + $0x1f] sm:$0x1]  ;;  %v13617_v49 = vand.u32 4294901760, %v13378_v25  ;;  %v13681_v59 = vand.u32 4294901760, %v13417_v53 }
  0x50   : > { %12366 = vmatpush3.msra.mxu1 %v13315_v38  ;;  %12367 = vmatprep.mubr.msk.f32.mxu1 %vm13145_vm0, %v13144_v0  ;;  %v2371_v38 = vsel %vm252_vm3, %v2370_v10, %v2369_v15  ;;  %v6591_v48 = vsel %vm246_vm1, %v6590_v33, %v6582_v29  ;;  %v7646_v10 = vrot.slane %v7639_v60, 7  ;;  %v7648_v15 = vrot.slane %v7640_v2, 6  ;;  %v8166_v33 = vld [vmem:[%s13265_s9 + $0xf] sm:$0x1] }
  0x51   : > { %12371 = vmatpush3.msra.mxu0 %v13352_v3  ;;  %12372 = vmatprep.mubr.msk.f32.mxu0 %vm13145_vm0, %v13144_v0  ;;  %v2372_v52 = vsel %vm258_vm5, %v2371_v38, 0  ;;  %v6593_v55 = vsel %vm249_vm2, %v6592_v34, %v6591_v48  ;;  %v8168_v38 = vld [vmem:[%s13265_s9 + $0x2f] sm:$0x1]  ;;  %v8174_v31 = vrot.slane %v8167_v30, 7  ;;  %v8169_v34 = vld [vmem:[%s13265_s9 + $0x3f] sm:$0x1]  ;;  %v4594_v61 = vsub.f32 %v13417_v53, %v13681_v59 }
  0x52   : > { %12375 = vmatprep.subr.mxu1 %v13144_v0  ;;  %12373 = vmatmul.mubr.f32.vlgmr.msra.gmra.mxu0 %v13319_v41  ;;  %v6595_v57 = vsel %vm252_vm3, %v6594_v37, %v6593_v55  ;;  %v13514_v4 = vand.u32 4294901760, %v2372_v52  ;;  %v7647_v51 = vsel %vm246_vm1, %v7646_v10, %v7638_v8  ;;  %v8176_v35 = vrot.slane %v8168_v38, 6  ;;  %s13059_s9 = scalar_lea.vmem %s14978_s25, 4096 }
  0x53   : > { %12368 = vmatmul.mubr.f32.vlgmr.msra.gmra.mxu1 %v13287_v13  ;;  %12380 = vmatprep.subr.mxu0 %v13144_v0  ;;  %v13508_v63 = vsel %vm258_vm5, %v6595_v57, 0  ;;  %v7649_v17 = vsel %vm249_vm2, %v7648_v15, %v7647_v51  ;;  %v8175_v36 = vsel %vm246_vm1, %v8174_v31, %v8166_v33  ;;  %v13649_v55 = vand.u32 4294901760, %v13399_v40  ;;  %v11995_v33 = vld [vmem:[%s15032_s2] ss:$0 sm:$0xff]  ;;  %p13060_p8 = scmp.ne.s32.totalorder %s14978_s25, %s13059_s9  ;;  %p13067_p3 = scmp.lt.s32.totalorder %s13065_s11, %s13059_s9 }
  0x54   : > { %12376 = vmatpush3.msra.mxu1 %v1429_v26  ;;  %12377 = vmatprep.mubr.msk.f32.mxu1 %vm13145_vm0, %v13144_v0  ;;  %v13545_v19 = vsub.f32 %v2372_v52, %v13514_v4  ;;  %v8177_v42 = vsel %vm249_vm2, %v8176_v35, %v8175_v36  ;;  %v3538_v52 = vsub.f32 %v13378_v25, %v13617_v49  ;;  %v4595_v62 = vand.u32 4294901760, %v4594_v61  ;;  %v11997_v36 = vld [vmem:[%s15032_s2 + $0x2] ss:$0 sm:$0xff] }
  0x55   : > { %12381 = vmatpush3.msra.mxu0 %v13374_v22  ;;  %12382 = vmatprep.mubr.msk.f32.mxu0 %vm13145_vm0, %v13144_v0  ;;  %v7651_v22 = vsel %vm252_vm3, %v7650_v43, %v7649_v17  ;;  %v4066_v57 = vsub.f32 %v13399_v40, %v13649_v55  ;;  %v13713_v1 = vand.u32 4294901760, %v13448_v11  ;;  %v13745_v7 = vand.u32 4294901760, %v13470_v28  ;;  %p13061_p12 = pnand %p13060_p8, %p13228_p9  ;;  %p13068_p5 = por %p13067_p3, %p13066_p1 }
  0x56   : > { %12385 = vmatprep.subr.mxu1 %v13144_v0  ;;  %12383 = vmatmul.mubr.f32.vlgmr.msra.gmra.mxu0 %v13296_v23  ;;  %v13548_v20 = vsel %vm258_vm5, %v7651_v22, 0  ;;  %v2483_v21 = vand.u32 4294901760, %v13545_v19  ;;  %v3539_v54 = vand.u32 4294901760, %v3538_v52  ;;  %v4596_v53 = vsub.f32 %v4594_v61, %v4595_v62 }
  0x57   : > { %12378 = vmatmul.mubr.f32.vlgmr.msra.gmra.mxu1 %v13287_v13  ;;  %12390 = vmatprep.subr.mxu0 %v13144_v0  ;;  %v4067_v58 = vand.u32 4294901760, %v4066_v57  ;;  %v5650_v9 = vsub.f32 %v13470_v28, %v13745_v7  ;;  %p13062_p0 = pneg %p13061_p12 }
  0x58   : > { %12386 = vmatpush3.msra.mxu1 %v13352_v3  ;;  %12387 = vmatprep.mubr.msk.f32.mxu1 %vm13145_vm0, %v13144_v0  ;;  %v2484_v26 = vsub.f32 %v13545_v19, %v2483_v21  ;;  %v3540_v25 = vsub.f32 %v3538_v52, %v3539_v54  ;;  %v4597_v2 = vand.u32 4294901760, %v4596_v53 }
  0x59   : > { %12391 = vmatpush3.msra.mxu0 %v1427_v46  ;;  %12392 = vmatprep.mubr.msk.f32.mxu0 %vm13145_vm0, %v13144_v0  ;;  %v1957_v46 = vand.u32 4294901760, %v1956_v12  ;;  %v4068_v40 = vsub.f32 %v4066_v57, %v4067_v58  ;;  %v5651_v10 = vand.u32 4294901760, %v5650_v9  ;;  %v13777_v12 = vand.u32 4294901760, %v13489_v47  ;;  %p13069_p6 = pnand %p13068_p5, %p13062_p0 }
  0x5a   : > { %12395 = vmatprep.subr.mxu1 %v13144_v0  ;;  %12393 = vmatmul.mubr.f32.vlgmr.msra.gmra.mxu0 %v13287_v13  ;;  %v2485_v37 = vand.u32 4294901760, %v2484_v26  ;;  %v3541_v56 = vand.u32 4294901760, %v3540_v25 }
  0x5b   : > { %12388 = vmatmul.mubr.f32.vlgmr.msra.gmra.mxu1 %v13306_v32  ;;  %12400 = vmatprep.subr.mxu0 %v13144_v0  ;;  %v4069_v60 = vand.u32 4294901760, %v4068_v40  ;;  %v5652_v28 = vsub.f32 %v5650_v9, %v5651_v10  ;;  %v6178_v43 = vsub.f32 %v13489_v47, %v13777_v12 }
  0x5c   : > { %12396 = vmatpush3.msra.mxu1 %v13352_v3  ;;  %12397 = vmatprep.mubr.msk.f32.mxu1 %vm13145_vm0, %v13144_v0  ;;  %v2899_v3 = vsel %vm252_vm3, %v2898_v16, %v2897_v18  ;;  %v13809_v16 = vand.u32 4294901760, %v13508_v63 }
  0x5d   : > { %12401 = vmatpush3.msra.mxu0 %v13437_v5  ;;  %12402 = vmatprep.mubr.msk.f32.mxu0 %vm13145_vm0, %v13144_v0  ;;  %v2900_v24 = vsel %vm258_vm5, %v2899_v3, 0  ;;  %v5653_v15 = vand.u32 4294901760, %v5652_v28  ;;  %v6179_v51 = vand.u32 4294901760, %v6178_v43 }
  0x5e   : > { %12405 = vmatprep.subr.mxu1 %v13144_v0  ;;  %12403 = vmatmul.mubr.f32.vlgmr.msra.gmra.mxu0 %v13319_v41  ;;  %v13573_v29 = vand.u32 4294901760, %v2900_v24  ;;  %v6706_v18 = vsub.f32 %v13508_v63, %v13809_v16 }
  0x5f   : > { %12398 = vmatmul.mubr.f32.vlgmr.msra.gmra.mxu1 %v13287_v13  ;;  %12410 = vmatprep.subr.mxu0 %v13144_v0  ;;  %v6180_v47 = vsub.f32 %v6178_v43, %v6179_v51 }
  0x60   : > { %12406 = vmatpush3.msra.mxu1 %v1957_v46  ;;  %12407 = vmatprep.mubr.msk.f32.mxu1 %vm13145_vm0, %v13144_v0  ;;  %v3010_v39 = vsub.f32 %v2900_v24, %v13573_v29  ;;  %v6707_v22 = vand.u32 4294901760, %v6706_v18  ;;  %v13841_v46 = vand.u32 4294901760, %v13527_v14  ;;  %v13873_v24 = vand.u32 4294901760, %v13548_v20 }
  0x61   : > { %12411 = vmatpush3.msra.mxu0 %v13467_v27  ;;  %12412 = vmatprep.mubr.msk.f32.mxu0 %vm13145_vm0, %v13144_v0  ;;  %v8178_v27 = vrot.slane %v8169_v34, 5  ;;  %v6181_v17 = vand.u32 4294901760, %v6180_v47  ;;  %v13146_v34 = vmov 0  }
  0x62   : > { %12415 = vmatprep.subr.mxu1 %v13144_v0  ;;  %12413 = vmatmul.mubr.f32.vlgmr.msra.gmra.mxu0 %v13296_v23  ;;  %v3011_v45 = vand.u32 4294901760, %v3010_v39  ;;  %v6708_v63 = vsub.f32 %v6706_v18, %v6707_v22  ;;  %v7234_v3 = vsub.f32 %v13527_v14, %v13841_v46 }
  0x63   : > { %12408 = vmatmul.mubr.f32.vlgmr.msra.gmra.mxu1 %v13287_v13  ;;  %12420 = vmatprep.subr.mxu0 %v13144_v0  ;;  %v8179_v44 = vsel %vm252_vm3, %v8178_v27, %v8177_v42  ;;  %v11996_v27 = vld [vmem:[%s15032_s2 + $0x1] ss:$0 sm:$0xff] }
  0x64   : > { %12416 = vmatpush3.msra.mxu1 %v13437_v5  ;;  %12417 = vmatprep.mubr.msk.f32.mxu1 %vm13145_vm0, %v13144_v0  ;;  %v3012_v48 = vsub.f32 %v3010_v39, %v3011_v45 }
  0x65   : > { %12421 = vmatpush3.msra.mxu0 %v1955_v50  ;;  %12422 = vmatprep.mubr.msk.f32.mxu0 %vm13145_vm0, %v13144_v0 }
  0x66   : > { %12425 = vmatprep.subr.mxu1 %v13144_v0  ;;  %12423 = vmatmul.mubr.f32.vlgmr.msra.gmra.mxu0 %v13287_v13  ;;  %v3013_v50 = vand.u32 4294901760, %v3012_v48  ;;  %v12001_v48 = vld [vmem:[%s15032_s2 + $0x6] ss:$0 sm:$0xff] }
  0x67   : > { %12418 = vmatmul.mubr.f32.vlgmr.msra.gmra.mxu1 %v13306_v32  ;;  %12430 = vmatprep.subr.mxu0 %v13144_v0 }
  0x68   : > { %12426 = vmatpush3.msra.mxu1 %v13437_v5  ;;  %12427 = vmatprep.mubr.msk.f32.mxu1 %vm13145_vm0, %v13144_v0  ;;  %v13600_v5 = vsel %vm258_vm5, %v8179_v44, 0  ;;  %v11999_v44 = vld [vmem:[%s15032_s2 + $0x4] ss:$0 sm:$0xff] }
  0x69   : > { %12431 = vmatpush3.msra.mxu0 %v13514_v4  ;;  %12432 = vmatprep.mubr.msk.f32.mxu0 %vm13145_vm0, %v13144_v0  ;;  %v13911_v38 = vand.u32 4294901760, %v13600_v5 }
  0x6a   : > { %12435 = vmatprep.subr.mxu1 %v13144_v0  ;;  %12433 = vmatmul.mubr.f32.vlgmr.msra.gmra.mxu0 %v13319_v41 }
  0x6b   : > { %12428 = vmatmul.mubr.f32.vlgmr.msra.gmra.mxu1 %v13287_v13  ;;  %12440 = vmatprep.subr.mxu0 %v13144_v0  ;;  %v8290_v35 = vsub.f32 %v13600_v5, %v13911_v38  ;;  %v12000_v5 = vld [vmem:[%s15032_s2 + $0x5] ss:$0 sm:$0xff] }
  0x6c   : > { %12436 = vmatpush3.msra.mxu1 %v2485_v37  ;;  %12437 = vmatprep.mubr.msk.f32.mxu1 %vm13145_vm0, %v13144_v0 }
  0x6d   : > { %12441 = vmatpush3.msra.mxu0 %v13545_v19  ;;  %12442 = vmatprep.mubr.msk.f32.mxu0 %vm13145_vm0, %v13144_v0  ;;  %v6709_v19 = vand.u32 4294901760, %v6708_v63  ;;  %v8291_v37 = vand.u32 4294901760, %v8290_v35 }
  0x6e   : > { %12445 = vmatprep.subr.mxu1 %v13144_v0  ;;  %12443 = vmatmul.mubr.f32.vlgmr.msra.gmra.mxu0 %v13296_v23 }
  0x6f   : > { %12438 = vmatmul.mubr.f32.vlgmr.msra.gmra.mxu1 %v13287_v13  ;;  %12450 = vmatprep.subr.mxu0 %v13144_v0  ;;  %v8292_v42 = vsub.f32 %v8290_v35, %v8291_v37 }
  0x70   : > { %12446 = vmatpush3.msra.mxu1 %v13514_v4  ;;  %12447 = vmatprep.mubr.msk.f32.mxu1 %vm13145_vm0, %v13144_v0 }
  0x71   : > { %12451 = vmatpush3.msra.mxu0 %v2483_v21  ;;  %12452 = vmatprep.mubr.msk.f32.mxu0 %vm13145_vm0, %v13144_v0  ;;  %v7235_v21 = vand.u32 4294901760, %v7234_v3 }
  0x72   : > { %12455 = vmatprep.subr.mxu1 %v13144_v0  ;;  %12453 = vmatmul.mubr.f32.vlgmr.msra.gmra.mxu0 %v13287_v13 }
  0x73   : > { %12448 = vmatmul.mubr.f32.vlgmr.msra.gmra.mxu1 %v13306_v32  ;;  %12460 = vmatprep.subr.mxu0 %v13144_v0  ;;  %v7236_v14 = vsub.f32 %v7234_v3, %v7235_v21 }
  0x74   : > { %12456 = vmatpush3.msra.mxu1 %v13514_v4  ;;  %12457 = vmatprep.mubr.msk.f32.mxu1 %vm13145_vm0, %v13144_v0  ;;  %v5122_v4 = vsub.f32 %v13448_v11, %v13713_v1 }
  0x75   : > { %12461 = vmatpush3.msra.mxu0 %v13573_v29  ;;  %12462 = vmatprep.mubr.msk.f32.mxu0 %vm13145_vm0, %v13144_v0  ;;  %v7237_v26 = vand.u32 4294901760, %v7236_v14 }
  0x76   : > { %12465 = vmatprep.subr.mxu1 %v13144_v0  ;;  %12463 = vmatmul.mubr.f32.vlgmr.msra.gmra.mxu0 %v13319_v41  ;;  %v5123_v6 = vand.u32 4294901760, %v5122_v4 }
  0x77   : > { %12458 = vmatmul.mubr.f32.vlgmr.msra.gmra.mxu1 %v13287_v13  ;;  %12470 = vmatprep.subr.mxu0 %v13144_v0 }
  0x78   : > { %12466 = vmatpush3.msra.mxu1 %v3013_v50  ;;  %12467 = vmatprep.mubr.msk.f32.mxu1 %vm13145_vm0, %v13144_v0  ;;  %v5124_v11 = vsub.f32 %v5122_v4, %v5123_v6 }
  0x79   : > { %12471 = vmatpush3.msra.mxu0 %v3010_v39  ;;  %12472 = vmatprep.mubr.msk.f32.mxu0 %vm13145_vm0, %v13144_v0  ;;  %v11998_v39 = vld [vmem:[%s15032_s2 + $0x3] ss:$0 sm:$0xff] }
  0x7a   : > { %12475 = vmatprep.subr.mxu1 %v13144_v0  ;;  %12473 = vmatmul.mubr.f32.vlgmr.msra.gmra.mxu0 %v13296_v23  ;;  %v5125_v8 = vand.u32 4294901760, %v5124_v11 }
  0x7b   : > { %12468 = vmatmul.mubr.f32.vlgmr.msra.gmra.mxu1 %v13287_v13  ;;  %12480 = vmatprep.subr.mxu0 %v13144_v0 }
  0x7c   : > { %12476 = vmatpush3.msra.mxu1 %v13573_v29  ;;  %12477 = vmatprep.mubr.msk.f32.mxu1 %vm13145_vm0, %v13144_v0 }
  0x7d   : > { %12481 = vmatpush3.msra.mxu0 %v3011_v45  ;;  %12482 = vmatprep.mubr.msk.f32.mxu0 %vm13145_vm0, %v13144_v0  ;;  %v8293_v45 = vand.u32 4294901760, %v8292_v42 }
  0x7e   : > { %12485 = vmatprep.subr.mxu1 %v13144_v0  ;;  %12483 = vmatmul.mubr.f32.vlgmr.msra.gmra.mxu0 %v13287_v13 }
  0x7f   : > { %12478 = vmatmul.mubr.f32.vlgmr.msra.gmra.mxu1 %v13306_v32  ;;  %12490 = vmatprep.subr.mxu0 %v13144_v0 }
  0x80   : > { %12486 = vmatpush3.msra.mxu1 %v13573_v29  ;;  %12487 = vmatprep.mubr.msk.f32.mxu1 %vm13145_vm0, %v13144_v0  ;;  %v7762_v29 = vsub.f32 %v13548_v20, %v13873_v24 }
  0x81   : > { %12491 = vmatpush3.msra.mxu0 %v13617_v49  ;;  %12492 = vmatprep.mubr.msk.f32.mxu0 %vm13145_vm0, %v13144_v0 }
  0x82   : > { %12495 = vmatprep.subr.mxu1 %v13144_v0  ;;  %12493 = vmatmul.mubr.f32.vlgmr.msra.gmra.mxu0 %v13319_v41  ;;  %v7763_v30 = vand.u32 4294901760, %v7762_v29 }
  0x83   : > { %12488 = vmatmul.mubr.f32.vlgmr.msra.gmra.mxu1 %v13287_v13  ;;  %12500 = vmatprep.subr.mxu0 %v13144_v0 }
  0x84   : > { %12496 = vmatpush3.msra.mxu1 %v3541_v56  ;;  %12497 = vmatprep.mubr.msk.f32.mxu1 %vm13145_vm0, %v13144_v0  ;;  %v7764_v20 = vsub.f32 %v7762_v29, %v7763_v30 }
  0x85   : > { %12501 = vmatpush3.msra.mxu0 %v3538_v52  ;;  %12502 = vmatprep.mubr.msk.f32.mxu0 %vm13145_vm0, %v13144_v0  ;;  %v13147_v52 = vmov 1966171168  }
  0x86   : > { %12505 = vmatprep.subr.mxu1 %v13144_v0  ;;  %12503 = vmatmul.mubr.f32.vlgmr.msra.gmra.mxu0 %v13296_v23  ;;  %v7765_v31 = vand.u32 4294901760, %v7764_v20 }
  0x87   : > { %12498 = vmatmul.mubr.f32.vlgmr.msra.gmra.mxu1 %v13287_v13  ;;  %12510 = vmatprep.subr.mxu0 %v13144_v0 }
  0x88   : > { %12506 = vmatpush3.msra.mxu1 %v13617_v49  ;;  %12507 = vmatprep.mubr.msk.f32.mxu1 %vm13145_vm0, %v13144_v0 }
  0x89   : > { %12511 = vmatpush3.msra.mxu0 %v3539_v54  ;;  %12512 = vmatprep.mubr.msk.f32.mxu0 %vm13145_vm0, %v13144_v0  ;;  %v710_v54 = vunpack.c.l.s4 %v13147_v52 }
  0x8a   : > { %12515 = vmatprep.subr.mxu1 %v13144_v0  ;;  %12513 = vmatmul.mubr.f32.vlgmr.msra.gmra.mxu0 %v13287_v13 }
  0x8b   : > { %12508 = vmatmul.mubr.f32.vlgmr.msra.gmra.mxu1 %v13306_v32  ;;  %12520 = vmatprep.subr.mxu0 %v13144_v0 }
  0x8c   : > { %12516 = vmatpush3.msra.mxu1 %v13617_v49  ;;  %12517 = vmatprep.mubr.msk.f32.mxu1 %vm13145_vm0, %v13144_v0  ;;  %v12002_v49 = vld [vmem:[%s15032_s2 + $0x7] ss:$0 sm:$0xff] }
  0x8d   : > { %12521 = vmatpush3.msra.mxu0 %v13649_v55  ;;  %12522 = vmatprep.mubr.msk.f32.mxu0 %vm13145_vm0, %v13144_v0 }
  0x8e   : > { %12525 = vmatprep.subr.mxu1 %v13144_v0  ;;  %12523 = vmatmul.mubr.f32.vlgmr.msra.gmra.mxu0 %v13319_v41 }
  0x8f   : > { %12518 = vmatmul.mubr.f32.vlgmr.msra.gmra.mxu1 %v13287_v13  ;;  %12530 = vmatprep.subr.mxu0 %v13144_v0 }
  0x90   : > { %12526 = vmatpush3.msra.mxu1 %v4069_v60  ;;  %12527 = vmatprep.mubr.msk.f32.mxu1 %vm13145_vm0, %v13144_v0 }
  0x91   : > { %12531 = vmatpush3.msra.mxu0 %v4066_v57  ;;  %12532 = vmatprep.mubr.msk.f32.mxu0 %vm13145_vm0, %v13144_v0 }
  0x92   : > { %12535 = vmatprep.subr.mxu1 %v13144_v0  ;;  %12533 = vmatmul.mubr.f32.vlgmr.msra.gmra.mxu0 %v13296_v23 }
  0x93   : > { %12528 = vmatmul.mubr.f32.vlgmr.msra.gmra.mxu1 %v13287_v13  ;;  %12540 = vmatprep.subr.mxu0 %v13144_v0 }
  0x94   : > { %12536 = vmatpush3.msra.mxu1 %v13649_v55  ;;  %12537 = vmatprep.mubr.msk.f32.mxu1 %vm13145_vm0, %v13144_v0 }
  0x95   : > { %12541 = vmatpush3.msra.mxu0 %v4067_v58  ;;  %12542 = vmatprep.mubr.msk.f32.mxu0 %vm13145_vm0, %v13144_v0 }
  0x96   : > { %12545 = vmatprep.subr.mxu1 %v13144_v0  ;;  %12543 = vmatmul.mubr.f32.vlgmr.msra.gmra.mxu0 %v13287_v13 }
  0x97   : > { %12538 = vmatmul.mubr.f32.vlgmr.msra.gmra.mxu1 %v13306_v32  ;;  %12550 = vmatprep.subr.mxu0 %v13144_v0 }
  0x98   : > { %12546 = vmatpush3.msra.mxu1 %v13649_v55  ;;  %12547 = vmatprep.mubr.msk.f32.mxu1 %vm13145_vm0, %v13144_v0 }
  0x99   : > { %12551 = vmatpush3.msra.mxu0 %v13681_v59  ;;  %12552 = vmatprep.mubr.msk.f32.mxu0 %vm13145_vm0, %v13144_v0 }
  0x9a   : > { %12555 = vmatprep.subr.mxu1 %v13144_v0  ;;  %12553 = vmatmul.mubr.f32.vlgmr.msra.gmra.mxu0 %v13319_v41 }
  0x9b   : > { %12548 = vmatmul.mubr.f32.vlgmr.msra.gmra.mxu1 %v13287_v13  ;;  %12560 = vmatprep.subr.mxu0 %v13144_v0 }
  0x9c   : > { %12556 = vmatpush3.msra.mxu1 %v4597_v2  ;;  %12557 = vmatprep.mubr.msk.f32.mxu1 %vm13145_vm0, %v13144_v0 }
  0x9d   : > { %12561 = vmatpush3.msra.mxu0 %v4594_v61  ;;  %12562 = vmatprep.mubr.msk.f32.mxu0 %vm13145_vm0, %v13144_v0 }
  0x9e   : > { %12565 = vmatprep.subr.mxu1 %v13144_v0  ;;  %12563 = vmatmul.mubr.f32.vlgmr.msra.gmra.mxu0 %v13296_v23 }
  0x9f   : > { %12558 = vmatmul.mubr.f32.vlgmr.msra.gmra.mxu1 %v13287_v13  ;;  %12570 = vmatprep.subr.mxu0 %v13144_v0 }
  0xa0   : > { %12566 = vmatpush3.msra.mxu1 %v13681_v59  ;;  %12567 = vmatprep.mubr.msk.f32.mxu1 %vm13145_vm0, %v13144_v0 }
  0xa1   : > { %12571 = vmatpush3.msra.mxu0 %v4595_v62  ;;  %12572 = vmatprep.mubr.msk.f32.mxu0 %vm13145_vm0, %v13144_v0 }
  0xa2   : > { %12575 = vmatprep.subr.mxu1 %v13144_v0  ;;  %12573 = vmatmul.mubr.f32.vlgmr.msra.gmra.mxu0 %v13287_v13 }
  0xa3   : > { %12568 = vmatmul.mubr.f32.vlgmr.msra.gmra.mxu1 %v13306_v32  ;;  %12580 = vmatprep.subr.mxu0 %v13144_v0 }
  0xa4   : > { %12576 = vmatpush3.msra.mxu1 %v13681_v59  ;;  %12577 = vmatprep.mubr.msk.f32.mxu1 %vm13145_vm0, %v13144_v0  ;;  %v711_v59 = vunpack.c.0.s8 %v710_v54 }
  0xa5   : > { %12581 = vmatpush3.msra.mxu0 %v13713_v1  ;;  %12582 = vmatprep.mubr.msk.f32.mxu0 %vm13145_vm0, %v13144_v0 }
  0xa6   : > { %12585 = vmatprep.subr.mxu1 %v13144_v0  ;;  %12583 = vmatmul.mubr.f32.vlgmr.msra.gmra.mxu0 %v13319_v41 }
  0xa7   : > { %12578 = vmatmul.mubr.f32.vlgmr.msra.gmra.mxu1 %v13287_v13  ;;  %12590 = vmatprep.subr.mxu0 %v13144_v0 }
  0xa8   : > { %12586 = vmatpush3.msra.mxu1 %v5125_v8  ;;  %12587 = vmatprep.mubr.msk.f32.mxu1 %vm13145_vm0, %v13144_v0 }
  0xa9   : > { %12591 = vmatpush3.msra.mxu0 %v5122_v4  ;;  %12592 = vmatprep.mubr.msk.f32.mxu0 %vm13145_vm0, %v13144_v0 }
  0xaa   : > { %12595 = vmatprep.subr.mxu1 %v13144_v0  ;;  %12593 = vmatmul.mubr.f32.vlgmr.msra.gmra.mxu0 %v13296_v23 }
  0xab   : > { %12588 = vmatmul.mubr.f32.vlgmr.msra.gmra.mxu1 %v13287_v13  ;;  %12600 = vmatprep.subr.mxu0 %v13144_v0 }
  0xac   : > { %12596 = vmatpush3.msra.mxu1 %v13713_v1  ;;  %12597 = vmatprep.mubr.msk.f32.mxu1 %vm13145_vm0, %v13144_v0 }
  0xad   : > { %12601 = vmatpush3.msra.mxu0 %v5123_v6  ;;  %12602 = vmatprep.mubr.msk.f32.mxu0 %vm13145_vm0, %v13144_v0 }
  0xae   : > { %12605 = vmatprep.subr.mxu1 %v13144_v0  ;;  %12603 = vmatmul.mubr.f32.vlgmr.msra.gmra.mxu0 %v13287_v13 }
  0xaf   : > { %12598 = vmatmul.mubr.f32.vlgmr.msra.gmra.mxu1 %v13306_v32  ;;  %12610 = vmatprep.subr.mxu0 %v13144_v0 }
  0xb0   : > { %12606 = vmatpush3.msra.mxu1 %v13713_v1  ;;  %12607 = vmatprep.mubr.msk.f32.mxu1 %vm13145_vm0, %v13144_v0 }
  0xb1   : > { %12611 = vmatpush3.msra.mxu0 %v13745_v7  ;;  %12612 = vmatprep.mubr.msk.f32.mxu0 %vm13145_vm0, %v13144_v0 }
  0xb2   : > { %12615 = vmatprep.subr.mxu1 %v13144_v0  ;;  %12613 = vmatmul.mubr.f32.vlgmr.msra.gmra.mxu0 %v13319_v41 }
  0xb3   : > { %12608 = vmatmul.mubr.f32.vlgmr.msra.gmra.mxu1 %v13287_v13  ;;  %12620 = vmatprep.subr.mxu0 %v13144_v0 }
  0xb4   : > { %12616 = vmatpush3.msra.mxu1 %v5653_v15  ;;  %12617 = vmatprep.mubr.msk.f32.mxu1 %vm13145_vm0, %v13144_v0 }
  0xb5   : > { %12621 = vmatpush3.msra.mxu0 %v5650_v9  ;;  %12622 = vmatprep.mubr.msk.f32.mxu0 %vm13145_vm0, %v13144_v0 }
  0xb6   : > { %12625 = vmatprep.subr.mxu1 %v13144_v0  ;;  %12623 = vmatmul.mubr.f32.vlgmr.msra.gmra.mxu0 %v13296_v23 }
  0xb7   : > { %12618 = vmatmul.mubr.f32.vlgmr.msra.gmra.mxu1 %v13287_v13  ;;  %12630 = vmatprep.subr.mxu0 %v13144_v0 }
  0xb8   : > { %12626 = vmatpush3.msra.mxu1 %v13745_v7  ;;  %12627 = vmatprep.mubr.msk.f32.mxu1 %vm13145_vm0, %v13144_v0 }
  0xb9   : > { %12631 = vmatpush3.msra.mxu0 %v5651_v10  ;;  %12632 = vmatprep.mubr.msk.f32.mxu0 %vm13145_vm0, %v13144_v0 }
  0xba   : > { %12635 = vmatprep.subr.mxu1 %v13144_v0  ;;  %12633 = vmatmul.mubr.f32.vlgmr.msra.gmra.mxu0 %v13287_v13 }
  0xbb   : > { %12628 = vmatmul.mubr.f32.vlgmr.msra.gmra.mxu1 %v13306_v32  ;;  %12640 = vmatprep.subr.mxu0 %v13144_v0 }
  0xbc   : > { %12636 = vmatpush3.msra.mxu1 %v13745_v7  ;;  %12637 = vmatprep.mubr.msk.f32.mxu1 %vm13145_vm0, %v13144_v0 }
  0xbd   : > { %12641 = vmatpush3.msra.mxu0 %v13777_v12  ;;  %12642 = vmatprep.mubr.msk.f32.mxu0 %vm13145_vm0, %v13144_v0 }
  0xbe   : > { %12645 = vmatprep.subr.mxu1 %v13144_v0  ;;  %12643 = vmatmul.mubr.f32.vlgmr.msra.gmra.mxu0 %v13319_v41 }
  0xbf   : > { %12638 = vmatmul.mubr.f32.vlgmr.msra.gmra.mxu1 %v13287_v13  ;;  %12650 = vmatprep.subr.mxu0 %v13144_v0 }
  0xc0   : > { %12646 = vmatpush3.msra.mxu1 %v6181_v17  ;;  %12647 = vmatprep.mubr.msk.f32.mxu1 %vm13145_vm0, %v13144_v0 }
  0xc1   : > { %12651 = vmatpush3.msra.mxu0 %v6178_v43  ;;  %12652 = vmatprep.mubr.msk.f32.mxu0 %vm13145_vm0, %v13144_v0 }
  0xc2   : > { %12655 = vmatprep.subr.mxu1 %v13144_v0  ;;  %12653 = vmatmul.mubr.f32.vlgmr.msra.gmra.mxu0 %v13296_v23 }
  0xc3   : > { %12648 = vmatmul.mubr.f32.vlgmr.msra.gmra.mxu1 %v13287_v13  ;;  %12660 = vmatprep.subr.mxu0 %v13144_v0 }
  0xc4   : > { %12656 = vmatpush3.msra.mxu1 %v13777_v12  ;;  %12657 = vmatprep.mubr.msk.f32.mxu1 %vm13145_vm0, %v13144_v0 }
  0xc5   : > { %12661 = vmatpush3.msra.mxu0 %v6179_v51  ;;  %12662 = vmatprep.mubr.msk.f32.mxu0 %vm13145_vm0, %v13144_v0 }
  0xc6   : > { %12665 = vmatprep.subr.mxu1 %v13144_v0  ;;  %12663 = vmatmul.mubr.f32.vlgmr.msra.gmra.mxu0 %v13287_v13 }
  0xc7   : > { %12658 = vmatmul.mubr.f32.vlgmr.msra.gmra.mxu1 %v13306_v32  ;;  %12670 = vmatprep.subr.mxu0 %v13144_v0 }
  0xc8   : > { %12666 = vmatpush3.msra.mxu1 %v13777_v12  ;;  %12667 = vmatprep.mubr.msk.f32.mxu1 %vm13145_vm0, %v13144_v0 }
  0xc9   : > { %12671 = vmatpush3.msra.mxu0 %v13809_v16  ;;  %12672 = vmatprep.mubr.msk.f32.mxu0 %vm13145_vm0, %v13144_v0 }
  0xca   : > { %12675 = vmatprep.subr.mxu1 %v13144_v0  ;;  %12673 = vmatmul.mubr.f32.vlgmr.msra.gmra.mxu0 %v13319_v41 }
  0xcb   : > { %12668 = vmatmul.mubr.f32.vlgmr.msra.gmra.mxu1 %v13287_v13  ;;  %12680 = vmatprep.subr.mxu0 %v13144_v0 }
  0xcc   : > { %12676 = vmatpush3.msra.mxu1 %v6709_v19  ;;  %12677 = vmatprep.mubr.msk.f32.mxu1 %vm13145_vm0, %v13144_v0 }
  0xcd   : > { %12681 = vmatpush3.msra.mxu0 %v6706_v18  ;;  %12682 = vmatprep.mubr.msk.f32.mxu0 %vm13145_vm0, %v13144_v0 }
  0xce   : > { %12685 = vmatprep.subr.mxu1 %v13144_v0  ;;  %12683 = vmatmul.mubr.f32.vlgmr.msra.gmra.mxu0 %v13296_v23 }
  0xcf   : > { %12678 = vmatmul.mubr.f32.vlgmr.msra.gmra.mxu1 %v13287_v13  ;;  %12690 = vmatprep.subr.mxu0 %v13144_v0 }
  0xd0   : > { %12686 = vmatpush3.msra.mxu1 %v13809_v16  ;;  %12687 = vmatprep.mubr.msk.f32.mxu1 %vm13145_vm0, %v13144_v0 }
  0xd1   : > { %12691 = vmatpush3.msra.mxu0 %v6707_v22  ;;  %12692 = vmatprep.mubr.msk.f32.mxu0 %vm13145_vm0, %v13144_v0 }
  0xd2   : > { %12695 = vmatprep.subr.mxu1 %v13144_v0  ;;  %12693 = vmatmul.mubr.f32.vlgmr.msra.gmra.mxu0 %v13287_v13 }
  0xd3   : > { %12688 = vmatmul.mubr.f32.vlgmr.msra.gmra.mxu1 %v13306_v32  ;;  %12700 = vmatprep.subr.mxu0 %v13144_v0 }
  0xd4   : > { %12696 = vmatpush3.msra.mxu1 %v13809_v16  ;;  %12697 = vmatprep.mubr.msk.f32.mxu1 %vm13145_vm0, %v13144_v0 }
  0xd5   : > { %12701 = vmatpush3.msra.mxu0 %v13841_v46  ;;  %12702 = vmatprep.mubr.msk.f32.mxu0 %vm13145_vm0, %v13144_v0 }
  0xd6   : > { %12705 = vmatprep.subr.mxu1 %v13144_v0  ;;  %12703 = vmatmul.mubr.f32.vlgmr.msra.gmra.mxu0 %v13319_v41 }
  0xd7   : > { %12698 = vmatmul.mubr.f32.vlgmr.msra.gmra.mxu1 %v13287_v13  ;;  %12710 = vmatprep.subr.mxu0 %v13144_v0 }
  0xd8   : > { %12706 = vmatpush3.msra.mxu1 %v7237_v26  ;;  %12707 = vmatprep.mubr.msk.f32.mxu1 %vm13145_vm0, %v13144_v0 }
  0xd9   : > { %12711 = vmatpush3.msra.mxu0 %v7234_v3  ;;  %12712 = vmatprep.mubr.msk.f32.mxu0 %vm13145_vm0, %v13144_v0 }
  0xda   : > { %12715 = vmatprep.subr.mxu1 %v13144_v0  ;;  %12713 = vmatmul.mubr.f32.vlgmr.msra.gmra.mxu0 %v13296_v23 }
  0xdb   : > { %12708 = vmatmul.mubr.f32.vlgmr.msra.gmra.mxu1 %v13287_v13  ;;  %12720 = vmatprep.subr.mxu0 %v13144_v0 }
  0xdc   : > { %12716 = vmatpush3.msra.mxu1 %v13841_v46  ;;  %12717 = vmatprep.mubr.msk.f32.mxu1 %vm13145_vm0, %v13144_v0 }
  0xdd   : > { %12721 = vmatpush3.msra.mxu0 %v7235_v21  ;;  %12722 = vmatprep.mubr.msk.f32.mxu0 %vm13145_vm0, %v13144_v0 }
  0xde   : > { %12725 = vmatprep.subr.mxu1 %v13144_v0  ;;  %12723 = vmatmul.mubr.f32.vlgmr.msra.gmra.mxu0 %v13287_v13 }
  0xdf   : > { %12718 = vmatmul.mubr.f32.vlgmr.msra.gmra.mxu1 %v13306_v32  ;;  %12730 = vmatprep.subr.mxu0 %v13144_v0 }
  0xe0   : > { %12726 = vmatpush3.msra.mxu1 %v13841_v46  ;;  %12727 = vmatprep.mubr.msk.f32.mxu1 %vm13145_vm0, %v13144_v0 }
  0xe1   : > { %12731 = vmatpush3.msra.mxu0 %v13873_v24  ;;  %12732 = vmatprep.mubr.msk.f32.mxu0 %vm13145_vm0, %v13144_v0 }
  0xe2   : > { %12735 = vmatprep.subr.mxu1 %v13144_v0  ;;  %12733 = vmatmul.mubr.f32.vlgmr.msra.gmra.mxu0 %v13319_v41 }
  0xe3   : > { %12728 = vmatmul.mubr.f32.vlgmr.msra.gmra.mxu1 %v13287_v13  ;;  %13029 = vset.pattern.permute.xlu0 %v13146_v34 }
  0xe4   : > { %12736 = vmatpush3.msra.mxu1 %v7765_v31  ;;  %12740 = vmatprep.subr.mxu0 %v13144_v0 }
  0xe5   : > { %8759 = vperm.xlu0 %13029, %v11995_v33   ;;  %12737 = vmatprep.mubr.msk.f32.mxu1 %vm13145_vm0, %v13144_v0 }
  0xe6   : > { %12741 = vmatpush3.msra.mxu0 %v7762_v29  ;;  %13030 = vset.pattern.permute.xlu1 %v13146_v34 }
  0xe7   : > { %12738 = vmatmul.mubr.f32.vlgmr.msra.gmra.mxu1 %v13287_v13  ;;  %12742 = vmatprep.mubr.msk.f32.mxu0 %vm13145_vm0, %v13144_v0 }
  0xe8   : > { %12745 = vmatprep.subr.mxu1 %v13144_v0  ;;  %8767 = vperm.xlu1 %13030, %v11997_v36  }
  0xe9   : > { %12743 = vmatmul.mubr.f32.vlgmr.msra.gmra.mxu0 %v13296_v23  ;;  %12746 = vmatpush3.msra.mxu1 %v13873_v24 }
  0xea   : > { %12750 = vmatprep.subr.mxu0 %v13144_v0  ;;  %8763 = vperm.xlu0 %13029, %v11996_v27  }
  0xeb   : > { %12747 = vmatprep.mubr.msk.f32.mxu1 %vm13145_vm0, %v13144_v0  ;;  %12751 = vmatpush3.msra.mxu0 %v7763_v30 }
  0xec   : > { %12748 = vmatmul.mubr.f32.vlgmr.msra.gmra.mxu1 %v13306_v32  ;;  %12752 = vmatprep.mubr.msk.f32.mxu0 %vm13145_vm0, %v13144_v0 }
  0xed   : > { %12755 = vmatprep.subr.mxu1 %v13144_v0  ;;  %8771 = vperm.xlu1 %13030, %v11998_v39  }
  0xee   : > { %12753 = vmatmul.mubr.f32.vlgmr.msra.gmra.mxu0 %v13287_v13  ;;  %12756 = vmatpush3.msra.mxu1 %v13873_v24 }
  0xef   : > { %12760 = vmatprep.subr.mxu0 %v13144_v0  ;;  %8775 = vperm.xlu0 %13029, %v11999_v44  }
  0xf0   : > { %12757 = vmatprep.mubr.msk.f32.mxu1 %vm13145_vm0, %v13144_v0  ;;  %12761 = vmatpush3.msra.mxu0 %v13911_v38 }
  0xf1   : > { %12758 = vmatmul.mubr.f32.vlgmr.msra.gmra.mxu1 %v13287_v13  ;;  %12762 = vmatprep.mubr.msk.f32.mxu0 %vm13145_vm0, %v13144_v0 }
  0xf2   : > { %12765 = vmatprep.subr.mxu1 %v13144_v0  ;;  %8779 = vperm.xlu1 %13030, %v12000_v5  }
  0xf3   : > { %12763 = vmatmul.mubr.f32.vlgmr.msra.gmra.mxu0 %v13319_v41  ;;  %12766 = vmatpush3.msra.mxu1 %v8293_v45 }
  0xf4   : > { %12770 = vmatprep.subr.mxu0 %v13144_v0  ;;  %8783 = vperm.xlu0 %13029, %v12001_v48  }
  0xf5   : > { %12767 = vmatprep.mubr.msk.f32.mxu1 %vm13145_vm0, %v13144_v0  ;;  %12771 = vmatpush3.msra.mxu0 %v8290_v35 }
  0xf6   : > { %12768 = vmatmul.mubr.f32.vlgmr.msra.gmra.mxu1 %v13287_v13  ;;  %12772 = vmatprep.mubr.msk.f32.mxu0 %vm13145_vm0, %v13144_v0 }
  0xf7   : > { %12775 = vmatprep.subr.mxu1 %v13144_v0  ;;  %8787 = vperm.xlu1 %13030, %v12002_v49  }
  0xf8   : > { %12773 = vmatmul.mubr.f32.vlgmr.msra.gmra.mxu0 %v13296_v23  ;;  %12776 = vmatpush3.msra.mxu1 %v13911_v38 }
  0xf9   : > { %12780 = vmatprep.subr.mxu0 %v13144_v0  ;;  %12777 = vmatprep.mubr.msk.f32.mxu1 %vm13145_vm0, %v13144_v0 }
  0xfa   : > { %12781 = vmatpush3.msra.mxu0 %v8291_v37  ;;  %12778 = vmatmul.mubr.f32.vlgmr.msra.gmra.mxu1 %v13306_v32  ;;  %v333_v41 = vpop.f32.mrf.mxu0  ;;  %v712_v32 = vlaneseq }
  0xfb   : > { %12782 = vmatprep.mubr.msk.f32.mxu0 %vm13145_vm0, %v13144_v0  ;;  %12785 = vmatprep.subr.mxu1 %v13144_v0 }
  0xfc   : > { %12783 = vmatmul.mubr.f32.vlgmr.msra.gmra.mxu0 %v13287_v13  ;;  %12786 = vmatpush3.msra.mxu1 %v13911_v38  ;;  %v12314_v23 = vpop.f32.mrf.mxu0  ;;  %v13996_v60 = vshrl.u32 %v712_v32, 7 }
  0xfd   : > { %12787 = vmatprep.mubr.msk.f32.mxu1 %vm13145_vm0, %v13144_v0 }
  0xfe   : > { %12788 = vmatmul.mubr.f32.vlgmr.msra.gmra.mxu1 %v13287_v13  ;;  %v483_v50 = vpop.f32.mrf.mxu0  ;;  %v13999_v13 = vsub.s32 %v711_v59, %v13996_v60 }
  0xff   : > { %v409_v25 = vpop.f32.mrf.mxu1 }
 0x100   : > { %v410_v55 = vadd.f32 %v409_v25, %v333_v41  ;;  %v12324_v56 = vpop.f32.mrf.mxu0 }
 0x101   : > { %v12319_v57 = vpop.f32.mrf.mxu1 }
 0x102   : > { %v484_v58 = vadd.f32 %v483_v50, %v410_v55  ;;  %v631_v40 = vpop.f32.mrf.mxu0 }
 0x103   : > { %v557_v61 = vpop.f32.mrf.mxu1 }
 0x104   : > { %v558_v62 = vadd.f32 %v557_v61, %v484_v58  ;;  %v12334_v53 = vpop.f32.mrf.mxu0 }
 0x105   : > { %v12329_v1 = vpop.f32.mrf.mxu1 }
 0x106   : > { %v632_v0 = vadd.f32 %v631_v40, %v558_v62  ;;  %v862_v2 = vpop.f32.mrf.mxu0 }
 0x107   : > { %v703_v4 = vpop.f32.mrf.mxu1 }
 0x108   : > { %v704_v6 = vadd.f32 %v703_v4, %v632_v0  ;;  %v12344_v11 = vpop.f32.mrf.mxu0 }
 0x109   : > { %v12339_v7 = vpop.f32.mrf.mxu1 }
 0x10a   : > { %v708_v8 = vcombine.high %v704_v6, %v704_v6  ;;  %v715_v9 = vrot.slane %v704_v6, %v13999_v13  ;;  %v1012_v10 = vpop.f32.mrf.mxu0 }
 0x10b   : > { %v938_v28 = vpop.f32.mrf.mxu1 }
 0x10c   : > { %v722_v12 = vrot.slane %v708_v8, %v13999_v13  ;;  %v723_v15 = vcombine.high %v715_v9, %v715_v9  ;;  %v731_v43 = vrot.slane %v715_v9, %v13999_v13  ;;  %v939_v51 = vadd.f32 %v938_v28, %v862_v2  ;;  %v12354_v47 = vpop.f32.mrf.mxu0 }
 0x10d   : > { %v12349_v16 = vpop.f32.mrf.mxu1 }
 0x10e   : > { %v724_v17 = vcombine.high %v722_v12, %v722_v12  ;;  %v738_v18 = vrot.slane %v722_v12, %v13999_v13  ;;  %v745_v22 = vrot.slane %v723_v15, %v13999_v13  ;;  %v753_v63 = vcombine.high %v731_v43, %v731_v43  ;;  %766 = vst.msk [vmem:[#allocation2] sm:$0x1] %vm765_vm6, %v731_v43  ;;  %v1160_v46 = vpop.f32.mrf.mxu0 }
 0x10f   : > { %v1013_v19 = vadd.f32 %v1012_v10, %v939_v51  ;;  %v1086_v3 = vpop.f32.mrf.mxu1 }
 0x110   : > { %v752_v21 = vrot.slane %v724_v17, %v13999_v13  ;;  %v754_v14 = vcombine.high %v738_v18, %v738_v18  ;;  %v755_v24 = vcombine.high %v745_v22, %v745_v22  ;;  %767 = vst.msk [vmem:[#allocation2 + $0x10] sm:$0x1] %vm765_vm6, %v745_v22  ;;  %768 = vst.msk [vmem:[#allocation2 + $0x20] sm:$0x1] %vm765_vm6, %v753_v63  ;;  %v12364_v26 = vpop.f32.mrf.mxu0 }
 0x111   : > { %770 = vst.msk [vmem:[#allocation2 + $0x40] sm:$0x1] %vm765_vm6, %v738_v18  ;;  %v1087_v29 = vadd.f32 %v1086_v3, %v1013_v19  ;;  %v12359_v30 = vpop.f32.mrf.mxu1 }
 0x112   : > { %v756_v20 = vcombine.high %v752_v21, %v752_v21  ;;  %769 = vst.msk [vmem:[#allocation2 + $0x30] sm:$0x1] %vm765_vm6, %v755_v24  ;;  %771 = vst.msk [vmem:[#allocation2 + $0x50] sm:$0x1] %vm765_vm6, %v752_v21  ;;  %v1390_v38 = vpop.f32.mrf.mxu0 }
 0x113   : > { %772 = vst.msk [vmem:[#allocation2 + $0x60] sm:$0x1] %vm765_vm6, %v754_v14  ;;  %v1161_v31 = vadd.f32 %v1160_v46, %v1087_v29  ;;  %v1232_v33 = vpop.f32.mrf.mxu1 }
 0x114   : > { %773 = vst.msk [vmem:[#allocation2 + $0x70] sm:$0x1] %vm765_vm6, %v756_v20  ;;  %v12374_v34 = vpop.f32.mrf.mxu0 }
 0x115   : > { %v1233_v35 = vadd.f32 %v1232_v33, %v1161_v31  ;;  %v12369_v36 = vpop.f32.mrf.mxu1 }
 0x116   : > { %v1540_v27 = vpop.f32.mrf.mxu0 }
 0x117   : > { %v1237_v37 = vcombine.high %v1233_v35, %v1233_v35  ;;  %v1244_v39 = vrot.slane %v1233_v35, %v13999_v13  ;;  %v1466_v42 = vpop.f32.mrf.mxu1 }
 0x118   : > { %v1467_v44 = vadd.f32 %v1466_v42, %v1390_v38  ;;  %v12384_v5 = vpop.f32.mrf.mxu0 }
 0x119   : > { %v1251_v45 = vrot.slane %v1237_v37, %v13999_v13  ;;  %v1252_v48 = vcombine.high %v1244_v39, %v1244_v39  ;;  %v1260_v49 = vrot.slane %v1244_v39, %v13999_v13  ;;  %v12379_v41 = vpop.f32.mrf.mxu1 }
 0x11a   : > { %v1541_v23 = vadd.f32 %v1540_v27, %v1467_v44  ;;  %v1688_v50 = vpop.f32.mrf.mxu0 }
 0x11b   : > { %v1253_v52 = vcombine.high %v1251_v45, %v1251_v45  ;;  %v1267_v54 = vrot.slane %v1251_v45, %v13999_v13  ;;  %v1274_v32 = vrot.slane %v1252_v48, %v13999_v13  ;;  %v1282_v25 = vcombine.high %v1260_v49, %v1260_v49  ;;  %1294 = vst.msk [vmem:[#allocation2 + $0x1] sm:$0x1] %vm765_vm6, %v1260_v49  ;;  %v1614_v55 = vpop.f32.mrf.mxu1 }
 0x11c   : > { %v1615_v56 = vadd.f32 %v1614_v55, %v1541_v23  ;;  %v12394_v57 = vpop.f32.mrf.mxu0 }
 0x11d   : > { %v1281_v58 = vrot.slane %v1253_v52, %v13999_v13  ;;  %v1283_v40 = vcombine.high %v1267_v54, %v1267_v54  ;;  %v1284_v59 = vcombine.high %v1274_v32, %v1274_v32  ;;  %1295 = vst.msk [vmem:[#allocation2 + $0x11] sm:$0x1] %vm765_vm6, %v1274_v32  ;;  %1296 = vst.msk [vmem:[#allocation2 + $0x21] sm:$0x1] %vm765_vm6, %v1282_v25  ;;  %v12389_v61 = vpop.f32.mrf.mxu1 }
 0x11e   : > { %1298 = vst.msk [vmem:[#allocation2 + $0x41] sm:$0x1] %vm765_vm6, %v1267_v54  ;;  %v1689_v62 = vadd.f32 %v1688_v50, %v1615_v56  ;;  %v1918_v53 = vpop.f32.mrf.mxu0 }
 0x11f   : > { %v1285_v1 = vcombine.high %v1281_v58, %v1281_v58  ;;  %1297 = vst.msk [vmem:[#allocation2 + $0x31] sm:$0x1] %vm765_vm6, %v1284_v59  ;;  %1299 = vst.msk [vmem:[#allocation2 + $0x51] sm:$0x1] %vm765_vm6, %v1281_v58  ;;  %v1760_v0 = vpop.f32.mrf.mxu1 }
 0x120   : > { %1300 = vst.msk [vmem:[#allocation2 + $0x61] sm:$0x1] %vm765_vm6, %v1283_v40  ;;  %v1761_v2 = vadd.f32 %v1760_v0, %v1689_v62  ;;  %v12404_v4 = vpop.f32.mrf.mxu0 }
 0x121   : > { %1301 = vst.msk [vmem:[#allocation2 + $0x71] sm:$0x1] %vm765_vm6, %v1285_v1  ;;  %v12399_v6 = vpop.f32.mrf.mxu1 }
 0x122   : > { %v1765_v11 = vcombine.high %v1761_v2, %v1761_v2  ;;  %v1772_v7 = vrot.slane %v1761_v2, %v13999_v13  ;;  %v2068_v8 = vpop.f32.mrf.mxu0 }
 0x123   : > { %v1994_v9 = vpop.f32.mrf.mxu1 }
 0x124   : > { %v1779_v10 = vrot.slane %v1765_v11, %v13999_v13  ;;  %v1780_v28 = vcombine.high %v1772_v7, %v1772_v7  ;;  %v1788_v12 = vrot.slane %v1772_v7, %v13999_v13  ;;  %v1995_v15 = vadd.f32 %v1994_v9, %v1918_v53  ;;  %v12414_v43 = vpop.f32.mrf.mxu0 }
 0x125   : > { %v12409_v51 = vpop.f32.mrf.mxu1 }
 0x126   : > { %v1781_v47 = vcombine.high %v1779_v10, %v1779_v10  ;;  %v1795_v16 = vrot.slane %v1779_v10, %v13999_v13  ;;  %v1802_v17 = vrot.slane %v1780_v28, %v13999_v13  ;;  %v1810_v18 = vcombine.high %v1788_v12, %v1788_v12  ;;  %1822 = vst.msk [vmem:[#allocation2 + $0x2] sm:$0x1] %vm765_vm6, %v1788_v12  ;;  %v2216_v22 = vpop.f32.mrf.mxu0 }
 0x127   : > { %v2069_v63 = vadd.f32 %v2068_v8, %v1995_v15  ;;  %v2142_v46 = vpop.f32.mrf.mxu1 }
 0x128   : > { %v1809_v19 = vrot.slane %v1781_v47, %v13999_v13  ;;  %v1811_v3 = vcombine.high %v1795_v16, %v1795_v16  ;;  %v1812_v21 = vcombine.high %v1802_v17, %v1802_v17  ;;  %1823 = vst.msk [vmem:[#allocation2 + $0x12] sm:$0x1] %vm765_vm6, %v1802_v17  ;;  %1824 = vst.msk [vmem:[#allocation2 + $0x22] sm:$0x1] %vm765_vm6, %v1810_v18  ;;  %v12424_v14 = vpop.f32.mrf.mxu0 }
 0x129   : > { %1826 = vst.msk [vmem:[#allocation2 + $0x42] sm:$0x1] %vm765_vm6, %v1795_v16  ;;  %v2143_v24 = vadd.f32 %v2142_v46, %v2069_v63  ;;  %v12419_v26 = vpop.f32.mrf.mxu1 }
 0x12a   : > { %v1813_v29 = vcombine.high %v1809_v19, %v1809_v19  ;;  %1825 = vst.msk [vmem:[#allocation2 + $0x32] sm:$0x1] %vm765_vm6, %v1812_v21  ;;  %1827 = vst.msk [vmem:[#allocation2 + $0x52] sm:$0x1] %vm765_vm6, %v1809_v19  ;;  %v2446_v30 = vpop.f32.mrf.mxu0 }
 0x12b   : > { %1828 = vst.msk [vmem:[#allocation2 + $0x62] sm:$0x1] %vm765_vm6, %v1811_v3  ;;  %v2217_v20 = vadd.f32 %v2216_v22, %v2143_v24  ;;  %v2288_v38 = vpop.f32.mrf.mxu1 }
 0x12c   : > { %1829 = vst.msk [vmem:[#allocation2 + $0x72] sm:$0x1] %vm765_vm6, %v1813_v29  ;;  %v12434_v31 = vpop.f32.mrf.mxu0 }
 0x12d   : > { %v2289_v33 = vadd.f32 %v2288_v38, %v2217_v20  ;;  %v12429_v34 = vpop.f32.mrf.mxu1 }
 0x12e   : > { %v2596_v35 = vpop.f32.mrf.mxu0 }
 0x12f   : > { %v2293_v36 = vcombine.high %v2289_v33, %v2289_v33  ;;  %v2300_v27 = vrot.slane %v2289_v33, %v13999_v13  ;;  %v2522_v37 = vpop.f32.mrf.mxu1  ;;  %v8807_v33 = vld [vmem:[%s15033_s3 + $0x8] sm:$0xff] }
 0x130   : > { %v2523_v39 = vadd.f32 %v2522_v37, %v2446_v30  ;;  %v12444_v42 = vpop.f32.mrf.mxu0 }
 0x131   : > { %v2307_v44 = vrot.slane %v2293_v36, %v13999_v13  ;;  %v2308_v5 = vcombine.high %v2300_v27, %v2300_v27  ;;  %v2316_v45 = vrot.slane %v2300_v27, %v13999_v13  ;;  %v12439_v48 = vpop.f32.mrf.mxu1 }
 0x132   : > { %v2597_v49 = vadd.f32 %v2596_v35, %v2523_v39  ;;  %v2744_v41 = vpop.f32.mrf.mxu0  ;;  %v14074_v35 = vand.u32 4294901760, %v8807_v33  ;;  %v8806_v39 = vld [vmem:[%s15033_s3] sm:$0xff] }
 0x133   : > { %v2309_v23 = vcombine.high %v2307_v44, %v2307_v44  ;;  %v2323_v50 = vrot.slane %v2307_v44, %v13999_v13  ;;  %v2330_v52 = vrot.slane %v2308_v5, %v13999_v13  ;;  %v2338_v54 = vcombine.high %v2316_v45, %v2316_v45  ;;  %2350 = vst.msk [vmem:[#allocation2 + $0x3] sm:$0x1] %vm765_vm6, %v2316_v45  ;;  %v2670_v32 = vpop.f32.mrf.mxu1 }
 0x134   : > { %v2671_v25 = vadd.f32 %v2670_v32, %v2597_v49  ;;  %v12454_v55 = vpop.f32.mrf.mxu0  ;;  %v14081_v5 = vsub.f32 %v8807_v33, %v14074_v35  ;;  %v14083_v45 = vand.u32 4294901760, %v8806_v39  ;;  %12790 = vmatprep.subr.mxu0 %v14074_v35 }
 0x135   : > { %v2337_v56 = vrot.slane %v2309_v23, %v13999_v13  ;;  %v2339_v57 = vcombine.high %v2323_v50, %v2323_v50  ;;  %v2340_v58 = vcombine.high %v2330_v52, %v2330_v52  ;;  %2351 = vst.msk [vmem:[#allocation2 + $0x13] sm:$0x1] %vm765_vm6, %v2330_v52  ;;  %2352 = vst.msk [vmem:[#allocation2 + $0x23] sm:$0x1] %vm765_vm6, %v2338_v54  ;;  %v12449_v40 = vpop.f32.mrf.mxu1  ;;  %12791 = vmatpush3.msra.mxu0 %v14074_v35 }
 0x136   : > { %2354 = vst.msk [vmem:[#allocation2 + $0x43] sm:$0x1] %vm765_vm6, %v2323_v50  ;;  %v2745_v59 = vadd.f32 %v2744_v41, %v2671_v25  ;;  %v2974_v61 = vpop.f32.mrf.mxu0  ;;  %v14090_v54 = vand.u32 4294901760, %v14081_v5  ;;  %v14093_v32 = vsub.f32 %v8806_v39, %v14083_v45  ;;  %12792 = vmatprep.subr.mxu0 %v14083_v45 }
 0x137   : > { %v2341_v62 = vcombine.high %v2337_v56, %v2337_v56  ;;  %2353 = vst.msk [vmem:[#allocation2 + $0x33] sm:$0x1] %vm765_vm6, %v2340_v58  ;;  %2355 = vst.msk [vmem:[#allocation2 + $0x53] sm:$0x1] %vm765_vm6, %v2337_v56  ;;  %v2816_v53 = vpop.f32.mrf.mxu1  ;;  %12793 = vmatpush3.msra.mxu0 %v14083_v45 }
 0x138   : > { %2356 = vst.msk [vmem:[#allocation2 + $0x63] sm:$0x1] %vm765_vm6, %v2339_v57  ;;  %v2817_v1 = vadd.f32 %v2816_v53, %v2745_v59  ;;  %v12464_v0 = vpop.f32.mrf.mxu0  ;;  %12846 = vmatprep.subr.mxu0 %v14081_v5 }
 0x139   : > { %2357 = vst.msk [vmem:[#allocation2 + $0x73] sm:$0x1] %vm765_vm6, %v2341_v62  ;;  %v12459_v2 = vpop.f32.mrf.mxu1  ;;  %v14103_v62 = vand.u32 4294901760, %v14093_v32 }
 0x13a   : > { %v2821_v4 = vcombine.high %v2817_v1, %v2817_v1  ;;  %v2828_v6 = vrot.slane %v2817_v1, %v13999_v13  ;;  %v3124_v11 = vpop.f32.mrf.mxu0 }
 0x13b   : > { %v3050_v7 = vpop.f32.mrf.mxu1 }
 0x13c   : > { %v2835_v8 = vrot.slane %v2821_v4, %v13999_v13  ;;  %v2836_v9 = vcombine.high %v2828_v6, %v2828_v6  ;;  %v2844_v10 = vrot.slane %v2828_v6, %v13999_v13  ;;  %v3051_v28 = vadd.f32 %v3050_v7, %v2974_v61  ;;  %v12474_v12 = vpop.f32.mrf.mxu0 }
 0x13d   : > { %v12469_v15 = vpop.f32.mrf.mxu1  ;;  %v9116_v61 = vsub.f32 %v14081_v5, %v14090_v54  ;;  %v9123_v7 = vsub.f32 %v14093_v32, %v14103_v62 }
 0x13e   : > { %v2837_v43 = vcombine.high %v2835_v8, %v2835_v8  ;;  %v2851_v51 = vrot.slane %v2835_v8, %v13999_v13  ;;  %v2858_v47 = vrot.slane %v2836_v9, %v13999_v13  ;;  %v2866_v16 = vcombine.high %v2844_v10, %v2844_v10  ;;  %2878 = vst.msk [vmem:[#allocation2 + $0x4] sm:$0x1] %vm765_vm6, %v2844_v10  ;;  %v3272_v17 = vpop.f32.mrf.mxu0 }
 0x13f   : > { %v3125_v18 = vadd.f32 %v3124_v11, %v3051_v28  ;;  %v3198_v22 = vpop.f32.mrf.mxu1  ;;  %v9117_v11 = vand.u32 4294901760, %v9116_v61  ;;  %v9124_v12 = vand.u32 4294901760, %v9123_v7 }
 0x140   : > { %v2865_v63 = vrot.slane %v2837_v43, %v13999_v13  ;;  %v2867_v46 = vcombine.high %v2851_v51, %v2851_v51  ;;  %v2868_v19 = vcombine.high %v2858_v47, %v2858_v47  ;;  %2879 = vst.msk [vmem:[#allocation2 + $0x14] sm:$0x1] %vm765_vm6, %v2858_v47  ;;  %2880 = vst.msk [vmem:[#allocation2 + $0x24] sm:$0x1] %vm765_vm6, %v2866_v16  ;;  %v12484_v3 = vpop.f32.mrf.mxu0 }
 0x141   : > { %2882 = vst.msk [vmem:[#allocation2 + $0x44] sm:$0x1] %vm765_vm6, %v2851_v51  ;;  %v3199_v21 = vadd.f32 %v3198_v22, %v3125_v18  ;;  %v12479_v14 = vpop.f32.mrf.mxu1  ;;  %12818 = vmatprep.subr.mxu1 %v9117_v11 }
 0x142   : > { %v2869_v24 = vcombine.high %v2865_v63, %v2865_v63  ;;  %2881 = vst.msk [vmem:[#allocation2 + $0x34] sm:$0x1] %vm765_vm6, %v2868_v19  ;;  %2883 = vst.msk [vmem:[#allocation2 + $0x54] sm:$0x1] %vm765_vm6, %v2865_v63  ;;  %v3502_v26 = vpop.f32.mrf.mxu0  ;;  %12819 = vmatpush3.msra.mxu1 %v9117_v11 }
 0x143   : > { %2884 = vst.msk [vmem:[#allocation2 + $0x64] sm:$0x1] %vm765_vm6, %v2867_v46  ;;  %v3273_v29 = vadd.f32 %v3272_v17, %v3199_v21  ;;  %v3344_v30 = vpop.f32.mrf.mxu1  ;;  %12820 = vmatprep.subr.mxu1 %v9124_v12 }
 0x144   : > { %2885 = vst.msk [vmem:[#allocation2 + $0x74] sm:$0x1] %vm765_vm6, %v2869_v24  ;;  %v12494_v20 = vpop.f32.mrf.mxu0  ;;  %12821 = vmatpush3.msra.mxu1 %v9124_v12 }
 0x145   : > { %v3345_v38 = vadd.f32 %v3344_v30, %v3273_v29  ;;  %v12489_v31 = vpop.f32.mrf.mxu1  ;;  %12874 = vmatprep.subr.mxu1 %v14074_v35 }
 0x146   : > { %v3652_v34 = vpop.f32.mrf.mxu0 }
 0x147   : > { %v3349_v36 = vcombine.high %v3345_v38, %v3345_v38  ;;  %v3356_v27 = vrot.slane %v3345_v38, %v13999_v13  ;;  %v3578_v37 = vpop.f32.mrf.mxu1 }
 0x148   : > { %v3579_v42 = vadd.f32 %v3578_v37, %v3502_v26  ;;  %v12504_v44 = vpop.f32.mrf.mxu0 }
 0x149   : > { %v3363_v48 = vrot.slane %v3349_v36, %v13999_v13  ;;  %v3364_v49 = vcombine.high %v3356_v27, %v3356_v27  ;;  %v3372_v41 = vrot.slane %v3356_v27, %v13999_v13  ;;  %v12499_v23 = vpop.f32.mrf.mxu1 }
 0x14a   : > { %v3653_v50 = vadd.f32 %v3652_v34, %v3579_v42  ;;  %v3800_v52 = vpop.f32.mrf.mxu0 }
 0x14b   : > { %v3365_v25 = vcombine.high %v3363_v48, %v3363_v48  ;;  %v3379_v55 = vrot.slane %v3363_v48, %v13999_v13  ;;  %v3386_v56 = vrot.slane %v3364_v49, %v13999_v13  ;;  %v3394_v57 = vcombine.high %v3372_v41, %v3372_v41  ;;  %3406 = vst.msk [vmem:[#allocation2 + $0x5] sm:$0x1] %vm765_vm6, %v3372_v41  ;;  %v3726_v58 = vpop.f32.mrf.mxu1 }
 0x14c   : > { %v3727_v40 = vadd.f32 %v3726_v58, %v3653_v50  ;;  %v12514_v59 = vpop.f32.mrf.mxu0 }
 0x14d   : > { %v3393_v53 = vrot.slane %v3365_v25, %v13999_v13  ;;  %v3395_v1 = vcombine.high %v3379_v55, %v3379_v55  ;;  %v3396_v0 = vcombine.high %v3386_v56, %v3386_v56  ;;  %3407 = vst.msk [vmem:[#allocation2 + $0x15] sm:$0x1] %vm765_vm6, %v3386_v56  ;;  %3408 = vst.msk [vmem:[#allocation2 + $0x25] sm:$0x1] %vm765_vm6, %v3394_v57  ;;  %v12509_v2 = vpop.f32.mrf.mxu1 }
 0x14e   : > { %3410 = vst.msk [vmem:[#allocation2 + $0x45] sm:$0x1] %vm765_vm6, %v3379_v55  ;;  %v3801_v4 = vadd.f32 %v3800_v52, %v3727_v40  ;;  %v4030_v6 = vpop.f32.mrf.mxu0 }
 0x14f   : > { %v3397_v8 = vcombine.high %v3393_v53, %v3393_v53  ;;  %3409 = vst.msk [vmem:[#allocation2 + $0x35] sm:$0x1] %vm765_vm6, %v3396_v0  ;;  %3411 = vst.msk [vmem:[#allocation2 + $0x55] sm:$0x1] %vm765_vm6, %v3393_v53  ;;  %v3872_v9 = vpop.f32.mrf.mxu1 }
 0x150   : > { %3412 = vst.msk [vmem:[#allocation2 + $0x65] sm:$0x1] %vm765_vm6, %v3395_v1  ;;  %v3873_v10 = vadd.f32 %v3872_v9, %v3801_v4  ;;  %v12524_v28 = vpop.f32.mrf.mxu0 }
 0x151   : > { %3413 = vst.msk [vmem:[#allocation2 + $0x75] sm:$0x1] %vm765_vm6, %v3397_v8  ;;  %v12519_v15 = vpop.f32.mrf.mxu1 }
 0x152   : > { %v3877_v43 = vcombine.high %v3873_v10, %v3873_v10  ;;  %v3884_v51 = vrot.slane %v3873_v10, %v13999_v13  ;;  %v4180_v47 = vpop.f32.mrf.mxu0 }
 0x153   : > { %v4106_v16 = vpop.f32.mrf.mxu1 }
 0x154   : > { %v3891_v17 = vrot.slane %v3877_v43, %v13999_v13  ;;  %v3892_v18 = vcombine.high %v3884_v51, %v3884_v51  ;;  %v3900_v22 = vrot.slane %v3884_v51, %v13999_v13  ;;  %v4107_v63 = vadd.f32 %v4106_v16, %v4030_v6  ;;  %v12534_v46 = vpop.f32.mrf.mxu0 }
 0x155   : > { %v12529_v19 = vpop.f32.mrf.mxu1 }
 0x156   : > { %v3893_v3 = vcombine.high %v3891_v17, %v3891_v17  ;;  %v3907_v21 = vrot.slane %v3891_v17, %v13999_v13  ;;  %v3914_v14 = vrot.slane %v3892_v18, %v13999_v13  ;;  %v3922_v24 = vcombine.high %v3900_v22, %v3900_v22  ;;  %3934 = vst.msk [vmem:[#allocation2 + $0x6] sm:$0x1] %vm765_vm6, %v3900_v22  ;;  %v4328_v26 = vpop.f32.mrf.mxu0 }
 0x157   : > { %v4181_v29 = vadd.f32 %v4180_v47, %v4107_v63  ;;  %v4254_v30 = vpop.f32.mrf.mxu1 }
 0x158   : > { %v3921_v20 = vrot.slane %v3893_v3, %v13999_v13  ;;  %v3923_v38 = vcombine.high %v3907_v21, %v3907_v21  ;;  %v3924_v31 = vcombine.high %v3914_v14, %v3914_v14  ;;  %3935 = vst.msk [vmem:[#allocation2 + $0x16] sm:$0x1] %vm765_vm6, %v3914_v14  ;;  %3936 = vst.msk [vmem:[#allocation2 + $0x26] sm:$0x1] %vm765_vm6, %v3922_v24  ;;  %v12544_v33 = vpop.f32.mrf.mxu0 }
 0x159   : > { %3938 = vst.msk [vmem:[#allocation2 + $0x46] sm:$0x1] %vm765_vm6, %v3907_v21  ;;  %v4255_v34 = vadd.f32 %v4254_v30, %v4181_v29  ;;  %v12539_v36 = vpop.f32.mrf.mxu1 }
 0x15a   : > { %v3925_v27 = vcombine.high %v3921_v20, %v3921_v20  ;;  %3937 = vst.msk [vmem:[#allocation2 + $0x36] sm:$0x1] %vm765_vm6, %v3924_v31  ;;  %3939 = vst.msk [vmem:[#allocation2 + $0x56] sm:$0x1] %vm765_vm6, %v3921_v20  ;;  %v4558_v37 = vpop.f32.mrf.mxu0 }
 0x15b   : > { %3940 = vst.msk [vmem:[#allocation2 + $0x66] sm:$0x1] %vm765_vm6, %v3923_v38  ;;  %v4329_v39 = vadd.f32 %v4328_v26, %v4255_v34  ;;  %v4400_v42 = vpop.f32.mrf.mxu1 }
 0x15c   : > { %3941 = vst.msk [vmem:[#allocation2 + $0x76] sm:$0x1] %vm765_vm6, %v3925_v27  ;;  %v12554_v44 = vpop.f32.mrf.mxu0 }
 0x15d   : > { %v4401_v48 = vadd.f32 %v4400_v42, %v4329_v39  ;;  %v12549_v49 = vpop.f32.mrf.mxu1 }
 0x15e   : > { %v4708_v41 = vpop.f32.mrf.mxu0 }
 0x15f   : > { %v4405_v23 = vcombine.high %v4401_v48, %v4401_v48  ;;  %v4412_v50 = vrot.slane %v4401_v48, %v13999_v13  ;;  %v4634_v52 = vpop.f32.mrf.mxu1 }
 0x160   : > { %v4635_v25 = vadd.f32 %v4634_v52, %v4558_v37  ;;  %v12564_v55 = vpop.f32.mrf.mxu0  ;;  %v14145_v17 = vpop.permute.xlu0 %8759 }
 0x161   : > { %v4419_v56 = vrot.slane %v4405_v23, %v13999_v13  ;;  %v4420_v57 = vcombine.high %v4412_v50, %v4412_v50  ;;  %v4428_v58 = vrot.slane %v4412_v50, %v13999_v13  ;;  %v12559_v40 = vpop.f32.mrf.mxu1 }
 0x162   : > { %v4709_v59 = vadd.f32 %v4708_v41, %v4635_v25  ;;  %v4856_v61 = vpop.f32.mrf.mxu0 }
 0x163   : > { %v4421_v53 = vcombine.high %v4419_v56, %v4419_v56  ;;  %v4435_v1 = vrot.slane %v4419_v56, %v13999_v13  ;;  %v4442_v0 = vrot.slane %v4420_v57, %v13999_v13  ;;  %v4450_v2 = vcombine.high %v4428_v58, %v4428_v58  ;;  %4462 = vst.msk [vmem:[#allocation2 + $0x7] sm:$0x1] %vm765_vm6, %v4428_v58  ;;  %v4782_v4 = vpop.f32.mrf.mxu1 }
 0x164   : > { %v4783_v6 = vadd.f32 %v4782_v4, %v4709_v59  ;;  %v12574_v11 = vpop.f32.mrf.mxu0 }
 0x165   : > { %v4449_v7 = vrot.slane %v4421_v53, %v13999_v13  ;;  %v4451_v8 = vcombine.high %v4435_v1, %v4435_v1  ;;  %v4452_v9 = vcombine.high %v4442_v0, %v4442_v0  ;;  %4463 = vst.msk [vmem:[#allocation2 + $0x17] sm:$0x1] %vm765_vm6, %v4442_v0  ;;  %4464 = vst.msk [vmem:[#allocation2 + $0x27] sm:$0x1] %vm765_vm6, %v4450_v2  ;;  %v12569_v10 = vpop.f32.mrf.mxu1 }
 0x166   : > { %4466 = vst.msk [vmem:[#allocation2 + $0x47] sm:$0x1] %vm765_vm6, %v4435_v1  ;;  %v4857_v28 = vadd.f32 %v4856_v61, %v4783_v6  ;;  %v5086_v12 = vpop.f32.mrf.mxu0 }
 0x167   : > { %v4453_v15 = vcombine.high %v4449_v7, %v4449_v7  ;;  %4465 = vst.msk [vmem:[#allocation2 + $0x37] sm:$0x1] %vm765_vm6, %v4452_v9  ;;  %4467 = vst.msk [vmem:[#allocation2 + $0x57] sm:$0x1] %vm765_vm6, %v4449_v7  ;;  %v4928_v43 = vpop.f32.mrf.mxu1 }
 0x168   : > { %4468 = vst.msk [vmem:[#allocation2 + $0x67] sm:$0x1] %vm765_vm6, %v4451_v8  ;;  %v4929_v51 = vadd.f32 %v4928_v43, %v4857_v28  ;;  %v12584_v47 = vpop.f32.mrf.mxu0 }
 0x169   : > { %4469 = vst.msk [vmem:[#allocation2 + $0x77] sm:$0x1] %vm765_vm6, %v4453_v15  ;;  %v12579_v16 = vpop.f32.mrf.mxu1 }
 0x16a   : > { %v8694_v18 = vld [vmem:[#allocation2] sm:$0xff]  ;;  %v4933_v22 = vcombine.high %v4929_v51, %v4929_v51  ;;  %v4940_v63 = vrot.slane %v4929_v51, %v13999_v13  ;;  %v5236_v46 = vpop.f32.mrf.mxu0 }
 0x16b   : > { %v8790_v19 = vadd.f32 %v14145_v17, %v8694_v18  ;;  %v5162_v3 = vpop.f32.mrf.mxu1 }
 0x16c   : > { %v4947_v21 = vrot.slane %v4933_v22, %v13999_v13  ;;  %v4948_v14 = vcombine.high %v4940_v63, %v4940_v63  ;;  %v4956_v24 = vrot.slane %v4940_v63, %v13999_v13  ;;  %v12594_v26 = vpop.f32.mrf.mxu0  ;;  %v5163_v27 = vadd.f32 %v5162_v3, %v5086_v12 }
 0x16d   : > { %v8810_v29 = vsel %vm8808_vm7, %v8790_v19, 0  ;;  %v12589_v30 = vpop.f32.mrf.mxu1 }
 0x16e   : > { %v14152_v20 = vand.u32 4294901760, %v8810_v29  ;;  %v4949_v38 = vcombine.high %v4947_v21, %v4947_v21  ;;  %v4963_v31 = vrot.slane %v4947_v21, %v13999_v13  ;;  %v4970_v33 = vrot.slane %v4948_v14, %v13999_v13  ;;  %4990 = vst.msk [vmem:[#allocation2 + $0x8] sm:$0x1] %vm765_vm6, %v4956_v24  ;;  %v5384_v34 = vpop.f32.mrf.mxu0 }
 0x16f   : > { %v4978_v36 = vcombine.high %v4956_v24, %v4956_v24  ;;  %v5310_v37 = vpop.f32.mrf.mxu1  ;;  %v5237_v52 = vadd.f32 %v5236_v46, %v5163_v27 }
 0x170   : > { %v14158_v39 = vsub.f32 %v8810_v29, %v14152_v20  ;;  %v4977_v42 = vrot.slane %v4949_v38, %v13999_v13  ;;  %4991 = vst.msk [vmem:[#allocation2 + $0x18] sm:$0x1] %vm765_vm6, %v4970_v33  ;;  %4994 = vst.msk [vmem:[#allocation2 + $0x48] sm:$0x1] %vm765_vm6, %v4963_v31  ;;  %12822 = vmatprep.mubr.f32.mxu1 %v14152_v20  ;;  %v12604_v44 = vpop.f32.mrf.mxu0  ;;  %v4979_v48 = vcombine.high %v4963_v31, %v4963_v31 }
 0x171   : > { %v4980_v49 = vcombine.high %v4970_v33, %v4970_v33  ;;  %4992 = vst.msk [vmem:[#allocation2 + $0x28] sm:$0x1] %vm765_vm6, %v4978_v36  ;;  %v12599_v41 = vpop.f32.mrf.mxu1  ;;  %v5311_v57 = vadd.f32 %v5310_v37, %v5237_v52 }
 0x172   : > { %v4981_v23 = vcombine.high %v4977_v42, %v4977_v42  ;;  %4995 = vst.msk [vmem:[#allocation2 + $0x58] sm:$0x1] %vm765_vm6, %v4977_v42  ;;  %v5614_v50 = vpop.f32.mrf.mxu0  ;;  %4996 = vst.msk [vmem:[#allocation2 + $0x68] sm:$0x1] %vm765_vm6, %v4979_v48  ;;  %v8926_v56 = vand.u32 4294901760, %v14158_v39 }
 0x173   : > { %4993 = vst.msk [vmem:[#allocation2 + $0x38] sm:$0x1] %vm765_vm6, %v4980_v49  ;;  %v5456_v25 = vpop.f32.mrf.mxu1  ;;  %v5385_v61 = vadd.f32 %v5384_v34, %v5311_v57 }
 0x174   : > { %4997 = vst.msk [vmem:[#allocation2 + $0x78] sm:$0x1] %vm765_vm6, %v4981_v23  ;;  %v12614_v55 = vpop.f32.mrf.mxu0  ;;  %v8927_v40 = vsub.f32 %v14158_v39, %v8926_v56 }
 0x175   : > { %v12609_v58 = vpop.f32.mrf.mxu1  ;;  %v5457_v4 = vadd.f32 %v5456_v25, %v5385_v61 }
 0x176   : > { %v5764_v59 = vpop.f32.mrf.mxu0  ;;  %v8928_v0 = vand.u32 4294901760, %v8927_v40 }
 0x177   : > { %v5690_v53 = vpop.f32.mrf.mxu1  ;;  %v5461_v8 = vcombine.high %v5457_v4, %v5457_v4  ;;  %v5468_v9 = vrot.slane %v5457_v4, %v13999_v13 }
 0x178   : > { %v5691_v1 = vadd.f32 %v5690_v53, %v5614_v50  ;;  %v12624_v2 = vpop.f32.mrf.mxu0  ;;  %12794 = vmatprep.mubr.f32.mxu0 %v8928_v0 }
 0x179   : > { %v12619_v6 = vpop.f32.mrf.mxu1  ;;  %v5475_v15 = vrot.slane %v5461_v8, %v13999_v13  ;;  %v5476_v43 = vcombine.high %v5468_v9, %v5468_v9  ;;  %v5484_v51 = vrot.slane %v5468_v9, %v13999_v13 }
 0x17a   : > { %v5765_v11 = vadd.f32 %v5764_v59, %v5691_v1  ;;  %v5912_v7 = vpop.f32.mrf.mxu0 }
 0x17b   : > { %v5838_v10 = vpop.f32.mrf.mxu1  ;;  %v5477_v22 = vcombine.high %v5475_v15, %v5475_v15  ;;  %v5491_v63 = vrot.slane %v5475_v15, %v13999_v13  ;;  %v5498_v46 = vrot.slane %v5476_v43, %v13999_v13  ;;  %v5506_v19 = vcombine.high %v5484_v51, %v5484_v51  ;;  %5518 = vst.msk [vmem:[#allocation2 + $0x9] sm:$0x1] %vm765_vm6, %v5484_v51 }
 0x17c   : > { %v5839_v28 = vadd.f32 %v5838_v10, %v5765_v11  ;;  %v12634_v12 = vpop.f32.mrf.mxu0 }
 0x17d   : > { %v12629_v47 = vpop.f32.mrf.mxu1  ;;  %v5505_v24 = vrot.slane %v5477_v22, %v13999_v13  ;;  %v5507_v26 = vcombine.high %v5491_v63, %v5491_v63  ;;  %v5508_v29 = vcombine.high %v5498_v46, %v5498_v46  ;;  %5519 = vst.msk [vmem:[#allocation2 + $0x19] sm:$0x1] %vm765_vm6, %v5498_v46  ;;  %5520 = vst.msk [vmem:[#allocation2 + $0x29] sm:$0x1] %vm765_vm6, %v5506_v19 }
 0x17e   : > { %v5913_v16 = vadd.f32 %v5912_v7, %v5839_v28  ;;  %v6142_v18 = vpop.f32.mrf.mxu0  ;;  %5522 = vst.msk [vmem:[#allocation2 + $0x49] sm:$0x1] %vm765_vm6, %v5491_v63 }
 0x17f   : > { %v5984_v3 = vpop.f32.mrf.mxu1  ;;  %v5509_v34 = vcombine.high %v5505_v24, %v5505_v24  ;;  %5521 = vst.msk [vmem:[#allocation2 + $0x39] sm:$0x1] %vm765_vm6, %v5508_v29  ;;  %5523 = vst.msk [vmem:[#allocation2 + $0x59] sm:$0x1] %vm765_vm6, %v5505_v24 }
 0x180   : > { %v5985_v21 = vadd.f32 %v5984_v3, %v5913_v16  ;;  %v12644_v14 = vpop.f32.mrf.mxu0  ;;  %5524 = vst.msk [vmem:[#allocation2 + $0x69] sm:$0x1] %vm765_vm6, %v5507_v26 }
 0x181   : > { %v12639_v30 = vpop.f32.mrf.mxu1  ;;  %5525 = vst.msk [vmem:[#allocation2 + $0x79] sm:$0x1] %vm765_vm6, %v5509_v34 }
 0x182   : > { %v5989_v38 = vcombine.high %v5985_v21, %v5985_v21  ;;  %v5996_v31 = vrot.slane %v5985_v21, %v13999_v13  ;;  %v6292_v33 = vpop.f32.mrf.mxu0 }
 0x183   : > { %v6218_v36 = vpop.f32.mrf.mxu1 }
 0x184   : > { %v6003_v27 = vrot.slane %v5989_v38, %v13999_v13  ;;  %v6004_v37 = vcombine.high %v5996_v31, %v5996_v31  ;;  %v6012_v42 = vrot.slane %v5996_v31, %v13999_v13  ;;  %v6219_v44 = vadd.f32 %v6218_v36, %v6142_v18  ;;  %v12654_v48 = vpop.f32.mrf.mxu0 }
 0x185   : > { %v12649_v49 = vpop.f32.mrf.mxu1 }
 0x186   : > { %v6005_v41 = vcombine.high %v6003_v27, %v6003_v27  ;;  %v6019_v23 = vrot.slane %v6003_v27, %v13999_v13  ;;  %v6026_v50 = vrot.slane %v6004_v37, %v13999_v13  ;;  %v6034_v52 = vcombine.high %v6012_v42, %v6012_v42  ;;  %6046 = vst.msk [vmem:[#allocation2 + $0xa] sm:$0x1] %vm765_vm6, %v6012_v42  ;;  %v6440_v25 = vpop.f32.mrf.mxu0 }
 0x187   : > { %v6293_v55 = vadd.f32 %v6292_v33, %v6219_v44  ;;  %v6366_v57 = vpop.f32.mrf.mxu1 }
 0x188   : > { %v6033_v58 = vrot.slane %v6005_v41, %v13999_v13  ;;  %v6035_v40 = vcombine.high %v6019_v23, %v6019_v23  ;;  %v6036_v59 = vcombine.high %v6026_v50, %v6026_v50  ;;  %6047 = vst.msk [vmem:[#allocation2 + $0x1a] sm:$0x1] %vm765_vm6, %v6026_v50  ;;  %6048 = vst.msk [vmem:[#allocation2 + $0x2a] sm:$0x1] %vm765_vm6, %v6034_v52  ;;  %v12664_v61 = vpop.f32.mrf.mxu0 }
 0x189   : > { %6050 = vst.msk [vmem:[#allocation2 + $0x4a] sm:$0x1] %vm765_vm6, %v6019_v23  ;;  %v6367_v53 = vadd.f32 %v6366_v57, %v6293_v55  ;;  %v12659_v1 = vpop.f32.mrf.mxu1 }
 0x18a   : > { %v6037_v0 = vcombine.high %v6033_v58, %v6033_v58  ;;  %6049 = vst.msk [vmem:[#allocation2 + $0x3a] sm:$0x1] %vm765_vm6, %v6036_v59  ;;  %6051 = vst.msk [vmem:[#allocation2 + $0x5a] sm:$0x1] %vm765_vm6, %v6033_v58  ;;  %v6670_v2 = vpop.f32.mrf.mxu0 }
 0x18b   : > { %6052 = vst.msk [vmem:[#allocation2 + $0x6a] sm:$0x1] %vm765_vm6, %v6035_v40  ;;  %v6441_v4 = vadd.f32 %v6440_v25, %v6367_v53  ;;  %v6512_v6 = vpop.f32.mrf.mxu1 }
 0x18c   : > { %6053 = vst.msk [vmem:[#allocation2 + $0x7a] sm:$0x1] %vm765_vm6, %v6037_v0  ;;  %v12674_v11 = vpop.f32.mrf.mxu0 }
 0x18d   : > { %v6513_v7 = vadd.f32 %v6512_v6, %v6441_v4  ;;  %v12669_v8 = vpop.f32.mrf.mxu1 }
 0x18e   : > { %v6820_v9 = vpop.f32.mrf.mxu0 }
 0x18f   : > { %v6517_v10 = vcombine.high %v6513_v7, %v6513_v7  ;;  %v6524_v28 = vrot.slane %v6513_v7, %v13999_v13  ;;  %v6746_v12 = vpop.f32.mrf.mxu1 }
 0x190   : > { %v6747_v15 = vadd.f32 %v6746_v12, %v6670_v2  ;;  %v12684_v43 = vpop.f32.mrf.mxu0 }
 0x191   : > { %v6531_v51 = vrot.slane %v6517_v10, %v13999_v13  ;;  %v6532_v47 = vcombine.high %v6524_v28, %v6524_v28  ;;  %v6540_v16 = vrot.slane %v6524_v28, %v13999_v13  ;;  %v12679_v18 = vpop.f32.mrf.mxu1 }
 0x192   : > { %v6821_v22 = vadd.f32 %v6820_v9, %v6747_v15  ;;  %v6968_v63 = vpop.f32.mrf.mxu0 }
 0x193   : > { %v6533_v46 = vcombine.high %v6531_v51, %v6531_v51  ;;  %v6547_v19 = vrot.slane %v6531_v51, %v13999_v13  ;;  %v6554_v3 = vrot.slane %v6532_v47, %v13999_v13  ;;  %v6562_v21 = vcombine.high %v6540_v16, %v6540_v16  ;;  %6574 = vst.msk [vmem:[#allocation2 + $0xb] sm:$0x1] %vm765_vm6, %v6540_v16  ;;  %v6894_v14 = vpop.f32.mrf.mxu1 }
 0x194   : > { %v6895_v24 = vadd.f32 %v6894_v14, %v6821_v22  ;;  %v12694_v26 = vpop.f32.mrf.mxu0 }
 0x195   : > { %v6561_v29 = vrot.slane %v6533_v46, %v13999_v13  ;;  %v6563_v30 = vcombine.high %v6547_v19, %v6547_v19  ;;  %v6564_v38 = vcombine.high %v6554_v3, %v6554_v3  ;;  %6575 = vst.msk [vmem:[#allocation2 + $0x1b] sm:$0x1] %vm765_vm6, %v6554_v3  ;;  %6576 = vst.msk [vmem:[#allocation2 + $0x2b] sm:$0x1] %vm765_vm6, %v6562_v21  ;;  %v12689_v31 = vpop.f32.mrf.mxu1 }
 0x196   : > { %6578 = vst.msk [vmem:[#allocation2 + $0x4b] sm:$0x1] %vm765_vm6, %v6547_v19  ;;  %v6969_v33 = vadd.f32 %v6968_v63, %v6895_v24  ;;  %v7198_v34 = vpop.f32.mrf.mxu0 }
 0x197   : > { %v6565_v36 = vcombine.high %v6561_v29, %v6561_v29  ;;  %6577 = vst.msk [vmem:[#allocation2 + $0x3b] sm:$0x1] %vm765_vm6, %v6564_v38  ;;  %6579 = vst.msk [vmem:[#allocation2 + $0x5b] sm:$0x1] %vm765_vm6, %v6561_v29  ;;  %v7040_v27 = vpop.f32.mrf.mxu1 }
 0x198   : > { %6580 = vst.msk [vmem:[#allocation2 + $0x6b] sm:$0x1] %vm765_vm6, %v6563_v30  ;;  %v7041_v37 = vadd.f32 %v7040_v27, %v6969_v33  ;;  %v12704_v42 = vpop.f32.mrf.mxu0 }
 0x199   : > { %6581 = vst.msk [vmem:[#allocation2 + $0x7b] sm:$0x1] %vm765_vm6, %v6565_v36  ;;  %v12699_v44 = vpop.f32.mrf.mxu1 }
 0x19a   : > { %v7045_v48 = vcombine.high %v7041_v37, %v7041_v37  ;;  %v7052_v49 = vrot.slane %v7041_v37, %v13999_v13  ;;  %v7348_v41 = vpop.f32.mrf.mxu0 }
 0x19b   : > { %v7274_v23 = vpop.f32.mrf.mxu1 }
 0x19c   : > { %v7059_v50 = vrot.slane %v7045_v48, %v13999_v13  ;;  %v7060_v52 = vcombine.high %v7052_v49, %v7052_v49  ;;  %v7068_v25 = vrot.slane %v7052_v49, %v13999_v13  ;;  %v7275_v55 = vadd.f32 %v7274_v23, %v7198_v34  ;;  %v12714_v57 = vpop.f32.mrf.mxu0 }
 0x19d   : > { %v12709_v58 = vpop.f32.mrf.mxu1 }
 0x19e   : > { %v7061_v40 = vcombine.high %v7059_v50, %v7059_v50  ;;  %v7075_v59 = vrot.slane %v7059_v50, %v13999_v13  ;;  %v7082_v61 = vrot.slane %v7060_v52, %v13999_v13  ;;  %v7090_v53 = vcombine.high %v7068_v25, %v7068_v25  ;;  %7102 = vst.msk [vmem:[#allocation2 + $0xc] sm:$0x1] %vm765_vm6, %v7068_v25  ;;  %v7496_v1 = vpop.f32.mrf.mxu0 }
 0x19f   : > { %v7349_v0 = vadd.f32 %v7348_v41, %v7275_v55  ;;  %v7422_v2 = vpop.f32.mrf.mxu1 }
 0x1a0   : > { %v7089_v4 = vrot.slane %v7061_v40, %v13999_v13  ;;  %v7091_v6 = vcombine.high %v7075_v59, %v7075_v59  ;;  %v7092_v11 = vcombine.high %v7082_v61, %v7082_v61  ;;  %7103 = vst.msk [vmem:[#allocation2 + $0x1c] sm:$0x1] %vm765_vm6, %v7082_v61  ;;  %7104 = vst.msk [vmem:[#allocation2 + $0x2c] sm:$0x1] %vm765_vm6, %v7090_v53  ;;  %v12724_v7 = vpop.f32.mrf.mxu0 }
 0x1a1   : > { %7106 = vst.msk [vmem:[#allocation2 + $0x4c] sm:$0x1] %vm765_vm6, %v7075_v59  ;;  %v7423_v8 = vadd.f32 %v7422_v2, %v7349_v0  ;;  %v12719_v9 = vpop.f32.mrf.mxu1 }
 0x1a2   : > { %v7093_v10 = vcombine.high %v7089_v4, %v7089_v4  ;;  %7105 = vst.msk [vmem:[#allocation2 + $0x3c] sm:$0x1] %vm765_vm6, %v7092_v11  ;;  %7107 = vst.msk [vmem:[#allocation2 + $0x5c] sm:$0x1] %vm765_vm6, %v7089_v4  ;;  %v7726_v28 = vpop.f32.mrf.mxu0 }
 0x1a3   : > { %7108 = vst.msk [vmem:[#allocation2 + $0x6c] sm:$0x1] %vm765_vm6, %v7091_v6  ;;  %v7497_v12 = vadd.f32 %v7496_v1, %v7423_v8  ;;  %v7568_v15 = vpop.f32.mrf.mxu1 }
 0x1a4   : > { %7109 = vst.msk [vmem:[#allocation2 + $0x7c] sm:$0x1] %vm765_vm6, %v7093_v10  ;;  %v12734_v43 = vpop.f32.mrf.mxu0 }
 0x1a5   : > { %v7569_v51 = vadd.f32 %v7568_v15, %v7497_v12  ;;  %v12729_v47 = vpop.f32.mrf.mxu1 }
 0x1a7   : > { %v7573_v16 = vcombine.high %v7569_v51, %v7569_v51  ;;  %v7580_v18 = vrot.slane %v7569_v51, %v13999_v13  ;;  %v7802_v22 = vpop.f32.mrf.mxu1  ;;  %v8696_v51 = vld [vmem:[#allocation2 + $0x10] sm:$0xff] }
 0x1a8   : > { %v7803_v63 = vadd.f32 %v7802_v22, %v7726_v28  ;;  %v8764_v22 = vpop.permute.xlu0 %8763 }
 0x1a9   : > { %v7587_v46 = vrot.slane %v7573_v16, %v13999_v13  ;;  %v7588_v19 = vcombine.high %v7580_v18, %v7580_v18  ;;  %v7596_v3 = vrot.slane %v7580_v18, %v13999_v13  ;;  %v7876_v21 = vpop.f32.mrf.mxu0  ;;  %v12739_v14 = vpop.f32.mrf.mxu1 }
 0x1aa   : > { %v7877_v24 = vadd.f32 %v7876_v21, %v7803_v63 }
 0x1ab   : > { %v7589_v26 = vcombine.high %v7587_v46, %v7587_v46  ;;  %v7603_v29 = vrot.slane %v7587_v46, %v13999_v13  ;;  %v7610_v30 = vrot.slane %v7588_v19, %v13999_v13  ;;  %v7618_v38 = vcombine.high %v7596_v3, %v7596_v3  ;;  %7630 = vst.msk [vmem:[#allocation2 + $0xd] sm:$0x1] %vm765_vm6, %v7596_v3  ;;  %v12744_v31 = vpop.f32.mrf.mxu0 }
 0x1ac   : > { %v7950_v33 = vpop.f32.mrf.mxu1  ;;  %v8792_v3 = vadd.f32 %v8764_v22, %v8696_v51 }
 0x1ad   : > { %v7617_v34 = vrot.slane %v7589_v26, %v13999_v13  ;;  %v7619_v36 = vcombine.high %v7603_v29, %v7603_v29  ;;  %v7620_v27 = vcombine.high %v7610_v30, %v7610_v30  ;;  %7631 = vst.msk [vmem:[#allocation2 + $0x1d] sm:$0x1] %vm765_vm6, %v7610_v30  ;;  %7632 = vst.msk [vmem:[#allocation2 + $0x2d] sm:$0x1] %vm765_vm6, %v7618_v38  ;;  %v8698_v26 = vld [vmem:[#allocation2 + $0x20] sm:$0xff] }
 0x1ae   : > { %7634 = vst.msk [vmem:[#allocation2 + $0x4d] sm:$0x1] %vm765_vm6, %v7603_v29  ;;  %v7951_v37 = vadd.f32 %v7950_v33, %v7877_v24  ;;  %v8024_v42 = vpop.f32.mrf.mxu0  ;;  %v12749_v44 = vpop.f32.mrf.mxu1  ;;  %v8816_v38 = vsel %vm8808_vm7, %v8792_v3, 0 }
 0x1af   : > { %v7621_v48 = vcombine.high %v7617_v34, %v7617_v34  ;;  %7633 = vst.msk [vmem:[#allocation2 + $0x3d] sm:$0x1] %vm765_vm6, %v7620_v27  ;;  %7635 = vst.msk [vmem:[#allocation2 + $0x5d] sm:$0x1] %vm765_vm6, %v7617_v34  ;;  %v8768_v24 = vpop.permute.xlu1 %8767 }
 0x1b0   : > { %7636 = vst.msk [vmem:[#allocation2 + $0x6d] sm:$0x1] %vm765_vm6, %v7619_v36  ;;  %v8025_v49 = vadd.f32 %v8024_v42, %v7951_v37  ;;  %v12754_v41 = vpop.f32.mrf.mxu0  ;;  %v8794_v36 = vadd.f32 %v8768_v24, %v8698_v26 }
 0x1b1   : > { %7637 = vst.msk [vmem:[#allocation2 + $0x7d] sm:$0x1] %vm765_vm6, %v7621_v48  ;;  %v8096_v23 = vpop.f32.mrf.mxu1  ;;  %v14264_v48 = vand.u32 4294901760, %v8816_v38 }
 0x1b2   : > { %v8097_v50 = vadd.f32 %v8096_v23, %v8025_v49  ;;  %v8700_v49 = vld [vmem:[#allocation2 + $0x30] sm:$0xff]  ;;  %v8702_v23 = vld [vmem:[#allocation2 + $0x40] sm:$0xff] }
 0x1b3   : > { %v8254_v52 = vpop.f32.mrf.mxu0  ;;  %v12759_v25 = vpop.f32.mrf.mxu1 }
 0x1b4   : > { %v8101_v55 = vcombine.high %v8097_v50, %v8097_v50  ;;  %v8108_v57 = vrot.slane %v8097_v50, %v13999_v13  ;;  %v8772_v41 = vpop.permute.xlu1 %8771 }
 0x1b5   : > { %v12764_v58 = vpop.f32.mrf.mxu0 }
 0x1b6   : > { %v8115_v40 = vrot.slane %v8101_v55, %v13999_v13  ;;  %v8116_v59 = vcombine.high %v8108_v57, %v8108_v57  ;;  %v8124_v61 = vrot.slane %v8108_v57, %v13999_v13  ;;  %v8330_v53 = vpop.f32.mrf.mxu1  ;;  %v8822_v55 = vsel %vm8808_vm7, %v8794_v36, 0  ;;  %v8776_v58 = vpop.permute.xlu0 %8775 }
 0x1b7   : > { %v8331_v1 = vadd.f32 %v8330_v53, %v8254_v52  ;;  %v8796_v57 = vadd.f32 %v8772_v41, %v8700_v49  ;;  %v8704_v53 = vld [vmem:[#allocation2 + $0x50] sm:$0xff] }
 0x1b8   : > { %v8117_v0 = vcombine.high %v8115_v40, %v8115_v40  ;;  %v8131_v2 = vrot.slane %v8115_v40, %v13999_v13  ;;  %v8138_v4 = vrot.slane %v8116_v59, %v13999_v13  ;;  %v8146_v6 = vcombine.high %v8124_v61, %v8124_v61  ;;  %8158 = vst.msk [vmem:[#allocation2 + $0xe] sm:$0x1] %vm765_vm6, %v8124_v61  ;;  %v8404_v11 = vpop.f32.mrf.mxu0  ;;  %v12769_v7 = vpop.f32.mrf.mxu1 }
 0x1b9   : > { %v8405_v8 = vadd.f32 %v8404_v11, %v8331_v1  ;;  %v14275_v59 = vsub.f32 %v8816_v38, %v14264_v48  ;;  %v8798_v61 = vadd.f32 %v8776_v58, %v8702_v23  ;;  %v14278_v1 = vand.u32 4294901760, %v8822_v55 }
 0x1ba   : > { %v8145_v9 = vrot.slane %v8117_v0, %v13999_v13  ;;  %v8147_v10 = vcombine.high %v8131_v2, %v8131_v2  ;;  %v8148_v28 = vcombine.high %v8138_v4, %v8138_v4  ;;  %8159 = vst.msk [vmem:[#allocation2 + $0x1e] sm:$0x1] %vm765_vm6, %v8138_v4  ;;  %8160 = vst.msk [vmem:[#allocation2 + $0x2e] sm:$0x1] %vm765_vm6, %v8146_v6  ;;  %v12774_v12 = vpop.f32.mrf.mxu0  ;;  %v8478_v15 = vpop.f32.mrf.mxu1 }
 0x1bb   : > { %8162 = vst.msk [vmem:[#allocation2 + $0x4e] sm:$0x1] %vm765_vm6, %v8131_v2  ;;  %v8479_v43 = vadd.f32 %v8478_v15, %v8405_v8  ;;  %v8828_v2 = vsel %vm8808_vm7, %v8796_v57, 0  ;;  %v8780_v4 = vpop.permute.xlu1 %8779  ;;  %v8834_v11 = vsel %vm8808_vm7, %v8798_v61, 0  ;;  %v8784_v12 = vpop.permute.xlu0 %8783  ;;  %v8706_v15 = vld [vmem:[#allocation2 + $0x60] sm:$0xff] }
 0x1bc   : > { %v8149_v47 = vcombine.high %v8145_v9, %v8145_v9  ;;  %8161 = vst.msk [vmem:[#allocation2 + $0x3e] sm:$0x1] %vm765_vm6, %v8148_v28  ;;  %8163 = vst.msk [vmem:[#allocation2 + $0x5e] sm:$0x1] %vm765_vm6, %v8145_v9  ;;  %v8552_v16 = vpop.f32.mrf.mxu0  ;;  %v12779_v18 = vpop.f32.mrf.mxu1  ;;  %v8800_v7 = vadd.f32 %v8780_v4, %v8704_v53  ;;  %v8802_v26 = vadd.f32 %v8784_v12, %v8706_v15 }
 0x1bd   : > { %8164 = vst.msk [vmem:[#allocation2 + $0x6e] sm:$0x1] %vm765_vm6, %v8147_v10  ;;  %v8553_v63 = vadd.f32 %v8552_v16, %v8479_v43  ;;  %v8946_v10 = vand.u32 4294901760, %v14275_v59  ;;  %v14286_v18 = vsub.f32 %v8822_v55, %v14278_v1 }
 0x1be   : > { %8165 = vst.msk [vmem:[#allocation2 + $0x7e] sm:$0x1] %vm765_vm6, %v8149_v47  ;;  %v12784_v46 = vpop.f32.mrf.mxu0  ;;  %v8624_v19 = vpop.f32.mrf.mxu1  ;;  %v8840_v38 = vsel %vm8808_vm7, %v8800_v7, 0  ;;  %v8846_v61 = vsel %vm8808_vm7, %v8802_v26, 0 }
 0x1bf   : > { %v8625_v21 = vadd.f32 %v8624_v19, %v8553_v63  ;;  %v14288_v63 = vand.u32 4294901760, %v8828_v2  ;;  %v14292_v19 = vand.u32 4294901760, %v8834_v11  ;;  %v8966_v23 = vand.u32 4294901760, %v14286_v18 }
 0x1c0   : > { %v12789_v14 = vpop.f32.mrf.mxu1 }
 0x1c1   : > { %v8629_v29 = vcombine.high %v8625_v21, %v8625_v21  ;;  %v8636_v30 = vrot.slane %v8625_v21, %v13999_v13 }
 0x1c3   : > { %v8643_v31 = vrot.slane %v8629_v29, %v13999_v13  ;;  %v8644_v33 = vcombine.high %v8636_v30, %v8636_v30  ;;  %v8652_v34 = vrot.slane %v8636_v30, %v13999_v13 }
 0x1c5   : > { %v8645_v27 = vcombine.high %v8643_v31, %v8643_v31  ;;  %v8659_v37 = vrot.slane %v8643_v31, %v13999_v13  ;;  %v8666_v42 = vrot.slane %v8644_v33, %v13999_v13  ;;  %v8674_v44 = vcombine.high %v8652_v34, %v8652_v34  ;;  %8686 = vst.msk [vmem:[#allocation2 + $0xf] sm:$0x1] %vm765_vm6, %v8652_v34  ;;  %v8788_v31 = vpop.permute.xlu1 %8787  ;;  %v8708_v33 = vld [vmem:[#allocation2 + $0x70] sm:$0xff] }
 0x1c6   : > { %v8947_v34 = vsub.f32 %v14275_v59, %v8946_v10 }
 0x1c7   : > { %v8673_v50 = vrot.slane %v8645_v27, %v13999_v13  ;;  %v8675_v52 = vcombine.high %v8659_v37, %v8659_v37  ;;  %v8676_v25 = vcombine.high %v8666_v42, %v8666_v42  ;;  %8687 = vst.msk [vmem:[#allocation2 + $0x1f] sm:$0x1] %vm765_vm6, %v8666_v42  ;;  %8688 = vst.msk [vmem:[#allocation2 + $0x2f] sm:$0x1] %vm765_vm6, %v8674_v44 }
 0x1c8   : > { %8690 = vst.msk [vmem:[#allocation2 + $0x4f] sm:$0x1] %vm765_vm6, %v8659_v37  ;;  %v8948_v53 = vand.u32 4294901760, %v8947_v34 }
 0x1c9   : > { %v8677_v40 = vcombine.high %v8673_v50, %v8673_v50  ;;  %8689 = vst.msk [vmem:[#allocation2 + $0x3f] sm:$0x1] %vm765_vm6, %v8676_v25  ;;  %8691 = vst.msk [vmem:[#allocation2 + $0x5f] sm:$0x1] %vm765_vm6, %v8673_v50  ;;  %v8804_v25 = vadd.f32 %v8788_v31, %v8708_v33 }
 0x1ca   : > { %8692 = vst.msk [vmem:[#allocation2 + $0x6f] sm:$0x1] %vm765_vm6, %v8675_v52  ;;  %v14328_v52 = vsub.f32 %v8834_v11, %v14292_v19 }
 0x1cb   : > { %8693 = vst.msk [vmem:[#allocation2 + $0x7f] sm:$0x1] %vm765_vm6, %v8677_v40  ;;  %v14336_v40 = vand.u32 4294901760, %v8840_v38 }
 0x1cc   : > { %v8695_v0 = vld [vmem:[#allocation2 + $0x8] sm:$0xff] }
 0x1cd   : > { %v8791_v6 = vadd.f32 %v14145_v17, %v8695_v0 }
 0x1ce   : > { %v8697_v8 = vld [vmem:[#allocation2 + $0x18] sm:$0xff]  ;;  %v8699_v9 = vld [vmem:[#allocation2 + $0x28] sm:$0xff] }
 0x1cf   : > { %v8703_v28 = vld [vmem:[#allocation2 + $0x48] sm:$0xff]  ;;  %v8813_v43 = vsel %vm8808_vm7, %v8791_v6, 0  ;;  %v8793_v51 = vadd.f32 %v8764_v22, %v8697_v8  ;;  %v8795_v47 = vadd.f32 %v8768_v24, %v8699_v9  ;;  %v8967_v8 = vsub.f32 %v14286_v18, %v8966_v23 }
 0x1d0   : > { %v8799_v16 = vadd.f32 %v8776_v58, %v8703_v28  ;;  %v14290_v17 = vand.u32 4294901760, %v8813_v43  ;;  %v8701_v46 = vld [vmem:[#allocation2 + $0x38] sm:$0xff] }
 0x1d1   : > { %v8819_v3 = vsel %vm8808_vm7, %v8793_v51, 0  ;;  %v8825_v21 = vsel %vm8808_vm7, %v8795_v47, 0  ;;  %v8797_v14 = vadd.f32 %v8772_v41, %v8701_v46  ;;  %v8705_v30 = vld [vmem:[#allocation2 + $0x58] sm:$0xff]  ;;  %v14323_v41 = vsub.f32 %v8828_v2, %v14288_v63  ;;  %v8707_v58 = vld [vmem:[#allocation2 + $0x68] sm:$0xff] }
 0x1d2   : > { %v14297_v22 = vsub.f32 %v8813_v43, %v14290_v17  ;;  %12823 = vmatmul.mubr.f32.vlgmr.msra.gmra.mxu1 %v14290_v17  ;;  %v14300_v24 = vand.u32 4294901760, %v8819_v3  ;;  %v14302_v29 = vand.u32 4294901760, %v8825_v21  ;;  %v8837_v27 = vsel %vm8808_vm7, %v8799_v16, 0  ;;  %v8709_v7 = vld [vmem:[#allocation2 + $0x78] sm:$0xff] }
 0x1d3   : > { %12825 = vmatprep.mubr.f32.mxu1 %v14264_v48  ;;  %12875 = vmatpush3.msra.mxu1 %v14074_v35  ;;  %v8831_v36 = vsel %vm8808_vm7, %v8797_v14, 0  ;;  %v8801_v50 = vadd.f32 %v8780_v4, %v8705_v30  ;;  %v14340_v0 = vand.u32 4294901760, %v8837_v27  ;;  %v8986_v9 = vand.u32 4294901760, %v14323_v41 }
 0x1d4   : > { %v8936_v37 = vand.u32 4294901760, %v14297_v22  ;;  %v14314_v42 = vsub.f32 %v8819_v3, %v14300_v24  ;;  %v14316_v44 = vand.u32 4294901760, %v8831_v36  ;;  %v14319_v49 = vsub.f32 %v8825_v21, %v14302_v29  ;;  %12876 = vmatprep.subr.mxu1 %v14083_v45 }
 0x1d5   : > { %12877 = vmatpush3.msra.mxu1 %v14083_v45  ;;  %v8843_v28 = vsel %vm8808_vm7, %v8801_v50, 0  ;;  %v8803_v15 = vadd.f32 %v8784_v12, %v8707_v58  ;;  %v14354_v43 = vand.u32 4294901760, %v8846_v61  ;;  %v14358_v51 = vsub.f32 %v8840_v38, %v14336_v40 }
 0x1d6   : > { %12826 = vmatmul.mubr.f32.gmra.mxu1 %v14300_v24  ;;  %v8937_v55 = vsub.f32 %v14297_v22, %v8936_v37  ;;  %v8956_v57 = vand.u32 4294901760, %v14314_v42  ;;  %12930 = vmatprep.subr.mxu1 %v14074_v35  ;;  %v8976_v6 = vand.u32 4294901760, %v14319_v49  ;;  %v14347_v11 = vsub.f32 %v8831_v36, %v14316_v44 }
 0x1d7   : > { %12828 = vmatprep.mubr.f32.mxu1 %v14278_v1  ;;  %v8852_v47 = vsel %vm8808_vm7, %v8804_v25, 0  ;;  %v14363_v16 = vsub.f32 %v8837_v27, %v14340_v0  ;;  %v8805_v46 = vadd.f32 %v8788_v31, %v8709_v7  ;;  %v14370_v14 = vand.u32 4294901760, %v8843_v28 }
 0x1d8   : > { %v8938_v2 = vand.u32 4294901760, %v8937_v55  ;;  %v8957_v4 = vsub.f32 %v14314_v42, %v8956_v57  ;;  %v8977_v3 = vsub.f32 %v14319_v49, %v8976_v6  ;;  %v8996_v21 = vand.u32 4294901760, %v14347_v11 }
 0x1d9   : > { %v8968_v26 = vand.u32 4294901760, %v8967_v8  ;;  %v8987_v30 = vsub.f32 %v14323_v41, %v8986_v9  ;;  %v9006_v38 = vand.u32 4294901760, %v14328_v52  ;;  %v8849_v31 = vsel %vm8808_vm7, %v8803_v15, 0 }
 0x1da   : > { %12795 = vmatmul.mubr.f32.vlgmr.msra.gmra.mxu0 %v8938_v2  ;;  %12829 = vmatmul.mubr.f32.gmra.mxu1 %v14302_v29  ;;  %v8958_v12 = vand.u32 4294901760, %v8957_v4  ;;  %v9016_v33 = vand.u32 4294901760, %v14363_v16  ;;  %v8855_v34 = vsel %vm8808_vm7, %v8805_v46, 0  ;;  %v8978_v36 = vand.u32 4294901760, %v8977_v3 }
 0x1db   : > { %12797 = vmatprep.mubr.f32.mxu0 %v8948_v53  ;;  %12831 = vmatprep.mubr.f32.mxu1 %v14288_v63  ;;  %v8997_v27 = vsub.f32 %v14347_v11, %v8996_v21  ;;  %v14387_v50 = vand.u32 4294901760, %v8849_v31  ;;  %v14391_v25 = vsub.f32 %v8843_v28, %v14370_v14  ;;  %v14394_v55 = vsub.f32 %v8846_v61, %v14354_v43 }
 0x1dc   : > { %12847 = vmatpush3.msra.mxu0 %v14081_v5  ;;  %v14379_v5 = vand.u32 4294901760, %v8852_v47  ;;  %v8988_v58 = vand.u32 4294901760, %v8987_v30  ;;  %v9007_v53 = vsub.f32 %v14328_v52, %v9006_v38  ;;  %v9026_v2 = vand.u32 4294901760, %v14358_v51 }
 0x1dd   : > { %12848 = vmatprep.subr.mxu0 %v14093_v32  ;;  %v8998_v4 = vand.u32 4294901760, %v8997_v27  ;;  %v9017_v61 = vsub.f32 %v14363_v16, %v9016_v33  ;;  %v9036_v7 = vand.u32 4294901760, %v14391_v25  ;;  %v14410_v8 = vsub.f32 %v8849_v31, %v14387_v50 }
 0x1de   : > { %12798 = vmatmul.mubr.f32.gmra.mxu0 %v8958_v12  ;;  %12832 = vmatmul.mubr.f32.gmra.mxu1 %v14316_v44  ;;  %v14413_v28 = vsub.f32 %v8852_v47, %v14379_v5  ;;  %v9008_v15 = vand.u32 4294901760, %v9007_v53  ;;  %v9027_v46 = vsub.f32 %v14358_v51, %v9026_v2  ;;  %v9046_v12 = vand.u32 4294901760, %v14394_v55 }
 0x1df   : > { %12800 = vmatprep.mubr.f32.mxu0 %v8968_v26  ;;  %12834 = vmatprep.mubr.f32.mxu1 %v14292_v19  ;;  %v9018_v3 = vand.u32 4294901760, %v9017_v61  ;;  %v9037_v26 = vsub.f32 %v14391_v25, %v9036_v7  ;;  %v9056_v30 = vand.u32 4294901760, %v14410_v8 }
 0x1e0   : > { %12849 = vmatpush3.msra.mxu0 %v14093_v32  ;;  %v14403_v32 = vand.u32 4294901760, %v8855_v34  ;;  %v9028_v31 = vand.u32 4294901760, %v9027_v46  ;;  %v9066_v27 = vand.u32 4294901760, %v14413_v28 }
 0x1e1   : > { %12902 = vmatprep.subr.mxu0 %v14090_v54  ;;  %v9057_v53 = vsub.f32 %v14410_v8, %v9056_v30 }
 0x1e2   : > { %12801 = vmatmul.mubr.f32.gmra.mxu0 %v8978_v36  ;;  %12835 = vmatmul.mubr.f32.gmra.mxu1 %v14340_v0  ;;  %v9075_v47 = vsub.f32 %v8855_v34, %v14403_v32  ;;  %v9047_v36 = vsub.f32 %v14394_v55, %v9046_v12 }
 0x1e3   : > { %12803 = vmatprep.mubr.f32.mxu0 %v8988_v58  ;;  %12837 = vmatprep.mubr.f32.mxu1 %v14336_v40  ;;  %v9038_v58 = vand.u32 4294901760, %v9037_v26  ;;  %v9058_v34 = vand.u32 4294901760, %v9057_v53 }
 0x1e4   : > { %v9048_v61 = vand.u32 4294901760, %v9047_v36 }
 0x1e6   : > { %12804 = vmatmul.mubr.f32.gmra.mxu0 %v8998_v4  ;;  %12838 = vmatmul.mubr.f32.gmra.mxu1 %v14370_v14  ;;  %v9076_v4 = vand.u32 4294901760, %v9075_v47 }
 0x1e7   : > { %12806 = vmatprep.mubr.f32.mxu0 %v9008_v15  ;;  %12840 = vmatprep.mubr.f32.mxu1 %v14354_v43  ;;  %v9067_v15 = vsub.f32 %v14413_v28, %v9066_v27 }
 0x1e8   : > { %v9077_v46 = vsub.f32 %v9075_v47, %v9076_v4 }
 0x1ea   : > { %12807 = vmatmul.mubr.f32.gmra.mxu0 %v9018_v3  ;;  %12841 = vmatmul.mubr.f32.gmra.mxu1 %v14387_v50  ;;  %v9068_v3 = vand.u32 4294901760, %v9067_v15  ;;  %v9078_v26 = vand.u32 4294901760, %v9077_v46 }
 0x1eb   : > { %12809 = vmatprep.mubr.f32.mxu0 %v9028_v31  ;;  %12843 = vmatprep.mubr.f32.mxu1 %v14379_v5 }
 0x1ee   : > { %12810 = vmatmul.mubr.f32.gmra.mxu0 %v9038_v58  ;;  %12844 = vmatmul.mubr.f32.gmra.mxu1 %v14403_v32 }
 0x1ef   : > { %12812 = vmatprep.mubr.f32.mxu0 %v9048_v61  ;;  %12878 = vmatprep.mubr.f32.mxu1 %v8926_v56 }
 0x1f2   : > { %12813 = vmatmul.mubr.f32.gmra.mxu0 %v9058_v34  ;;  %12879 = vmatmul.mubr.f32.vlgmr.msra.gmra.mxu1 %v8936_v37 }
 0x1f3   : > { %12815 = vmatprep.mubr.f32.mxu0 %v9068_v3  ;;  %12881 = vmatprep.mubr.f32.mxu1 %v8946_v10 }
 0x1f4   : > { %12931 = vmatpush3.msra.mxu1 %v14074_v35 }
 0x1f5   : > { %12932 = vmatprep.subr.mxu1 %v14083_v45 }
 0x1f6   : > { %12816 = vmatmul.mubr.f32.gmra.mxu0 %v9078_v26  ;;  %12882 = vmatmul.mubr.f32.gmra.mxu1 %v8956_v57 }
 0x1f7   : > { %12850 = vmatprep.mubr.f32.mxu0 %v14158_v39  ;;  %12884 = vmatprep.mubr.f32.mxu1 %v8966_v23 }
 0x1f8   : > { %12933 = vmatpush3.msra.mxu1 %v14083_v45 }
 0x1fa   : > { %12851 = vmatmul.mubr.f32.vlgmr.msra.gmra.mxu0 %v14297_v22  ;;  %12885 = vmatmul.mubr.f32.gmra.mxu1 %v8976_v6 }
 0x1fb   : > { %12853 = vmatprep.mubr.f32.mxu0 %v14275_v59  ;;  %12887 = vmatprep.mubr.f32.mxu1 %v8986_v9 }
 0x1fc   : > { %12903 = vmatpush3.msra.mxu0 %v14090_v54 }
 0x1fd   : > { %12904 = vmatprep.subr.mxu0 %v14103_v62 }
 0x1fe   : > { %12854 = vmatmul.mubr.f32.gmra.mxu0 %v14314_v42  ;;  %12888 = vmatmul.mubr.f32.gmra.mxu1 %v8996_v21 }
 0x1ff   : > { %12856 = vmatprep.mubr.f32.mxu0 %v14286_v18  ;;  %12890 = vmatprep.mubr.f32.mxu1 %v9006_v38 }
 0x200   : > { %12905 = vmatpush3.msra.mxu0 %v14103_v62 }
 0x202   : > { %12857 = vmatmul.mubr.f32.gmra.mxu0 %v14319_v49  ;;  %12891 = vmatmul.mubr.f32.gmra.mxu1 %v9016_v33 }
 0x203   : > { %12859 = vmatprep.mubr.f32.mxu0 %v14323_v41  ;;  %12893 = vmatprep.mubr.f32.mxu1 %v9026_v2 }
 0x206   : > { %12860 = vmatmul.mubr.f32.gmra.mxu0 %v14347_v11  ;;  %12894 = vmatmul.mubr.f32.gmra.mxu1 %v9036_v7 }
 0x207   : > { %12862 = vmatprep.mubr.f32.mxu0 %v14328_v52  ;;  %12896 = vmatprep.mubr.f32.mxu1 %v9046_v12 }
 0x20a   : > { %12863 = vmatmul.mubr.f32.gmra.mxu0 %v14363_v16  ;;  %12897 = vmatmul.mubr.f32.gmra.mxu1 %v9056_v30 }
 0x20b   : > { %12865 = vmatprep.mubr.f32.mxu0 %v14358_v51  ;;  %12899 = vmatprep.mubr.f32.mxu1 %v9066_v27 }
 0x20e   : > { %12866 = vmatmul.mubr.f32.gmra.mxu0 %v14391_v25  ;;  %12900 = vmatmul.mubr.f32.gmra.mxu1 %v9076_v4 }
 0x20f   : > { %12868 = vmatprep.mubr.f32.mxu0 %v14394_v55  ;;  %12934 = vmatprep.mubr.f32.mxu1 %v14152_v20 }
 0x212   : > { %12869 = vmatmul.mubr.f32.gmra.mxu0 %v14410_v8  ;;  %12935 = vmatmul.mubr.f32.vlgmr.msra.gmra.mxu1 %v14290_v17 }
 0x213   : > { %12871 = vmatprep.mubr.f32.mxu0 %v14413_v28  ;;  %12937 = vmatprep.mubr.f32.mxu1 %v14264_v48 }
 0x216   : > { %12872 = vmatmul.mubr.f32.gmra.mxu0 %v9075_v47  ;;  %12938 = vmatmul.mubr.f32.gmra.mxu1 %v14300_v24 }
 0x217   : > { %12906 = vmatprep.mubr.f32.mxu0 %v14152_v20  ;;  %12940 = vmatprep.mubr.f32.mxu1 %v14278_v1 }
 0x21a   : > { %12907 = vmatmul.mubr.f32.vlgmr.msra.gmra.mxu0 %v14290_v17  ;;  %12941 = vmatmul.mubr.f32.gmra.mxu1 %v14302_v29 }
 0x21b   : > { %12909 = vmatprep.mubr.f32.mxu0 %v14264_v48  ;;  %12943 = vmatprep.mubr.f32.mxu1 %v14288_v63 }
 0x21e   : > { %12910 = vmatmul.mubr.f32.gmra.mxu0 %v14300_v24  ;;  %12944 = vmatmul.mubr.f32.gmra.mxu1 %v14316_v44 }
 0x21f   : > { %12912 = vmatprep.mubr.f32.mxu0 %v14278_v1  ;;  %12946 = vmatprep.mubr.f32.mxu1 %v14292_v19 }
 0x222   : > { %12913 = vmatmul.mubr.f32.gmra.mxu0 %v14302_v29  ;;  %12947 = vmatmul.mubr.f32.gmra.mxu1 %v14340_v0 }
 0x223   : > { %12915 = vmatprep.mubr.f32.mxu0 %v14288_v63  ;;  %12949 = vmatprep.mubr.f32.mxu1 %v14336_v40 }
 0x226   : > { %12916 = vmatmul.mubr.f32.gmra.mxu0 %v14316_v44  ;;  %12950 = vmatmul.mubr.f32.gmra.mxu1 %v14370_v14 }
 0x227   : > { %12918 = vmatprep.mubr.f32.mxu0 %v14292_v19  ;;  %12952 = vmatprep.mubr.f32.mxu1 %v14354_v43 }
 0x22a   : > { %12919 = vmatmul.mubr.f32.gmra.mxu0 %v14340_v0  ;;  %12953 = vmatmul.mubr.f32.gmra.mxu1 %v14387_v50 }
 0x22b   : > { %12921 = vmatprep.mubr.f32.mxu0 %v14336_v40  ;;  %12955 = vmatprep.mubr.f32.mxu1 %v14379_v5 }
 0x22e   : > { %12922 = vmatmul.mubr.f32.gmra.mxu0 %v14370_v14  ;;  %12956 = vmatmul.mubr.f32.gmra.mxu1 %v14403_v32 }
 0x22f   : > { %12924 = vmatprep.mubr.f32.mxu0 %v14354_v43 }
 0x232   : > { %12925 = vmatmul.mubr.f32.gmra.mxu0 %v14387_v50 }
 0x233   : > { %12927 = vmatprep.mubr.f32.mxu0 %v14379_v5 }
 0x236   : > { %12928 = vmatmul.mubr.f32.gmra.mxu0 %v14403_v32 }
 0x292   : > { %v14506_v35 = vpop.f32.mrf.mxu1 }
 0x294   : > { %v14508_v45 = vpop.f32.mrf.mxu1 }
 0x296   : > { %v12827_v54 = vpop.f32.mrf.mxu1 }
 0x298   : > { %v9173_v62 = vpop.f32.mrf.mxu1 }
 0x29a   : > { %v14510_v20 = vpop.f32.mrf.mxu0  ;;  %v12830_v39 = vpop.f32.mrf.mxu1 }
 0x29c   : > { %v14512_v56 = vpop.f32.mrf.mxu0  ;;  %v9185_v48 = vpop.f32.mrf.mxu1 }
 0x29e   : > { %v12799_v59 = vpop.f32.mrf.mxu0  ;;  %v12833_v1 = vpop.f32.mrf.mxu1 }
 0x29f   : > { %v14514_v10 = vadd.f32 %v12827_v54, %v12799_v59 }
 0x2a0   : > { %v8950_v18 = vpop.f32.mrf.mxu0  ;;  %v9197_v63 = vpop.f32.mrf.mxu1 }
 0x2a1   : > { %v14516_v17 = vadd.f32 %v9173_v62, %v8950_v18 }
 0x2a2   : > { %v12802_v19 = vpop.f32.mrf.mxu0  ;;  %v12836_v22 = vpop.f32.mrf.mxu1 }
 0x2a3   : > { %v14518_v24 = vadd.f32 %v12830_v39, %v12802_v19 }
 0x2a4   : > { %v8970_v29 = vpop.f32.mrf.mxu0  ;;  %v9209_v37 = vpop.f32.mrf.mxu1 }
 0x2a5   : > { %v14520_v42 = vadd.f32 %v9185_v48, %v8970_v29 }
 0x2a6   : > { %v12805_v44 = vpop.f32.mrf.mxu0  ;;  %v12839_v49 = vpop.f32.mrf.mxu1 }
 0x2a7   : > { %v14522_v41 = vadd.f32 %v12833_v1, %v12805_v44 }
 0x2a8   : > { %v8990_v23 = vpop.f32.mrf.mxu0  ;;  %v9221_v52 = vpop.f32.mrf.mxu1 }
 0x2a9   : > { %v9198_v57 = vadd.f32 %v9197_v63, %v8990_v23 }
 0x2aa   : > { %v12808_v40 = vpop.f32.mrf.mxu0  ;;  %v12842_v0 = vpop.f32.mrf.mxu1 }
 0x2ab   : > { %v9216_v6 = vadd.f32 %v12836_v22, %v12808_v40 }
 0x2ac   : > { %v9010_v11 = vpop.f32.mrf.mxu0  ;;  %v9233_v9 = vpop.f32.mrf.mxu1 }
 0x2ad   : > { %v9210_v43 = vadd.f32 %v9209_v37, %v9010_v11 }
 0x2ae   : > { %v12811_v51 = vpop.f32.mrf.mxu0  ;;  %v12845_v16 = vpop.f32.mrf.mxu1 }
 0x2af   : > { %v9228_v21 = vadd.f32 %v12839_v49, %v12811_v51 }
 0x2b0   : > { %v9030_v14 = vpop.f32.mrf.mxu0  ;;  %v9245_v38 = vpop.f32.mrf.mxu1 }
 0x2b1   : > { %v9222_v5 = vadd.f32 %v9221_v52, %v9030_v14  ;;  %v9162_v14 = vadd.f32 %v14508_v45, %v14512_v56 }
 0x2b2   : > { %v12814_v33 = vpop.f32.mrf.mxu0  ;;  %v14524_v50 = vpop.f32.mrf.mxu1 }
 0x2b3   : > { %v9240_v25 = vadd.f32 %v12842_v0, %v12814_v33 }
 0x2b4   : > { %v9050_v55 = vpop.f32.mrf.mxu0  ;;  %v14526_v2 = vpop.f32.mrf.mxu1 }
 0x2b5   : > { %v9234_v32 = vadd.f32 %v9233_v9, %v9050_v55 }
 0x2b6   : > { %v12817_v7 = vpop.f32.mrf.mxu0  ;;  %v14528_v8 = vpop.f32.mrf.mxu1 }
 0x2b7   : > { %v9252_v28 = vadd.f32 %v12845_v16, %v12817_v7 }
 0x2b8   : > { %v9070_v12 = vpop.f32.mrf.mxu0  ;;  %v14530_v30 = vpop.f32.mrf.mxu1 }
 0x2b9   : > { %v9246_v47 = vadd.f32 %v9245_v38, %v9070_v12 }
 0x2ba   : > { %v12852_v31 = vpop.f32.mrf.mxu0  ;;  %v14532_v36 = vpop.f32.mrf.mxu1 }
 0x2bc   : > { %v9327_v27 = vpop.f32.mrf.mxu0  ;;  %v14534_v58 = vpop.f32.mrf.mxu1 }
 0x2be   : > { %v12855_v53 = vpop.f32.mrf.mxu0  ;;  %v14536_v4 = vpop.f32.mrf.mxu1 }
 0x2c0   : > { %v9341_v61 = vpop.f32.mrf.mxu0  ;;  %v9555_v15 = vpop.f32.mrf.mxu1 }
 0x2c2   : > { %v12858_v34 = vpop.f32.mrf.mxu0  ;;  %v12892_v46 = vpop.f32.mrf.mxu1 }
 0x2c4   : > { %v9355_v3 = vpop.f32.mrf.mxu0  ;;  %v9571_v26 = vpop.f32.mrf.mxu1 }
 0x2c6   : > { %v12861_v54 = vpop.f32.mrf.mxu0  ;;  %v12895_v62 = vpop.f32.mrf.mxu1 }
 0x2c8   : > { %v9369_v39 = vpop.f32.mrf.mxu0  ;;  %v9587_v48 = vpop.f32.mrf.mxu1 }
 0x2c9   : > { %v9370_v59 = vadd.f32 %v9369_v39, %v9198_v57 }
 0x2ca   : > { %v12864_v1 = vpop.f32.mrf.mxu0  ;;  %v12898_v18 = vpop.f32.mrf.mxu1 }
 0x2cb   : > { %v9391_v63 = vadd.f32 %v12864_v1, %v9216_v6  ;;  %v14538_v19 = vadd.f32 %v9555_v15, %v9370_v59  ;;  %v9168_v6 = vadd.f32 %v14506_v35, %v14510_v20  ;;  %v9349_v20 = vadd.f32 %v12855_v53, %v14514_v10 }
 0x2cc   : > { %v9383_v22 = vpop.f32.mrf.mxu0  ;;  %v9603_v37 = vpop.f32.mrf.mxu1  ;;  %v9356_v59 = vadd.f32 %v9355_v3, %v14520_v42 }
 0x2cd   : > { %v9384_v29 = vadd.f32 %v9383_v22, %v9210_v43  ;;  %v14540_v44 = vadd.f32 %v12892_v46, %v9391_v63  ;;  %v9335_v38 = vadd.f32 %v12852_v31, %v9168_v6  ;;  %v9377_v63 = vadd.f32 %v12861_v54, %v14522_v41 }
 0x2ce   : > { %v12867_v49 = vpop.f32.mrf.mxu0  ;;  %v12901_v0 = vpop.f32.mrf.mxu1  ;;  %v14569_v22 = vsub.s32 0, %v13996_v60  ;;  %v14580_v41 = vadd.f32 %v14534_v58, %v9356_v59 }
 0x2cf   : > { %v9405_v23 = vadd.f32 %v12867_v49, %v9228_v21  ;;  %v14542_v52 = vadd.f32 %v9571_v26, %v9384_v29  ;;  %v13148_v26 = vmov 1983009808   ;;  %v9516_v39 = vadd.f32 %v14524_v50, %v9335_v38 }
 0x2d0   : > { %v9397_v40 = vpop.f32.mrf.mxu0  ;;  %v9619_v21 = vpop.f32.mrf.mxu1  ;;  %v11276_v35 = vunpack.c.l.s4 %v13148_v26  ;;  %v9532_v50 = vadd.f32 %v14528_v8, %v9349_v20 }
 0x2d1   : > { %v9398_v11 = vadd.f32 %v9397_v40, %v9222_v5  ;;  %v14544_v9 = vadd.f32 %v12895_v62, %v9405_v23  ;;  %v9328_v5 = vadd.f32 %v9327_v27, %v9162_v14  ;;  %v9363_v27 = vadd.f32 %v12858_v34, %v14518_v24 }
 0x2d2   : > { %v12870_v57 = vpop.f32.mrf.mxu0  ;;  %v11277_v1 = vunpack.c.0.s8 %v11276_v35 }
 0x2d3   : > { %v9419_v51 = vadd.f32 %v12870_v57, %v9240_v25  ;;  %v14548_v16 = vadd.f32 %v9587_v48, %v9398_v11  ;;  %v12936_v25 = vpop.f32.mrf.mxu1  ;;  %v9508_v31 = vadd.f32 %v14526_v2, %v9328_v5 }
 0x2d4   : > { %v9411_v43 = vpop.f32.mrf.mxu0  ;;  %v14573_v42 = vsub.s32 %v11277_v1, %v13996_v60 }
 0x2d5   : > { %v9412_v33 = vadd.f32 %v9411_v43, %v9234_v32  ;;  %v14552_v55 = vadd.f32 %v12898_v18, %v9419_v51  ;;  %v9867_v53 = vpop.f32.mrf.mxu1 }
 0x2d6   : > { %v12873_v7 = vpop.f32.mrf.mxu0 }
 0x2d7   : > { %v9433_v12 = vadd.f32 %v12873_v7, %v9252_v28  ;;  %v14554_v15 = vadd.f32 %v9603_v37, %v9412_v33  ;;  %v9342_v28 = vadd.f32 %v9341_v61, %v14516_v17  ;;  %v14577_v37 = vadd.f32 %v14532_v36, %v9363_v27  ;;  %v12939_v8 = vpop.f32.mrf.mxu1 }
 0x2d8   : > { %v9425_v46 = vpop.f32.mrf.mxu0 }
 0x2d9   : > { %v9426_v62 = vadd.f32 %v9425_v46, %v9246_v47  ;;  %v14558_v45 = vadd.f32 %v12901_v0, %v9433_v12  ;;  %v9524_v34 = vadd.f32 %v14530_v30, %v9342_v28  ;;  %v14588_v30 = vadd.f32 %v14536_v4, %v9377_v63 }
 0x2da   : > { %v12908_v56 = vpop.f32.mrf.mxu0 }
 0x2db   : > { %v9711_v32 = vadd.f32 %v12908_v56, %v9516_v39  ;;  %v14561_v48 = vadd.f32 %v9619_v21, %v9426_v62 }
 0x2dc   : > { %v9704_v10 = vpop.f32.mrf.mxu0 }
 0x2dd   : > { %v9874_v47 = vadd.f32 %v12936_v25, %v9711_v32  ;;  %v9705_v18 = vadd.f32 %v9704_v10, %v9508_v31 }
 0x2de   : > { %v12911_v2 = vpop.f32.mrf.mxu0 }
 0x2df   : > { %v10026_v29 = vcombine.high %v9874_v47, %v9874_v47  ;;  %v10033_v17 = vrot.slane %v9874_v47, %v13999_v13  ;;  %v9868_v61 = vadd.f32 %v9867_v53, %v9705_v18  ;;  %v9723_v24 = vadd.f32 %v12911_v2, %v9532_v50 }
 0x2e0   : > { %v9716_v3 = vpop.f32.mrf.mxu0 }
 0x2e1   : > { %v10040_v54 = vrot.slane %v10026_v29, %v13999_v13  ;;  %v10041_v49 = vcombine.high %v10033_v17, %v10033_v17  ;;  %v10049_v23 = vrot.slane %v10033_v17, %v13999_v13  ;;  %v9977_v40 = vcombine.high %v9868_v61, %v9868_v61 }
 0x2e2   : > { %v9984_v0 = vrot.slane %v9868_v61, %v13999_v13  ;;  %v14585_v60 = vadd.f32 %v12939_v8, %v9723_v24  ;;  %v9717_v11 = vadd.f32 %v9716_v3, %v9524_v34 }
 0x2e3   : > { %v10042_v36 = vcombine.high %v10040_v54, %v10040_v54  ;;  %v10056_v57 = vrot.slane %v10040_v54, %v13999_v13  ;;  %v10063_v58 = vrot.slane %v10041_v49, %v13999_v13  ;;  %v10071_v6 = vcombine.high %v10049_v23, %v10049_v23 }
 0x2e4   : > { %v10796_v51 = vrot.slane %v10049_v23, %v14569_v22  ;;  %v9991_v43 = vrot.slane %v9977_v40, %v13999_v13  ;;  %v9992_v14 = vcombine.high %v9984_v0, %v9984_v0  ;;  %v10000_v38 = vrot.slane %v9984_v0, %v13999_v13  ;;  %v9879_v23 = vpop.f32.mrf.mxu1 }
 0x2e5   : > { %v10070_v21 = vrot.slane %v10042_v36, %v13999_v13  ;;  %v10072_v33 = vcombine.high %v10056_v57, %v10056_v57  ;;  %v10073_v4 = vcombine.high %v10063_v58, %v10063_v58  ;;  %v10800_v7 = vrot.slane %v10063_v58, %v14569_v22  ;;  %v14621_v58 = vpop.f32.mrf.mxu0 }
 0x2e6   : > { %v10804_v5 = vrot.slane %v10071_v6, %v14569_v22  ;;  %v10812_v12 = vrot.slane %v10056_v57, %v14569_v22  ;;  %v9993_v46 = vcombine.high %v9991_v43, %v9991_v43  ;;  %v10007_v26 = vrot.slane %v9991_v43, %v13999_v13 }
 0x2e7   : > { %v10074_v35 = vcombine.high %v10070_v21, %v10070_v21  ;;  %v10808_v20 = vrot.slane %v10073_v4, %v14569_v22  ;;  %v10816_v25 = vrot.slane %v10070_v21, %v14569_v22  ;;  %v10820_v62 = vrot.slane %v10072_v33, %v14569_v22 }
 0x2e8   : > { %v11307_v39 = vcombine.low %v10796_v51, %v10800_v7  ;;  %v10014_v56 = vrot.slane %v9992_v14, %v13999_v13  ;;  %v10021_v32 = vrot.slane %v9993_v46, %v13999_v13  ;;  %v10022_v31 = vcombine.high %v10000_v38, %v10000_v38 }
 0x2e9   : > { %v10824_v28 = vrot.slane %v10074_v35, %v14569_v22  ;;  %v11308_v27 = vcombine.low %v10804_v5, %v10808_v20  ;;  %v11324_v59 = vcombine.low %v10812_v12, %v10816_v25  ;;  %v10023_v1 = vcombine.high %v10007_v26, %v10007_v26  ;;  %v9728_v20 = vpop.f32.mrf.mxu0 }
 0x2ea   : > { %v11315_v10 = vrot.slane %v11307_v39, %v14573_v42  ;;  %v10024_v53 = vcombine.high %v10014_v56, %v10014_v56  ;;  %v10025_v47 = vcombine.high %v10021_v32, %v10021_v32  ;;  %v10764_v18 = vrot.slane %v10000_v38, %v14569_v22 }
 0x2eb   : > { %v11322_v50 = vrot.slane %v11308_v27, %v14573_v42  ;;  %v11325_v63 = vcombine.low %v10820_v62, %v10824_v28  ;;  %v11332_v2 = vrot.slane %v11324_v59, %v14573_v42  ;;  %v10768_v29 = vrot.slane %v10014_v56, %v14569_v22  ;;  %v12942_v59 = vpop.f32.mrf.mxu1 }
 0x2ec   : > { %v10772_v17 = vrot.slane %v10022_v31, %v14569_v22  ;;  %v10776_v61 = vrot.slane %v10024_v53, %v14569_v22  ;;  %v10780_v24 = vrot.slane %v10007_v26, %v14569_v22  ;;  %v10784_v34 = vrot.slane %v10021_v32, %v14569_v22 }
 0x2ed   : > { %v11323_v3 = vcombine.low %v11315_v10, %v11322_v50  ;;  %v11339_v8 = vrot.slane %v11325_v63, %v14573_v42  ;;  %v10788_v54 = vrot.slane %v10023_v1, %v14569_v22  ;;  %v10792_v49 = vrot.slane %v10025_v47, %v14569_v22 }
 0x2ee   : > { %v11273_v40 = vcombine.low %v10764_v18, %v10768_v29  ;;  %v11274_v0 = vcombine.low %v10772_v17, %v10776_v61  ;;  %v11290_v36 = vcombine.low %v10780_v24, %v10784_v34  ;;  %v10124_v57 = vcombine.high %v14585_v60, %v14585_v60  ;;  %v12917_v29 = vpop.f32.mrf.mxu0 }
 0x2ef   : > { %v11340_v6 = vcombine.low %v11332_v2, %v11339_v8  ;;  %11852 = vst.msk [vmem:[%s14623_s24 + $0x10] sm:$0xff] %vm11849_vm8, %v11323_v3  ;;  %v11291_v51 = vcombine.low %v10788_v54, %v10792_v49  ;;  %v10131_v43 = vrot.slane %v14585_v60, %v13999_v13  ;;  %v9880_v14 = vadd.f32 %v9879_v23, %v9717_v11  ;;  %v9891_v23 = vpop.f32.mrf.mxu1 }
 0x2f0   : > { %v11281_v38 = vrot.slane %v11273_v40, %v14573_v42  ;;  %v11288_v21 = vrot.slane %v11274_v0, %v14573_v42  ;;  %v11298_v33 = vrot.slane %v11290_v36, %v14573_v42  ;;  %v10138_v4 = vrot.slane %v10124_v57, %v13999_v13 }
 0x2f1   : > { %11853 = vst.msk [vmem:[%s14623_s24 + $0x18] sm:$0xff] %vm11849_vm8, %v11340_v6  ;;  %v11305_v7 = vrot.slane %v11291_v51, %v14573_v42  ;;  %v10139_v5 = vcombine.high %v10131_v43, %v10131_v43  ;;  %v10147_v12 = vrot.slane %v10131_v43, %v13999_v13  ;;  %v10075_v46 = vcombine.high %v9880_v14, %v9880_v14 }
 0x2f2   : > { %v11289_v60 = vcombine.low %v11281_v38, %v11288_v21  ;;  %v10140_v11 = vcombine.high %v10138_v4, %v10138_v4  ;;  %v10154_v26 = vrot.slane %v10138_v4, %v13999_v13  ;;  %v10082_v35 = vrot.slane %v9880_v14, %v13999_v13  ;;  %v9740_v38 = vpop.f32.mrf.mxu0 }
 0x2f3   : > { %v11306_v25 = vcombine.low %v11298_v33, %v11305_v7  ;;  %v10161_v62 = vrot.slane %v10139_v5, %v13999_v13  ;;  %v10169_v39 = vcombine.high %v10147_v12, %v10147_v12  ;;  %v10860_v56 = vrot.slane %v10147_v12, %v14569_v22 }
 0x2f4   : > { %11850 = vst.msk [vmem:[%s14623_s24] sm:$0xff] %vm11849_vm8, %v11289_v60  ;;  %v10168_v32 = vrot.slane %v10140_v11, %v13999_v13  ;;  %v10170_v31 = vcombine.high %v10154_v26, %v10154_v26  ;;  %v10876_v28 = vrot.slane %v10154_v26, %v14569_v22  ;;  %v10089_v27 = vrot.slane %v10075_v46, %v13999_v13  ;;  %v12945_v26 = vpop.f32.mrf.mxu1 }
 0x2f5   : > { %11851 = vst.msk [vmem:[%s14623_s24 + $0x8] sm:$0xff] %vm11849_vm8, %v11306_v25  ;;  %v10171_v1 = vcombine.high %v10161_v62, %v10161_v62  ;;  %v10864_v10 = vrot.slane %v10161_v62, %v14569_v22  ;;  %v10868_v53 = vrot.slane %v10169_v39, %v14569_v22  ;;  %v10090_v47 = vcombine.high %v10082_v35, %v10082_v35 }
 0x2f6   : > { %v10172_v18 = vcombine.high %v10168_v32, %v10168_v32  ;;  %v10880_v50 = vrot.slane %v10168_v32, %v14569_v22  ;;  %v10884_v63 = vrot.slane %v10170_v31, %v14569_v22  ;;  %v10091_v2 = vcombine.high %v10089_v27, %v10089_v27 }
 0x2f7   : > { %v10872_v17 = vrot.slane %v10171_v1, %v14569_v22  ;;  %v11375_v61 = vcombine.low %v10860_v56, %v10864_v10  ;;  %v10098_v24 = vrot.slane %v10082_v35, %v13999_v13  ;;  %v10105_v34 = vrot.slane %v10089_v27, %v13999_v13 }
 0x2f8   : > { %v10888_v3 = vrot.slane %v10172_v18, %v14569_v22  ;;  %v11392_v8 = vcombine.low %v10876_v28, %v10880_v50  ;;  %v10112_v54 = vrot.slane %v10090_v47, %v13999_v13  ;;  %v10119_v49 = vrot.slane %v10091_v2, %v13999_v13  ;;  %v12920_v28 = vpop.f32.mrf.mxu0 }
 0x2f9   : > { %v11376_v40 = vcombine.low %v10868_v53, %v10872_v17  ;;  %v11383_v0 = vrot.slane %v11375_v61, %v14573_v42  ;;  %v10120_v36 = vcombine.high %v10098_v24, %v10098_v24  ;;  %v10121_v57 = vcombine.high %v10105_v34, %v10105_v34 }
 0x2fa   : > { %v11393_v6 = vcombine.low %v10884_v63, %v10888_v3  ;;  %v11400_v51 = vrot.slane %v11392_v8, %v14573_v42  ;;  %v10122_v43 = vcombine.high %v10112_v54, %v10112_v54  ;;  %v10123_v14 = vcombine.high %v10119_v49, %v10119_v49  ;;  %v9903_v63 = vpop.f32.mrf.mxu1 }
 0x2fb   : > { %v11390_v21 = vrot.slane %v11376_v40, %v14573_v42  ;;  %v10828_v33 = vrot.slane %v10098_v24, %v14569_v22  ;;  %v10832_v4 = vrot.slane %v10112_v54, %v14569_v22  ;;  %v10836_v7 = vrot.slane %v10120_v36, %v14569_v22 }
 0x2fc   : > { %v11407_v5 = vrot.slane %v11393_v6, %v14573_v42  ;;  %v10840_v12 = vrot.slane %v10122_v43, %v14569_v22  ;;  %v10844_v46 = vrot.slane %v10105_v34, %v14569_v22  ;;  %v10848_v60 = vrot.slane %v10119_v49, %v14569_v22 }
 0x2fd   : > { %v11391_v11 = vcombine.low %v11383_v0, %v11390_v21  ;;  %v10852_v35 = vrot.slane %v10121_v57, %v14569_v22  ;;  %v10856_v25 = vrot.slane %v10123_v14, %v14569_v22  ;;  %v11341_v62 = vcombine.low %v10828_v33, %v10832_v4 }
 0x2fe   : > { %v11408_v39 = vcombine.low %v11400_v51, %v11407_v5  ;;  %v11342_v56 = vcombine.low %v10836_v7, %v10840_v12  ;;  %v11358_v32 = vcombine.low %v10844_v46, %v10848_v60  ;;  %v9735_v31 = vadd.f32 %v14621_v58, %v14577_v37 }
 0x2ff   : > { %11856 = vst.msk [vmem:[%s14623_s24 + $0x30] sm:$0xff] %vm11849_vm8, %v11391_v11  ;;  %v11349_v27 = vrot.slane %v11341_v62, %v14573_v42  ;;  %v11359_v1 = vcombine.low %v10852_v35, %v10856_v25  ;;  %v9729_v10 = vadd.f32 %v9728_v20, %v14580_v41  ;;  %v9747_v53 = vadd.f32 %v12917_v29, %v14588_v30 }
 0x300   : > { %11857 = vst.msk [vmem:[%s14623_s24 + $0x38] sm:$0xff] %vm11849_vm8, %v11408_v39  ;;  %v11356_v47 = vrot.slane %v11342_v56, %v14573_v42  ;;  %v11366_v18 = vrot.slane %v11358_v32, %v14573_v42  ;;  %v9898_v50 = vadd.f32 %v12942_v59, %v9735_v31  ;;  %v9741_v37 = vadd.f32 %v9740_v38, %v14538_v19 }
 0x301   : > { %v11373_v58 = vrot.slane %v11359_v1, %v14573_v42  ;;  %v9892_v2 = vadd.f32 %v9891_v23, %v9729_v10  ;;  %v9910_v17 = vadd.f32 %v12945_v26, %v9747_v53  ;;  %v14684_v41 = vadd.f32 %v12920_v28, %v14540_v44 }
 0x302   : > { %v11357_v30 = vcombine.low %v11349_v27, %v11356_v47  ;;  %v10222_v20 = vcombine.high %v9898_v50, %v9898_v50  ;;  %v10229_v29 = vrot.slane %v9898_v50, %v13999_v13  ;;  %v14687_v61 = vadd.f32 %v9903_v63, %v9741_v37 }
 0x303   : > { %v11374_v24 = vcombine.low %v11366_v18, %v11373_v58  ;;  %v10173_v34 = vcombine.high %v9892_v2, %v9892_v2  ;;  %v10180_v59 = vrot.slane %v9892_v2, %v13999_v13  ;;  %v10320_v19 = vcombine.high %v9910_v17, %v9910_v17 }
 0x304   : > { %11854 = vst.msk [vmem:[%s14623_s24 + $0x20] sm:$0xff] %vm11849_vm8, %v11357_v30  ;;  %v10236_v3 = vrot.slane %v10222_v20, %v13999_v13  ;;  %v10237_v8 = vcombine.high %v10229_v29, %v10229_v29  ;;  %v10245_v54 = vrot.slane %v10229_v29, %v13999_v13  ;;  %v10327_v44 = vrot.slane %v9910_v17, %v13999_v13 }
 0x305   : > { %11855 = vst.msk [vmem:[%s14623_s24 + $0x28] sm:$0xff] %vm11849_vm8, %v11374_v24  ;;  %v10187_v49 = vrot.slane %v10173_v34, %v13999_v13  ;;  %v10188_v23 = vcombine.high %v10180_v59, %v10180_v59  ;;  %v10196_v40 = vrot.slane %v10180_v59, %v13999_v13  ;;  %v10334_v0 = vrot.slane %v10320_v19, %v13999_v13 }
 0x306   : > { %v10238_v36 = vcombine.high %v10236_v3, %v10236_v3  ;;  %v10252_v57 = vrot.slane %v10236_v3, %v13999_v13  ;;  %v10259_v6 = vrot.slane %v10237_v8, %v13999_v13  ;;  %v10267_v51 = vcombine.high %v10245_v54, %v10245_v54 }
 0x307   : > { %v10924_v43 = vrot.slane %v10245_v54, %v14569_v22  ;;  %v10189_v14 = vcombine.high %v10187_v49, %v10187_v49  ;;  %v10203_v38 = vrot.slane %v10187_v49, %v13999_v13  ;;  %v10210_v21 = vrot.slane %v10188_v23, %v13999_v13 }
 0x308   : > { %v10266_v33 = vrot.slane %v10238_v36, %v13999_v13  ;;  %v10268_v4 = vcombine.high %v10252_v57, %v10252_v57  ;;  %v10269_v7 = vcombine.high %v10259_v6, %v10259_v6  ;;  %v10928_v5 = vrot.slane %v10259_v6, %v14569_v22 }
 0x309   : > { %v10932_v12 = vrot.slane %v10267_v51, %v14569_v22  ;;  %v10940_v46 = vrot.slane %v10252_v57, %v14569_v22  ;;  %v10217_v60 = vrot.slane %v10189_v14, %v13999_v13  ;;  %v10218_v11 = vcombine.high %v10196_v40, %v10196_v40 }
 0x30a   : > { %v10270_v26 = vcombine.high %v10266_v33, %v10266_v33  ;;  %v10936_v35 = vrot.slane %v10269_v7, %v14569_v22  ;;  %v10944_v25 = vrot.slane %v10266_v33, %v14569_v22  ;;  %v10948_v62 = vrot.slane %v10268_v4, %v14569_v22 }
 0x30b   : > { %v11443_v39 = vcombine.low %v10924_v43, %v10928_v5  ;;  %v10219_v56 = vcombine.high %v10203_v38, %v10203_v38  ;;  %v10220_v32 = vcombine.high %v10210_v21, %v10210_v21  ;;  %v10221_v31 = vcombine.high %v10217_v60, %v10217_v60 }
 0x30c   : > { %v10952_v28 = vrot.slane %v10270_v26, %v14569_v22  ;;  %v11444_v27 = vcombine.low %v10932_v12, %v10936_v35  ;;  %v11460_v1 = vcombine.low %v10940_v46, %v10944_v25  ;;  %v10892_v10 = vrot.slane %v10196_v40, %v14569_v22  ;;  %v9752_v12 = vpop.f32.mrf.mxu0  ;;  %v12948_v35 = vpop.f32.mrf.mxu1 }
 0x30d   : > { %v11451_v53 = vrot.slane %v11443_v39, %v14573_v42  ;;  %v10896_v47 = vrot.slane %v10210_v21, %v14569_v22  ;;  %v10900_v18 = vrot.slane %v10218_v11, %v14569_v22  ;;  %v10904_v50 = vrot.slane %v10220_v32, %v14569_v22 }
 0x30e   : > { %v11458_v37 = vrot.slane %v11444_v27, %v14573_v42  ;;  %v11461_v58 = vcombine.low %v10948_v62, %v10952_v28  ;;  %v11468_v63 = vrot.slane %v11460_v1, %v14573_v42  ;;  %v10908_v2 = vrot.slane %v10203_v38, %v14569_v22 }
 0x30f   : > { %v10912_v17 = vrot.slane %v10217_v60, %v14569_v22  ;;  %v10916_v30 = vrot.slane %v10219_v56, %v14569_v22  ;;  %v10920_v20 = vrot.slane %v10221_v31, %v14569_v22  ;;  %v11409_v29 = vcombine.low %v10892_v10, %v10896_v47 }
 0x310   : > { %v11459_v24 = vcombine.low %v11451_v53, %v11458_v37  ;;  %v11475_v34 = vrot.slane %v11461_v58, %v14573_v42  ;;  %v11410_v59 = vcombine.low %v10900_v18, %v10904_v50  ;;  %v10335_v19 = vcombine.high %v10327_v44, %v10327_v44 }
 0x311   : > { %v11417_v3 = vrot.slane %v11409_v29, %v14573_v42  ;;  %v11426_v8 = vcombine.low %v10908_v2, %v10912_v17  ;;  %v11427_v54 = vcombine.low %v10916_v30, %v10920_v20  ;;  %v10336_v49 = vcombine.high %v10334_v0, %v10334_v0 }
 0x312   : > { %v11476_v23 = vcombine.low %v11468_v63, %v11475_v34  ;;  %11860 = vst.msk [vmem:[%s14623_s24 + $0x50] sm:$0xff] %vm11849_vm8, %v11459_v24  ;;  %v11424_v40 = vrot.slane %v11410_v59, %v14573_v42  ;;  %v10343_v36 = vrot.slane %v10327_v44, %v13999_v13  ;;  %v10350_v57 = vrot.slane %v10334_v0, %v13999_v13 }
 0x313   : > { %v11434_v6 = vrot.slane %v11426_v8, %v14573_v42  ;;  %v11441_v51 = vrot.slane %v11427_v54, %v14573_v42  ;;  %v10357_v43 = vrot.slane %v10335_v19, %v13999_v13  ;;  %v10364_v14 = vrot.slane %v10336_v49, %v13999_v13 }
 0x314   : > { %11861 = vst.msk [vmem:[%s14623_s24 + $0x58] sm:$0xff] %vm11849_vm8, %v11476_v23  ;;  %v11425_v38 = vcombine.low %v11417_v3, %v11424_v40  ;;  %v10365_v21 = vcombine.high %v10343_v36, %v10343_v36  ;;  %v10366_v33 = vcombine.high %v10350_v57, %v10350_v57  ;;  %v10988_v4 = vrot.slane %v10343_v36, %v14569_v22 }
 0x315   : > { %v11442_v44 = vcombine.low %v11434_v6, %v11441_v51  ;;  %v10367_v7 = vcombine.high %v10357_v43, %v10357_v43  ;;  %v10368_v5 = vcombine.high %v10364_v14, %v10364_v14  ;;  %v10992_v0 = vrot.slane %v10357_v43, %v14569_v22 }
 0x316   : > { %11858 = vst.msk [vmem:[%s14623_s24 + $0x40] sm:$0xff] %vm11849_vm8, %v11425_v38  ;;  %v10996_v46 = vrot.slane %v10365_v21, %v14569_v22  ;;  %v11004_v60 = vrot.slane %v10350_v57, %v14569_v22  ;;  %v11008_v11 = vrot.slane %v10364_v14, %v14569_v22  ;;  %v11012_v26 = vrot.slane %v10366_v33, %v14569_v22  ;;  %v9915_v14 = vpop.f32.mrf.mxu1 }
 0x317   : > { %11859 = vst.msk [vmem:[%s14623_s24 + $0x48] sm:$0xff] %vm11849_vm8, %v11442_v44  ;;  %v11000_v25 = vrot.slane %v10367_v7, %v14569_v22  ;;  %v11016_v62 = vrot.slane %v10368_v5, %v14569_v22  ;;  %v11511_v39 = vcombine.low %v10988_v4, %v10992_v0  ;;  %v10271_v56 = vcombine.high %v14687_v61, %v14687_v61  ;;  %v12923_v44 = vpop.f32.mrf.mxu0 }
 0x318   : > { %v11528_v32 = vcombine.low %v11004_v60, %v11008_v11  ;;  %v10278_v31 = vrot.slane %v14687_v61, %v13999_v13  ;;  %v9922_v28 = vadd.f32 %v12948_v35, %v14684_v41  ;;  %v14756_v27 = vadd.f32 %v9752_v12, %v14542_v52 }
 0x319   : > { %v11512_v1 = vcombine.low %v10996_v46, %v11000_v25  ;;  %v11519_v10 = vrot.slane %v11511_v39, %v14573_v42  ;;  %v11529_v53 = vcombine.low %v11012_v26, %v11016_v62  ;;  %v10285_v47 = vrot.slane %v10271_v56, %v13999_v13  ;;  %v12951_v56 = vpop.f32.mrf.mxu1 }
 0x31a   : > { %v11536_v18 = vrot.slane %v11528_v32, %v14573_v42  ;;  %v10286_v50 = vcombine.high %v10278_v31, %v10278_v31  ;;  %v10294_v37 = vrot.slane %v10278_v31, %v13999_v13  ;;  %v10418_v58 = vcombine.high %v9922_v28, %v9922_v28 }
 0x31b   : > { %v11526_v63 = vrot.slane %v11512_v1, %v14573_v42  ;;  %v11543_v41 = vrot.slane %v11529_v53, %v14573_v42  ;;  %v10287_v52 = vcombine.high %v10285_v47, %v10285_v47  ;;  %v10301_v61 = vrot.slane %v10285_v47, %v13999_v13 }
 0x31c   : > { %v10308_v2 = vrot.slane %v10286_v50, %v13999_v13  ;;  %v10316_v17 = vcombine.high %v10294_v37, %v10294_v37  ;;  %v10956_v30 = vrot.slane %v10294_v37, %v14569_v22  ;;  %v10425_v20 = vrot.slane %v9922_v28, %v13999_v13 }
 0x31d   : > { %v11527_v29 = vcombine.low %v11519_v10, %v11526_v63  ;;  %v11544_v24 = vcombine.low %v11536_v18, %v11543_v41  ;;  %v10315_v34 = vrot.slane %v10287_v52, %v13999_v13  ;;  %v10317_v59 = vcombine.high %v10301_v61, %v10301_v61  ;;  %v9764_v10 = vpop.f32.mrf.mxu0 }
 0x31e   : > { %v10318_v19 = vcombine.high %v10308_v2, %v10308_v2  ;;  %v10960_v3 = vrot.slane %v10308_v2, %v14569_v22  ;;  %v10964_v8 = vrot.slane %v10316_v17, %v14569_v22  ;;  %v10972_v54 = vrot.slane %v10301_v61, %v14569_v22 }
 0x31f   : > { %11864 = vst.msk [vmem:[%s14623_s24 + $0x70] sm:$0xff] %vm11849_vm8, %v11527_v29  ;;  %11865 = vst.msk [vmem:[%s14623_s24 + $0x78] sm:$0xff] %vm11849_vm8, %v11544_v24  ;;  %v10319_v49 = vcombine.high %v10315_v34, %v10315_v34  ;;  %v10976_v23 = vrot.slane %v10315_v34, %v14569_v22  ;;  %v10980_v40 = vrot.slane %v10317_v59, %v14569_v22 }
 0x320   : > { %v10432_v36 = vrot.slane %v10418_v58, %v13999_v13  ;;  %v10968_v57 = vrot.slane %v10318_v19, %v14569_v22  ;;  %v11477_v6 = vcombine.low %v10956_v30, %v10960_v3  ;;  %v10433_v51 = vcombine.high %v10425_v20, %v10425_v20  ;;  %v9927_v30 = vpop.f32.mrf.mxu1 }
 0x321   : > { %v10441_v43 = vrot.slane %v10425_v20, %v13999_v13  ;;  %v10984_v38 = vrot.slane %v10319_v49, %v14569_v22  ;;  %v11494_v21 = vcombine.low %v10972_v54, %v10976_v23  ;;  %v9916_v41 = vadd.f32 %v9915_v14, %v14756_v27 }
 0x322   : > { %v10434_v33 = vcombine.high %v10432_v36, %v10432_v36  ;;  %v10448_v4 = vrot.slane %v10432_v36, %v13999_v13  ;;  %v11478_v7 = vcombine.low %v10964_v8, %v10968_v57  ;;  %v11485_v5 = vrot.slane %v11477_v6, %v14573_v42 }
 0x323   : > { %v10455_v0 = vrot.slane %v10433_v51, %v13999_v13  ;;  %v10463_v12 = vcombine.high %v10441_v43, %v10441_v43  ;;  %v11495_v46 = vcombine.low %v10980_v40, %v10984_v38  ;;  %v11502_v60 = vrot.slane %v11494_v21, %v14573_v42 }
 0x324   : > { %v10462_v11 = vrot.slane %v10434_v33, %v13999_v13  ;;  %v10464_v26 = vcombine.high %v10448_v4, %v10448_v4  ;;  %v11492_v35 = vrot.slane %v11478_v7, %v14573_v42  ;;  %v11052_v62 = vrot.slane %v10441_v43, %v14569_v22 }
 0x325   : > { %v10465_v25 = vcombine.high %v10455_v0, %v10455_v0  ;;  %v11056_v39 = vrot.slane %v10455_v0, %v14569_v22  ;;  %v11509_v32 = vrot.slane %v11495_v46, %v14573_v42  ;;  %v11060_v28 = vrot.slane %v10463_v12, %v14569_v22 }
 0x326   : > { %v10466_v31 = vcombine.high %v10462_v11, %v10462_v11  ;;  %v11068_v1 = vrot.slane %v10448_v4, %v14569_v22  ;;  %v11493_v53 = vcombine.low %v11485_v5, %v11492_v35  ;;  %v11072_v18 = vrot.slane %v10462_v11, %v14569_v22 }
 0x327   : > { %v11064_v47 = vrot.slane %v10465_v25, %v14569_v22  ;;  %v11076_v50 = vrot.slane %v10464_v26, %v14569_v22  ;;  %v11510_v37 = vcombine.low %v11502_v60, %v11509_v32  ;;  %v11579_v63 = vcombine.low %v11052_v62, %v11056_v39 }
 0x328   : > { %v11080_v58 = vrot.slane %v10466_v31, %v14569_v22  ;;  %11862 = vst.msk [vmem:[%s14623_s24 + $0x60] sm:$0xff] %vm11849_vm8, %v11493_v53  ;;  %v11596_v61 = vcombine.low %v11068_v1, %v11072_v18  ;;  %v9771_v2 = vadd.f32 %v12923_v44, %v14544_v9  ;;  %v9765_v17 = vadd.f32 %v9764_v10, %v14548_v16 }
 0x329   : > { %v11580_v52 = vcombine.low %v11060_v28, %v11064_v47  ;;  %11863 = vst.msk [vmem:[%s14623_s24 + $0x68] sm:$0xff] %vm11849_vm8, %v11510_v37  ;;  %v11587_v20 = vrot.slane %v11579_v63, %v14573_v42  ;;  %v10369_v24 = vcombine.high %v9916_v41, %v9916_v41  ;;  %v10376_v34 = vrot.slane %v9916_v41, %v13999_v13 }
 0x32a   : > { %v11597_v29 = vcombine.low %v11076_v50, %v11080_v58  ;;  %v11604_v27 = vrot.slane %v11596_v61, %v14573_v42  ;;  %v9934_v19 = vadd.f32 %v12951_v56, %v9771_v2  ;;  %v14808_v3 = vadd.f32 %v9927_v30, %v9765_v17  ;;  %v12926_v30 = vpop.f32.mrf.mxu0 }
 0x32b   : > { %v11594_v59 = vrot.slane %v11580_v52, %v14573_v42  ;;  %v10383_v16 = vrot.slane %v10369_v24, %v13999_v13  ;;  %v10384_v8 = vcombine.high %v10376_v34, %v10376_v34  ;;  %v10392_v54 = vrot.slane %v10376_v34, %v13999_v13 }
 0x32c   : > { %v11611_v9 = vrot.slane %v11597_v29, %v14573_v42  ;;  %v10516_v23 = vcombine.high %v9934_v19, %v9934_v19  ;;  %v10523_v40 = vrot.slane %v9934_v19, %v13999_v13  ;;  %v10467_v36 = vcombine.high %v14808_v3, %v14808_v3 }
 0x32d   : > { %v11595_v49 = vcombine.low %v11587_v20, %v11594_v59  ;;  %v10385_v6 = vcombine.high %v10383_v16, %v10383_v16  ;;  %v10399_v51 = vrot.slane %v10383_v16, %v13999_v13  ;;  %v10406_v43 = vrot.slane %v10384_v8, %v13999_v13 }
 0x32e   : > { %v11612_v57 = vcombine.low %v11604_v27, %v11611_v9  ;;  %v10414_v14 = vcombine.high %v10392_v54, %v10392_v54  ;;  %v11020_v38 = vrot.slane %v10392_v54, %v14569_v22  ;;  %v10530_v21 = vrot.slane %v10516_v23, %v13999_v13 }
 0x32f   : > { %11868 = vst.msk [vmem:[%s14623_s24 + $0x90] sm:$0xff] %vm11849_vm8, %v11595_v49  ;;  %v10531_v33 = vcombine.high %v10523_v40, %v10523_v40  ;;  %v10413_v4 = vrot.slane %v10385_v6, %v13999_v13  ;;  %v10415_v44 = vcombine.high %v10399_v51, %v10399_v51  ;;  %v10416_v7 = vcombine.high %v10406_v43, %v10406_v43 }
 0x330   : > { %11869 = vst.msk [vmem:[%s14623_s24 + $0x98] sm:$0xff] %vm11849_vm8, %v11612_v57  ;;  %v11024_v5 = vrot.slane %v10406_v43, %v14569_v22  ;;  %v11028_v0 = vrot.slane %v10414_v14, %v14569_v22  ;;  %v11036_v12 = vrot.slane %v10399_v51, %v14569_v22  ;;  %v10532_v46 = vcombine.high %v10530_v21, %v10530_v21  ;;  %v9776_v51 = vpop.f32.mrf.mxu0  ;;  %v12954_v43 = vpop.f32.mrf.mxu1 }
 0x331   : > { %v10539_v60 = vrot.slane %v10523_v40, %v13999_v13  ;;  %v10417_v11 = vcombine.high %v10413_v4, %v10413_v4  ;;  %v11032_v26 = vrot.slane %v10416_v7, %v14569_v22  ;;  %v11040_v35 = vrot.slane %v10413_v4, %v14569_v22 }
 0x332   : > { %v11044_v25 = vrot.slane %v10415_v44, %v14569_v22  ;;  %v11545_v62 = vcombine.low %v11020_v38, %v11024_v5  ;;  %v10546_v39 = vrot.slane %v10530_v21, %v13999_v13  ;;  %v10553_v56 = vrot.slane %v10531_v33, %v13999_v13 }
 0x333   : > { %v10560_v32 = vrot.slane %v10532_v46, %v13999_v13  ;;  %v11048_v31 = vrot.slane %v10417_v11, %v14569_v22  ;;  %v11546_v28 = vcombine.low %v11028_v0, %v11032_v26  ;;  %v11562_v1 = vcombine.low %v11036_v12, %v11040_v35  ;;  %v12929_v26 = vpop.f32.mrf.mxu0 }
 0x334   : > { %v10561_v10 = vcombine.high %v10539_v60, %v10539_v60  ;;  %v11553_v53 = vrot.slane %v11545_v62, %v14573_v42  ;;  %v10562_v47 = vcombine.high %v10546_v39, %v10546_v39  ;;  %v10563_v18 = vcombine.high %v10553_v56, %v10553_v56 }
 0x335   : > { %v10564_v50 = vcombine.high %v10560_v32, %v10560_v32  ;;  %v11560_v37 = vrot.slane %v11546_v28, %v14573_v42  ;;  %v11563_v58 = vcombine.low %v11044_v25, %v11048_v31  ;;  %v11570_v63 = vrot.slane %v11562_v1, %v14573_v42 }
 0x336   : > { %v11116_v41 = vrot.slane %v10539_v60, %v14569_v22  ;;  %v11120_v52 = vrot.slane %v10553_v56, %v14569_v22  ;;  %v11124_v61 = vrot.slane %v10561_v10, %v14569_v22  ;;  %v11128_v2 = vrot.slane %v10563_v18, %v14569_v22  ;;  %v9939_v18 = vpop.f32.mrf.mxu1 }
 0x337   : > { %v11132_v17 = vrot.slane %v10546_v39, %v14569_v22  ;;  %v11561_v20 = vcombine.low %v11553_v53, %v11560_v37  ;;  %v11577_v29 = vrot.slane %v11563_v58, %v14573_v42  ;;  %v11136_v24 = vrot.slane %v10560_v32, %v14569_v22 }
 0x338   : > { %v11140_v34 = vrot.slane %v10562_v47, %v14569_v22  ;;  %v11144_v59 = vrot.slane %v10564_v50, %v14569_v22  ;;  %v11647_v27 = vcombine.low %v11116_v41, %v11120_v52  ;;  %v11648_v19 = vcombine.low %v11124_v61, %v11128_v2 }
 0x339   : > { %v10474_v9 = vrot.slane %v14808_v3, %v13999_v13  ;;  %v11578_v16 = vcombine.low %v11570_v63, %v11577_v29  ;;  %11866 = vst.msk [vmem:[%s14623_s24 + $0x80] sm:$0xff] %vm11849_vm8, %v11561_v20  ;;  %v11664_v8 = vcombine.low %v11132_v17, %v11136_v24  ;;  %v10481_v54 = vrot.slane %v10467_v36, %v13999_v13 }
 0x33a   : > { %v9783_v49 = vadd.f32 %v12926_v30, %v14552_v55  ;;  %v11655_v23 = vrot.slane %v11647_v27, %v14573_v42  ;;  %v11662_v40 = vrot.slane %v11648_v19, %v14573_v42  ;;  %v11665_v57 = vcombine.low %v11140_v34, %v11144_v59 }
 0x33b   : > { %v10482_v6 = vcombine.high %v10474_v9, %v10474_v9  ;;  %11867 = vst.msk [vmem:[%s14623_s24 + $0x88] sm:$0xff] %vm11849_vm8, %v11578_v16  ;;  %v11672_v3 = vrot.slane %v11664_v8, %v14573_v42  ;;  %v10483_v14 = vcombine.high %v10481_v54, %v10481_v54  ;;  %v10490_v38 = vrot.slane %v10474_v9, %v13999_v13 }
 0x33c   : > { %v10497_v36 = vrot.slane %v10481_v54, %v13999_v13  ;;  %v11663_v21 = vcombine.low %v11655_v23, %v11662_v40  ;;  %v11679_v55 = vrot.slane %v11665_v57, %v14573_v42  ;;  %v9946_v4 = vadd.f32 %v12954_v43, %v9783_v49  ;;  %v9788_v23 = vpop.f32.mrf.mxu0  ;;  %v12957_v40 = vpop.f32.mrf.mxu1 }
 0x33d   : > { %v10504_v33 = vrot.slane %v10482_v6, %v13999_v13  ;;  %v10511_v44 = vrot.slane %v10483_v14, %v13999_v13  ;;  %v10512_v7 = vcombine.high %v10490_v38, %v10490_v38  ;;  %v11084_v0 = vrot.slane %v10490_v38, %v14569_v22 }
 0x33e   : > { %v10513_v5 = vcombine.high %v10497_v36, %v10497_v36  ;;  %v11680_v12 = vcombine.low %v11672_v3, %v11679_v55  ;;  %11872 = vst.msk [vmem:[%s14623_s24 + $0xb0] sm:$0xff] %vm11849_vm8, %v11663_v21  ;;  %v11100_v11 = vrot.slane %v10497_v36, %v14569_v22  ;;  %v10614_v31 = vcombine.high %v9946_v4, %v9946_v4 }
 0x33f   : > { %v10514_v46 = vcombine.high %v10504_v33, %v10504_v33  ;;  %v11088_v60 = vrot.slane %v10504_v33, %v14569_v22  ;;  %v10515_v35 = vcombine.high %v10511_v44, %v10511_v44  ;;  %v11092_v25 = vrot.slane %v10512_v7, %v14569_v22 }
 0x340   : > { %v11104_v62 = vrot.slane %v10511_v44, %v14569_v22  ;;  %v11108_v39 = vrot.slane %v10513_v5, %v14569_v22  ;;  %11873 = vst.msk [vmem:[%s14623_s24 + $0xb8] sm:$0xff] %vm11849_vm8, %v11680_v12  ;;  %v10621_v28 = vrot.slane %v9946_v4, %v13999_v13  ;;  %v9777_v53 = vadd.f32 %v9776_v51, %v14554_v15 }
 0x341   : > { %v11096_v56 = vrot.slane %v10514_v46, %v14569_v22  ;;  %v11613_v32 = vcombine.low %v11084_v0, %v11088_v60  ;;  %v11112_v1 = vrot.slane %v10515_v35, %v14569_v22  ;;  %v9795_v47 = vadd.f32 %v12929_v26, %v14558_v45 }
 0x342   : > { %v11630_v10 = vcombine.low %v11100_v11, %v11104_v62  ;;  %v10628_v58 = vrot.slane %v10614_v31, %v13999_v13  ;;  %v10629_v63 = vcombine.high %v10621_v28, %v10621_v28  ;;  %v10637_v61 = vrot.slane %v10621_v28, %v13999_v13 }
 0x343   : > { %v11614_v50 = vcombine.low %v11092_v25, %v11096_v56  ;;  %v11621_v37 = vrot.slane %v11613_v32, %v14573_v42  ;;  %v11631_v41 = vcombine.low %v11108_v39, %v11112_v1  ;;  %v9940_v2 = vadd.f32 %v9939_v18, %v9777_v53 }
 0x344   : > { %v11638_v52 = vrot.slane %v11630_v10, %v14573_v42  ;;  %v10630_v30 = vcombine.high %v10628_v58, %v10628_v58  ;;  %v10644_v15 = vrot.slane %v10628_v58, %v13999_v13  ;;  %v10651_v45 = vrot.slane %v10629_v63, %v13999_v13 }
 0x345   : > { %v11628_v17 = vrot.slane %v11614_v50, %v14573_v42  ;;  %v11645_v20 = vrot.slane %v11631_v41, %v14573_v42  ;;  %v10659_v29 = vcombine.high %v10637_v61, %v10637_v61  ;;  %v11180_v24 = vrot.slane %v10637_v61, %v14569_v22 }
 0x346   : > { %v10565_v34 = vcombine.high %v9940_v2, %v9940_v2  ;;  %v10658_v27 = vrot.slane %v10630_v30, %v13999_v13  ;;  %v10660_v19 = vcombine.high %v10644_v15, %v10644_v15  ;;  %v10661_v9 = vcombine.high %v10651_v45, %v10651_v45 }
 0x347   : > { %v11629_v59 = vcombine.low %v11621_v37, %v11628_v17  ;;  %v11646_v16 = vcombine.low %v11638_v52, %v11645_v20  ;;  %v11184_v8 = vrot.slane %v10651_v45, %v14569_v22  ;;  %v11188_v54 = vrot.slane %v10659_v29, %v14569_v22  ;;  %v9951_v37 = vpop.f32.mrf.mxu1 }
 0x348   : > { %v11196_v49 = vrot.slane %v10644_v15, %v14569_v22  ;;  %v10662_v57 = vcombine.high %v10658_v27, %v10658_v27  ;;  %v11192_v6 = vrot.slane %v10661_v9, %v14569_v22  ;;  %v11200_v51 = vrot.slane %v10658_v27, %v14569_v22 }
 0x349   : > { %11870 = vst.msk [vmem:[%s14623_s24 + $0xa0] sm:$0xff] %vm11849_vm8, %v11629_v59  ;;  %v11204_v43 = vrot.slane %v10660_v19, %v14569_v22  ;;  %11871 = vst.msk [vmem:[%s14623_s24 + $0xa8] sm:$0xff] %vm11849_vm8, %v11646_v16  ;;  %v11715_v3 = vcombine.low %v11180_v24, %v11184_v8  ;;  %v10572_v14 = vrot.slane %v9940_v2, %v13999_v13 }
 0x34a   : > { %v10579_v38 = vrot.slane %v10565_v34, %v13999_v13  ;;  %v9958_v36 = vadd.f32 %v12957_v40, %v9795_v47  ;;  %v11208_v21 = vrot.slane %v10662_v57, %v14569_v22  ;;  %v11716_v55 = vcombine.low %v11188_v54, %v11192_v6 }
 0x34b   : > { %v11732_v33 = vcombine.low %v11196_v49, %v11200_v51  ;;  %v9789_v4 = vadd.f32 %v9788_v23, %v14561_v48  ;;  %v11723_v44 = vrot.slane %v11715_v3, %v14573_v42  ;;  %v10580_v7 = vcombine.high %v10572_v14, %v10572_v14 }
 0x34c   : > { %v10581_v5 = vcombine.high %v10579_v38, %v10579_v38  ;;  %v10588_v0 = vrot.slane %v10572_v14, %v13999_v13  ;;  %v11730_v12 = vrot.slane %v11716_v55, %v14573_v42  ;;  %v11733_v46 = vcombine.low %v11204_v43, %v11208_v21 }
 0x34d   : > { %v11740_v60 = vrot.slane %v11732_v33, %v14573_v42  ;;  %v10595_v11 = vrot.slane %v10579_v38, %v13999_v13  ;;  %v10602_v26 = vrot.slane %v10580_v7, %v13999_v13  ;;  %v10712_v50 = vcombine.high %v9958_v36, %v9958_v36 }
 0x34e   : > { %v10609_v35 = vrot.slane %v10581_v5, %v13999_v13  ;;  %v10610_v25 = vcombine.high %v10588_v0, %v10588_v0  ;;  %v11148_v48 = vrot.slane %v10588_v0, %v14569_v22  ;;  %v11731_v62 = vcombine.low %v11723_v44, %v11730_v12 }
 0x34f   : > { %v11747_v39 = vrot.slane %v11733_v46, %v14573_v42  ;;  %v10611_v56 = vcombine.high %v10595_v11, %v10595_v11  ;;  %v11164_v32 = vrot.slane %v10595_v11, %v14569_v22  ;;  %v10612_v31 = vcombine.high %v10602_v26, %v10602_v26 }
 0x350   : > { %v10613_v28 = vcombine.high %v10609_v35, %v10609_v35  ;;  %v11152_v1 = vrot.slane %v10602_v26, %v14569_v22  ;;  %v11156_v10 = vrot.slane %v10610_v25, %v14569_v22  ;;  %11876 = vst.msk [vmem:[%s14623_s24 + $0xd0] sm:$0xff] %vm11849_vm8, %v11731_v62  ;;  %v11168_v47 = vrot.slane %v10609_v35, %v14569_v22 }
 0x351   : > { %v11748_v53 = vcombine.low %v11740_v60, %v11747_v39  ;;  %v11172_v18 = vrot.slane %v10611_v56, %v14569_v22  ;;  %v11160_v58 = vrot.slane %v10612_v31, %v14569_v22  ;;  %v10719_v52 = vrot.slane %v9958_v36, %v13999_v13 }
 0x352   : > { %v11176_v63 = vrot.slane %v10613_v28, %v14569_v22  ;;  %v11681_v41 = vcombine.low %v11148_v48, %v11152_v1  ;;  %v11698_v61 = vcombine.low %v11164_v32, %v11168_v47  ;;  %v10726_v2 = vrot.slane %v10712_v50, %v13999_v13 }
 0x353   : > { %11877 = vst.msk [vmem:[%s14623_s24 + $0xd8] sm:$0xff] %vm11849_vm8, %v11748_v53  ;;  %v9952_v17 = vadd.f32 %v9951_v37, %v9789_v4  ;;  %v11682_v30 = vcombine.low %v11156_v10, %v11160_v58  ;;  %v10727_v20 = vcombine.high %v10719_v52, %v10719_v52  ;;  %v10735_v34 = vrot.slane %v10719_v52, %v13999_v13 }
 0x354   : > { %v11689_v15 = vrot.slane %v11681_v41, %v14573_v42  ;;  %v11699_v45 = vcombine.low %v11172_v18, %v11176_v63  ;;  %v11706_v29 = vrot.slane %v11698_v61, %v14573_v42  ;;  %v10728_v24 = vcombine.high %v10726_v2, %v10726_v2 }
 0x355   : > { %v10742_v59 = vrot.slane %v10726_v2, %v13999_v13  ;;  %v11696_v27 = vrot.slane %v11682_v30, %v14573_v42  ;;  %v10749_v9 = vrot.slane %v10727_v20, %v13999_v13  ;;  %v10663_v16 = vcombine.high %v9952_v17, %v9952_v17 }
 0x356   : > { %v11713_v19 = vrot.slane %v11699_v45, %v14573_v42  ;;  %v10756_v8 = vrot.slane %v10728_v24, %v13999_v13  ;;  %v10757_v54 = vcombine.high %v10735_v34, %v10735_v34  ;;  %v11244_v23 = vrot.slane %v10735_v34, %v14569_v22 }
 0x357   : > { %v10758_v49 = vcombine.high %v10742_v59, %v10742_v59  ;;  %v11697_v40 = vcombine.low %v11689_v15, %v11696_v27  ;;  %v10759_v6 = vcombine.high %v10749_v9, %v10749_v9  ;;  %v11248_v51 = vrot.slane %v10749_v9, %v14569_v22 }
 0x358   : > { %v11714_v57 = vcombine.low %v11706_v29, %v11713_v19  ;;  %v10760_v43 = vcombine.high %v10756_v8, %v10756_v8  ;;  %v11260_v3 = vrot.slane %v10742_v59, %v14569_v22  ;;  %v11264_v14 = vrot.slane %v10756_v8, %v14569_v22 }
 0x359   : > { %11874 = vst.msk [vmem:[%s14623_s24 + $0xc0] sm:$0xff] %vm11849_vm8, %v11697_v40  ;;  %v11252_v38 = vrot.slane %v10757_v54, %v14569_v22  ;;  %v11256_v36 = vrot.slane %v10759_v6, %v14569_v22  ;;  %v11783_v21 = vcombine.low %v11244_v23, %v11248_v51  ;;  %v10670_v55 = vrot.slane %v9952_v17, %v13999_v13 }
 0x35a   : > { %11875 = vst.msk [vmem:[%s14623_s24 + $0xc8] sm:$0xff] %vm11849_vm8, %v11714_v57  ;;  %v11268_v33 = vrot.slane %v10758_v49, %v14569_v22  ;;  %v11272_v4 = vrot.slane %v10760_v43, %v14569_v22  ;;  %v11800_v44 = vcombine.low %v11260_v3, %v11264_v14  ;;  %v10677_v7 = vrot.slane %v10663_v16, %v13999_v13 }
 0x35b   : > { %v11784_v5 = vcombine.low %v11252_v38, %v11256_v36  ;;  %v10678_v0 = vcombine.high %v10670_v55, %v10670_v55  ;;  %v10686_v12 = vrot.slane %v10670_v55, %v13999_v13  ;;  %v11791_v26 = vrot.slane %v11783_v21, %v14573_v42 }
 0x35c   : > { %v11801_v46 = vcombine.low %v11268_v33, %v11272_v4  ;;  %v10679_v60 = vcombine.high %v10677_v7, %v10677_v7  ;;  %v10693_v11 = vrot.slane %v10677_v7, %v13999_v13  ;;  %v11808_v62 = vrot.slane %v11800_v44, %v14573_v42 }
 0x35d   : > { %v11798_v35 = vrot.slane %v11784_v5, %v14573_v42  ;;  %v10700_v25 = vrot.slane %v10678_v0, %v13999_v13  ;;  %v10708_v48 = vcombine.high %v10686_v12, %v10686_v12  ;;  %v11212_v1 = vrot.slane %v10686_v12, %v14569_v22 }
 0x35e   : > { %v11815_v39 = vrot.slane %v11801_v46, %v14573_v42  ;;  %v10707_v56 = vrot.slane %v10679_v60, %v13999_v13  ;;  %v10709_v32 = vcombine.high %v10693_v11, %v10693_v11  ;;  %v11228_v18 = vrot.slane %v10693_v11, %v14569_v22 }
 0x35f   : > { %v11799_v31 = vcombine.low %v11791_v26, %v11798_v35  ;;  %v10710_v28 = vcombine.high %v10700_v25, %v10700_v25  ;;  %v11216_v10 = vrot.slane %v10700_v25, %v14569_v22  ;;  %v11220_v37 = vrot.slane %v10708_v48, %v14569_v22 }
 0x360   : > { %v11816_v53 = vcombine.low %v11808_v62, %v11815_v39  ;;  %v10711_v47 = vcombine.high %v10707_v56, %v10707_v56  ;;  %v11232_v50 = vrot.slane %v10707_v56, %v14569_v22  ;;  %v11236_v63 = vrot.slane %v10709_v32, %v14569_v22 }
 0x361   : > { %11880 = vst.msk [vmem:[%s14623_s24 + $0xf0] sm:$0xff] %vm11849_vm8, %v11799_v31  ;;  %v11224_v13 = vrot.slane %v10710_v28, %v14569_v22  ;;  %v11749_v58 = vcombine.low %v11212_v1, %v11216_v10 }
 0x362   : > { %11881 = vst.msk [vmem:[%s14623_s24 + $0xf8] sm:$0xff] %vm11849_vm8, %v11816_v53  ;;  %v11240_v41 = vrot.slane %v10711_v47, %v14569_v22  ;;  %v11766_v52 = vcombine.low %v11228_v18, %v11232_v50 }
 0x363   : > { %v11750_v61 = vcombine.low %v11220_v37, %v11224_v13  ;;  %v11757_v17 = vrot.slane %v11749_v58, %v14573_v42 }
 0x364   : > { %v11767_v2 = vcombine.low %v11236_v63, %v11240_v41  ;;  %v11774_v15 = vrot.slane %v11766_v52, %v14573_v42 }
 0x365   : > { %v11764_v30 = vrot.slane %v11750_v61, %v14573_v42 }
 0x366   : > { %v11781_v45 = vrot.slane %v11767_v2, %v14573_v42 }
 0x367   : > { %v11765_v20 = vcombine.low %v11757_v17, %v11764_v30 }
 0x368   : > { %v11782_v22 = vcombine.low %v11774_v15, %v11781_v45 }
 0x369   : > { %11878 = vst.msk [vmem:[%s14623_s24 + $0xe0] sm:$0xff] %vm11849_vm8, %v11765_v20 }
 0x36a   : > { %11879 = vst.msk [vmem:[%s14623_s24 + $0xe8] sm:$0xff] %vm11849_vm8, %v11782_v22 }
 0x36b   : > { %13072 = shalt.err (!%p13069_p6)
}
 0x36c   : > { %s13073_s12 = scalar_lea.hbm %s14976_s8, 4096  ;;  %s13077_s21 = scalar_lea.hbm %s15034_s4, 8192 }
 0x36d   : > { %p13074_p7 = scmp.ne.s32.totalorder %s14976_s8, %s13073_s12  ;;  %p13078_p13 = scmp.lt.s32.totalorder %s14976_s8, %s15034_s4 }
 0x36e   : > { %p13079_p2 = scmp.lt.s32.totalorder %s13077_s21, %s13073_s12 }
 0x36f   : > { %p13075_p10 = pnand %p13074_p7, %p13228_p9 }
 0x370   : > { %p13080_p8 = por %p13079_p2, %p13078_p13 }
 0x371   : > { %p13076_p4 = pneg %p13075_p10 }
 0x373   : > { %p13081_p12 = pnand %p13080_p8, %p13076_p4 }
 0x375   : > { %13084 = shalt.err (!%p13081_p12)
}
 0x376   : > { %s13150_s26 = smov 128   ;;  %s13151_s5 = smov 8  }
 0x377   : > { %12960 = dma.vmem_to_hbm [thread:$0]  (%p13228_p9), %s14978_s25, 4096, %s14976_s8, %s11883_s18, %s13150_s26, %s13150_s26, %s13151_s5  }
 0x378 PF: > { %s11913_s7 = sand.u32 1, %s13119_s15   ;;  %p15040_p0 = scmp.ge.s32.totalorder %s13139_s20, 2 }
 0x379   : > { %s11914_s9 = scalar_lea.sflag [#allocation5], %s11913_s7 }
 0x37a   : > { %p12967_p1 = pnand %p15040_p0, %p13235_p11 }
 0x37c   : > { %p12968_p3 = pneg %p12967_p1 }
 0x37e   : > { %13114 = dma.done.wait (%p12968_p3), %s11914_s9, 4096  }
 0x37f   : > { %13116 = vsyncadd (%p12968_p3), %s11914_s9, 4294963200  ;;  %s20_s20 = sadd.s32 1, %s13139_s20   ;;  %s15041_s15 = smov %s13123_s16 }
 0x380   : > { %p17_p5 = scmp.ge.s32.totalorder %s20_s20, 4   ;;  %s15042_s16 = smov %s13127_s17 }
 0x381   : > { %s15043_s17 = smov %s13233_s29  ;;  %s15044_s18 = smov %s13135_s19 }
 0x382   : > { %s15045_s19 = smov %s15047_s23  ;;  %19 = sbr.rel (!%p17_p5) target bundleno = 6 (0x6), region = 81 }
 0x387   :  { %11919 = vsyncpa [#allocation4], 1 }
 0x388   :  { %11921 = vsyncpa [#allocation4 + $0x1], 1 }
 0x389   :  { %11922 = vsyncpa [#allocation5], 1 }
 0x38a   :  { %11924 = vsyncpa [#allocation5 + $0x1], 1 }

</bundles_post_ra>
